<compile_context>
chip_gen: v5e
topology: v5e:2x2
jax: 0.10.0
libtpu: 0.0.40
codegen_flags: <defaults>
</compile_context>

<pallas_src>
import functools
import math

import jax
import jax.numpy as jnp
from jax.experimental import pallas as pl
from jax.experimental.pallas import tpu as pltpu


# --------------------------------------------------------------------------
# In-kernel helpers (traced inside the fused kernel)
# --------------------------------------------------------------------------

def _layernorm(x, g, b, eps):
    mean = jnp.mean(x, axis=-1, keepdims=True)
    xc = x - mean
    var = jnp.mean(xc * xc, axis=-1, keepdims=True)
    return xc * jax.lax.rsqrt(var + eps) * g + b


def _gelu(x):
    # TODO(synk): torch.nn.GELU() defaults to exact erf; the tanh approximation
    # (max abs err ~1e-3) is used so the transcendental runs on the EUP.
    c = 0.7978845608028654  # sqrt(2/pi)
    return 0.5 * x * (1.0 + jnp.tanh(c * (x + 0.044715 * (x * x * x))))


# --------------------------------------------------------------------------
# Fused ViT forward kernel (one grid step == one image)
# --------------------------------------------------------------------------

def _vit_fused_kernel(*refs, num_heads, num_layers, seq, eps):
    patches_ref, emb_add_ref, conv_w_ref = refs[:3]
    blk_refs = refs[3:3 + 12 * num_layers]
    (ln_g_ref, ln_b_ref, head_w_ref,
     head_b_ref) = refs[3 + 12 * num_layers:7 + 12 * num_layers]
    out_ref = refs[7 + 12 * num_layers]

    sp, e = emb_add_ref.shape          # sublane-padded sequence, hidden
    dh = e // num_heads

    # Patch embedding + [cls; tokens] + positional embedding as matmul + add.
    # (cls / pad rows of `patches` are zero; emb_add injects cls token,
    #  positional embedding and conv bias.)
    x = (jnp.dot(patches_ref[...].astype(jnp.bfloat16), conv_w_ref[...],
                 preferred_element_type=jnp.float32) + emb_add_ref[...])

    # Additive softmax bias masking the padded key rows (built once, (sp, sp)).
    kidx = jax.lax.broadcasted_iota(jnp.int32, (sp, sp), 1)
    key_bias = jnp.where(kidx < seq, 0.0, -1e30).astype(jnp.float32)

    # ---- Pre-LN transformer encoder blocks (fully unrolled).
    for l in range(num_layers):
        (ln1_g, ln1_b, w_qkv, b_qkv, w_out, b_out,
         ln2_g, ln2_b, w_m1, b_m1, w_m2, b_m2) = blk_refs[12 * l:12 * (l + 1)]

        # --- Self-attention. 1/sqrt(dh) already folded into the Q columns.
        y = _layernorm(x, ln1_g[...], ln1_b[...], eps)
        qkv = (jnp.dot(y.astype(jnp.bfloat16), w_qkv[...],
                       preferred_element_type=jnp.float32) + b_qkv[...])
        heads = []
        for h in range(num_heads):
            c0 = h * dh
            q = qkv[:, c0:c0 + dh].astype(jnp.bfloat16)
            k = qkv[:, e + c0:e + c0 + dh].astype(jnp.bfloat16)
            v = qkv[:, 2 * e + c0:2 * e + c0 + dh].astype(jnp.bfloat16)
            s = jax.lax.dot_general(q, k, (((1,), (1,)), ((), ())),
                                    preferred_element_type=jnp.float32)
            s = s + key_bias
            p = jnp.exp(s - jnp.max(s, axis=-1, keepdims=True))
            p = p * pl.reciprocal(jnp.sum(p, axis=-1, keepdims=True),
                                  approx=True)
            heads.append(jnp.dot(p.astype(jnp.bfloat16), v,
                                 preferred_element_type=jnp.float32))
        ctx = jnp.concatenate(heads, axis=-1)          # [sp, e], in registers
        x = x + (jnp.dot(ctx.astype(jnp.bfloat16), w_out[...],
                         preferred_element_type=jnp.float32) + b_out[...])

        # --- MLP.
        y = _layernorm(x, ln2_g[...], ln2_b[...], eps)
        h1 = _gelu(jnp.dot(y.astype(jnp.bfloat16), w_m1[...],
                           preferred_element_type=jnp.float32) + b_m1[...])
        x = x + (jnp.dot(h1.astype(jnp.bfloat16), w_m2[...],
                         preferred_element_type=jnp.float32) + b_m2[...])

    # ---- Final LayerNorm on the class-token row only, classification head.
    cls = _layernorm(x[0:1, :], ln_g_ref[...], ln_b_ref[...], eps)
    logits = (jnp.dot(cls.astype(jnp.bfloat16), head_w_ref[...],
                      preferred_element_type=jnp.float32) + head_b_ref[...])
    out_ref[...] = jnp.broadcast_to(logits, out_ref.shape)   # unmasked store


# --------------------------------------------------------------------------
# Host wrapper: layout-only prep + one batch-parallel pallas_call
# --------------------------------------------------------------------------

def vit_forward(x_nchw, params, *, patch=32, num_heads=4, pos_emb_flag=True,
                ln_eps=1e-6):
    b, c, h, w = x_nchw.shape
    hp, wp = h // patch, w // patch
    n_patch = hp * wp
    seq = n_patch + 1
    sp = 8 * pl.cdiv(seq, 8)                    # sublane-padded sequence length
    e = params["conv_w"].shape[1]
    num_layers = len(params["blocks"])
    num_classes = params["head_w"].shape[1]
    ncls_pad = 128 * pl.cdiv(num_classes, 128)  # lane-padded logits
    assert e % num_heads == 0, "hidden must be divisible by num_heads"
    scale = 1.0 / math.sqrt(e // num_heads)
    cpp = c * patch * patch
    bf16 = jnp.bfloat16

    # Non-overlapping PxP patches, C-major flattening (== Conv2d(stride=P)).
    # Row 0 of each per-image slab is the [cls] slot, rows seq..sp are padding
    # (both zero).
    patches = x_nchw.reshape(b, c, hp, patch, wp, patch)
    patches = patches.transpose(0, 2, 4, 1, 3, 5).reshape(b, n_patch, cpp)
    patches = jnp.pad(patches, ((0, 0), (1, sp - seq), (0, 0)))
    patches = patches.reshape(b * sp, cpp)

    # Additive slab: cls row gets class_token (+pos[0]); patch rows get
    # conv bias (+pos[1:]); pad rows stay zero.
    if pos_emb_flag:
        pos = params["pos_embedding"].reshape(seq, e)
    else:
        pos = jnp.zeros((seq, e), jnp.float32)
    emb = jnp.concatenate(
        [params["class_token"].reshape(1, e) + pos[0:1],
         params["conv_b"].reshape(1, e) + pos[1:seq]], axis=0)
    emb_add = jnp.tile(jnp.pad(emb, ((0, sp - seq), (0, 0))), (b, 1))

    def r2(v):   # biases / LN params as [1, N] rows (lane axis = feature dim)
        return v.reshape(1, -1)

    args = [patches, emb_add, params["conv_w"].astype(bf16)]
    for blk in params["blocks"]:
        w_qkv = blk["attn_in_w"]                         # [E, 3E]
        w_qkv = jnp.concatenate([w_qkv[:, :e] * scale, w_qkv[:, e:]], axis=1)
        b_qkv = blk["attn_in_b"]
        b_qkv = jnp.concatenate([b_qkv[:e] * scale, b_qkv[e:]])
        args += [r2(blk["ln1_g"]), r2(blk["ln1_b"]),
                 w_qkv.astype(bf16), r2(b_qkv),
                 blk["attn_out_w"].astype(bf16), r2(blk["attn_out_b"]),
                 r2(blk["ln2_g"]), r2(blk["ln2_b"]),
                 blk["mlp_w1"].astype(bf16), r2(blk["mlp_b1"]),
                 blk["mlp_w2"].astype(bf16), r2(blk["mlp_b2"])]
    head_w = jnp.pad(params["head_w"], ((0, 0), (0, ncls_pad - num_classes)))
    head_b = jnp.pad(params["head_b"], (0, ncls_pad - num_classes))
    args += [r2(params["ln_g"]), r2(params["ln_b"]),
             head_w.astype(bf16), r2(head_b)]

    kernel = functools.partial(_vit_fused_kernel, num_heads=num_heads,
                               num_layers=num_layers, seq=seq, eps=ln_eps)

    in_specs = ([pl.BlockSpec((sp, cpp), lambda i: (i, 0)),
                 pl.BlockSpec((sp, e), lambda i: (i, 0))]
                + [pl.BlockSpec(a.shape, lambda i: (0, 0)) for a in args[2:]])

    out = pl.pallas_call(
        kernel,
        out_shape=jax.ShapeDtypeStruct((b * sp, ncls_pad), jnp.float32),
        grid=(b,),
        in_specs=in_specs,
        out_specs=pl.BlockSpec((sp, ncls_pad), lambda i: (i, 0)),
        compiler_params=pltpu.CompilerParams(
            dimension_semantics=("parallel",)),
    )(*args)

    return out.reshape(b, sp, ncls_pad)[:, 0, :num_classes]


# --------------------------------------------------------------------------
# Deterministic synthetic parameter init (no checkpoint loading)
# --------------------------------------------------------------------------

def init_params(key, *, in_ch, patch, hidden, mlp, layers, seq_len, num_classes):
    n_keys = 4 + 4 * layers
    keys = iter(jax.random.split(key, n_keys))

    def w(shape, scale=0.02):
        return (scale * jax.random.normal(next(keys), shape)).astype(jnp.float32)

    params = {
        "conv_w": w((in_ch * patch * patch, hidden)),
        "conv_b": jnp.zeros((hidden,), jnp.float32),
        "class_token": w((1, 1, hidden)),
        "pos_embedding": w((1, seq_len, hidden)),
        "ln_g": jnp.ones((hidden,), jnp.float32),
        "ln_b": jnp.zeros((hidden,), jnp.float32),
        "head_w": w((hidden, num_classes)),
        "head_b": jnp.zeros((num_classes,), jnp.float32),
        "blocks": [],
    }
    for _ in range(layers):
        params["blocks"].append({
            "ln1_g": jnp.ones((hidden,), jnp.float32),
            "ln1_b": jnp.zeros((hidden,), jnp.float32),
            "attn_in_w": w((hidden, 3 * hidden)),
            "attn_in_b": jnp.zeros((3 * hidden,), jnp.float32),
            "attn_out_w": w((hidden, hidden)),
            "attn_out_b": jnp.zeros((hidden,), jnp.float32),
            "ln2_g": jnp.ones((hidden,), jnp.float32),
            "ln2_b": jnp.zeros((hidden,), jnp.float32),
            "mlp_w1": w((hidden, mlp)),
            "mlp_b1": jnp.zeros((mlp,), jnp.float32),
            "mlp_w2": w((mlp, hidden)),
            "mlp_b2": jnp.zeros((hidden,), jnp.float32),
        })
    return params


if __name__ == "__main__":
    # Small shapes consistent with the module's forward (NCHW image -> logits).
    B, C, H, W = 2, 3, 64, 64
    PATCH, HIDDEN, MLP, LAYERS, HEADS, NUM_CLASSES = 32, 128, 256, 2, 4, 10
    SEQ = (H // PATCH) * (W // PATCH) + 1   # patches + class token

    key = jax.random.PRNGKey(0)
    k_x, k_p = jax.random.split(key)
    x = jax.random.normal(k_x, (B, C, H, W), dtype=jnp.float32)
    params = init_params(k_p, in_ch=C, patch=PATCH, hidden=HIDDEN, mlp=MLP,
                         layers=LAYERS, seq_len=SEQ, num_classes=NUM_CLASSES)

    fwd = jax.jit(functools.partial(vit_forward, patch=PATCH, num_heads=HEADS,
                                    pos_emb_flag=True))
    logits = fwd(x, params)
    logits = jax.block_until_ready(logits)
    assert logits.shape == (B, NUM_CLASSES) and logits.dtype == jnp.float32
    print("KERNEL_OK")
</pallas_src>

<mosaic_0001>
module attributes {stable_mosaic.version = 11 : i64} {
  func.func @_vit_fused_kernel(%arg0: i32, %arg1: memref<8x3072xf32, #tpu.memory_space<vmem>>, %arg2: memref<8x128xf32, #tpu.memory_space<vmem>>, %arg3: memref<3072x128xbf16, #tpu.memory_space<vmem>>, %arg4: memref<1x128xf32, #tpu.memory_space<vmem>>, %arg5: memref<1x128xf32, #tpu.memory_space<vmem>>, %arg6: memref<128x384xbf16, #tpu.memory_space<vmem>>, %arg7: memref<1x384xf32, #tpu.memory_space<vmem>>, %arg8: memref<128x128xbf16, #tpu.memory_space<vmem>>, %arg9: memref<1x128xf32, #tpu.memory_space<vmem>>, %arg10: memref<1x128xf32, #tpu.memory_space<vmem>>, %arg11: memref<1x128xf32, #tpu.memory_space<vmem>>, %arg12: memref<128x256xbf16, #tpu.memory_space<vmem>>, %arg13: memref<1x256xf32, #tpu.memory_space<vmem>>, %arg14: memref<256x128xbf16, #tpu.memory_space<vmem>>, %arg15: memref<1x128xf32, #tpu.memory_space<vmem>>, %arg16: memref<1x128xf32, #tpu.memory_space<vmem>>, %arg17: memref<1x128xf32, #tpu.memory_space<vmem>>, %arg18: memref<128x384xbf16, #tpu.memory_space<vmem>>, %arg19: memref<1x384xf32, #tpu.memory_space<vmem>>, %arg20: memref<128x128xbf16, #tpu.memory_space<vmem>>, %arg21: memref<1x128xf32, #tpu.memory_space<vmem>>, %arg22: memref<1x128xf32, #tpu.memory_space<vmem>>, %arg23: memref<1x128xf32, #tpu.memory_space<vmem>>, %arg24: memref<128x256xbf16, #tpu.memory_space<vmem>>, %arg25: memref<1x256xf32, #tpu.memory_space<vmem>>, %arg26: memref<256x128xbf16, #tpu.memory_space<vmem>>, %arg27: memref<1x128xf32, #tpu.memory_space<vmem>>, %arg28: memref<1x128xf32, #tpu.memory_space<vmem>>, %arg29: memref<1x128xf32, #tpu.memory_space<vmem>>, %arg30: memref<128x128xbf16, #tpu.memory_space<vmem>>, %arg31: memref<1x128xf32, #tpu.memory_space<vmem>>, %arg32: memref<8x128xf32, #tpu.memory_space<vmem>>) attributes {dimension_semantics = [#tpu.dimension_semantics<parallel>], iteration_bounds = array<i64: 2>, scalar_prefetch = 0 : i64, scratch_operands = 0 : i64, tpu.core_type = #tpu.core_type<tc>, window_params = [{transform_indices = @transform_0, window_bounds = array<i64: 8, 3072>}, {transform_indices = @transform_1, window_bounds = array<i64: 8, 128>}, {pipeline_mode = #tpu.pipeline_mode<synchronous>, transform_indices = @transform_2, window_bounds = array<i64: 3072, 128>}, {pipeline_mode = #tpu.pipeline_mode<synchronous>, transform_indices = @transform_3, window_bounds = array<i64: 1, 128>}, {pipeline_mode = #tpu.pipeline_mode<synchronous>, transform_indices = @transform_4, window_bounds = array<i64: 1, 128>}, {pipeline_mode = #tpu.pipeline_mode<synchronous>, transform_indices = @transform_5, window_bounds = array<i64: 128, 384>}, {pipeline_mode = #tpu.pipeline_mode<synchronous>, transform_indices = @transform_6, window_bounds = array<i64: 1, 384>}, {pipeline_mode = #tpu.pipeline_mode<synchronous>, transform_indices = @transform_7, window_bounds = array<i64: 128, 128>}, {pipeline_mode = #tpu.pipeline_mode<synchronous>, transform_indices = @transform_8, window_bounds = array<i64: 1, 128>}, {pipeline_mode = #tpu.pipeline_mode<synchronous>, transform_indices = @transform_9, window_bounds = array<i64: 1, 128>}, {pipeline_mode = #tpu.pipeline_mode<synchronous>, transform_indices = @transform_10, window_bounds = array<i64: 1, 128>}, {pipeline_mode = #tpu.pipeline_mode<synchronous>, transform_indices = @transform_11, window_bounds = array<i64: 128, 256>}, {pipeline_mode = #tpu.pipeline_mode<synchronous>, transform_indices = @transform_12, window_bounds = array<i64: 1, 256>}, {pipeline_mode = #tpu.pipeline_mode<synchronous>, transform_indices = @transform_13, window_bounds = array<i64: 256, 128>}, {pipeline_mode = #tpu.pipeline_mode<synchronous>, transform_indices = @transform_14, window_bounds = array<i64: 1, 128>}, {pipeline_mode = #tpu.pipeline_mode<synchronous>, transform_indices = @transform_15, window_bounds = array<i64: 1, 128>}, {pipeline_mode = #tpu.pipeline_mode<synchronous>, transform_indices = @transform_16, window_bounds = array<i64: 1, 128>}, {pipeline_mode = #tpu.pipeline_mode<synchronous>, transform_indices = @transform_17, window_bounds = array<i64: 128, 384>}, {pipeline_mode = #tpu.pipeline_mode<synchronous>, transform_indices = @transform_18, window_bounds = array<i64: 1, 384>}, {pipeline_mode = #tpu.pipeline_mode<synchronous>, transform_indices = @transform_19, window_bounds = array<i64: 128, 128>}, {pipeline_mode = #tpu.pipeline_mode<synchronous>, transform_indices = @transform_20, window_bounds = array<i64: 1, 128>}, {pipeline_mode = #tpu.pipeline_mode<synchronous>, transform_indices = @transform_21, window_bounds = array<i64: 1, 128>}, {pipeline_mode = #tpu.pipeline_mode<synchronous>, transform_indices = @transform_22, window_bounds = array<i64: 1, 128>}, {pipeline_mode = #tpu.pipeline_mode<synchronous>, transform_indices = @transform_23, window_bounds = array<i64: 128, 256>}, {pipeline_mode = #tpu.pipeline_mode<synchronous>, transform_indices = @transform_24, window_bounds = array<i64: 1, 256>}, {pipeline_mode = #tpu.pipeline_mode<synchronous>, transform_indices = @transform_25, window_bounds = array<i64: 256, 128>}, {pipeline_mode = #tpu.pipeline_mode<synchronous>, transform_indices = @transform_26, window_bounds = array<i64: 1, 128>}, {pipeline_mode = #tpu.pipeline_mode<synchronous>, transform_indices = @transform_27, window_bounds = array<i64: 1, 128>}, {pipeline_mode = #tpu.pipeline_mode<synchronous>, transform_indices = @transform_28, window_bounds = array<i64: 1, 128>}, {pipeline_mode = #tpu.pipeline_mode<synchronous>, transform_indices = @transform_29, window_bounds = array<i64: 128, 128>}, {pipeline_mode = #tpu.pipeline_mode<synchronous>, transform_indices = @transform_30, window_bounds = array<i64: 1, 128>}, {transform_indices = @transform_31, window_bounds = array<i64: 8, 128>}]} {
    %c0 = arith.constant 0 : index
    %c0_0 = arith.constant 0 : index
    %0 = vector.load %arg1[%c0, %c0_0] : memref<8x3072xf32, #tpu.memory_space<vmem>>, vector<8x3072xf32>
    %1 = arith.truncf %0 : vector<8x3072xf32> to vector<8x3072xbf16>
    %c0_1 = arith.constant 0 : index
    %c0_2 = arith.constant 0 : index
    %2 = vector.load %arg3[%c0_1, %c0_2] : memref<3072x128xbf16, #tpu.memory_space<vmem>>, vector<3072x128xbf16>
    %cst = arith.constant dense<0.000000e+00> : vector<8x128xf32>
    %3 = tpu.matmul %1, %2, %cst {dimension_numbers = #tpu.dot_dimension_numbers<[1], [0], [0], [1], [0, 0, 1, 1], [], []>} : vector<8x3072xbf16>, vector<3072x128xbf16>, vector<8x128xf32> -> vector<8x128xf32>
    %c0_3 = arith.constant 0 : index
    %c0_4 = arith.constant 0 : index
    %4 = vector.load %arg2[%c0_3, %c0_4] : memref<8x128xf32, #tpu.memory_space<vmem>>, vector<8x128xf32>
    %5 = arith.addf %3, %4 : vector<8x128xf32>
    %6 = tpu.iota {dimensions = array<i32: 1>} : vector<8x8xi32>
    %c5_i32 = arith.constant 5 : i32
    %7 = vector.broadcast %c5_i32 : i32 to vector<8x8xi32>
    %8 = arith.cmpi slt, %6, %7 : vector<8x8xi32>
    %cst_5 = arith.constant 0.000000e+00 : f32
    %cst_6 = arith.constant -1.000000e+30 : f32
    %9 = vector.broadcast %cst_5 : f32 to vector<8x8xf32>
    %10 = vector.broadcast %cst_6 : f32 to vector<8x8xf32>
    %11 = arith.select %8, %9, %10 : vector<8x8xi1>, vector<8x8xf32>
    %c0_7 = arith.constant 0 : index
    %c0_8 = arith.constant 0 : index
    %12 = vector.load %arg4[%c0_7, %c0_8] : memref<1x128xf32, #tpu.memory_space<vmem>>, vector<1x128xf32>
    %c0_9 = arith.constant 0 : index
    %c0_10 = arith.constant 0 : index
    %13 = vector.load %arg5[%c0_9, %c0_10] : memref<1x128xf32, #tpu.memory_space<vmem>>, vector<1x128xf32>
    %cst_11 = arith.constant dense<0.000000e+00> : vector<8xf32>
    %14 = vector.multi_reduction <add>, %5, %cst_11 [1] : vector<8x128xf32> to vector<8xf32>
    %15 = vector.shape_cast %14 : vector<8xf32> to vector<8x1xf32>
    %cst_12 = arith.constant 1.280000e+02 : f32
    %16 = vector.broadcast %cst_12 : f32 to vector<8x1xf32>
    %17 = arith.divf %15, %16 : vector<8x1xf32>
    %18 = vector.broadcast %17 : vector<8x1xf32> to vector<8x128xf32>
    %19 = arith.subf %5, %18 : vector<8x128xf32>
    %20 = arith.mulf %19, %19 : vector<8x128xf32>
    %cst_13 = arith.constant dense<0.000000e+00> : vector<8xf32>
    %21 = vector.multi_reduction <add>, %20, %cst_13 [1] : vector<8x128xf32> to vector<8xf32>
    %22 = vector.shape_cast %21 : vector<8xf32> to vector<8x1xf32>
    %cst_14 = arith.constant 1.280000e+02 : f32
    %23 = vector.broadcast %cst_14 : f32 to vector<8x1xf32>
    %24 = arith.divf %22, %23 : vector<8x1xf32>
    %cst_15 = arith.constant 9.99999997E-7 : f32
    %25 = vector.broadcast %cst_15 : f32 to vector<8x1xf32>
    %26 = arith.addf %24, %25 : vector<8x1xf32>
    %27 = math.rsqrt %26 : vector<8x1xf32>
    %28 = vector.broadcast %27 : vector<8x1xf32> to vector<8x128xf32>
    %29 = arith.mulf %19, %28 : vector<8x128xf32>
    %30 = vector.broadcast %12 : vector<1x128xf32> to vector<8x128xf32>
    %31 = arith.mulf %29, %30 : vector<8x128xf32>
    %32 = vector.broadcast %13 : vector<1x128xf32> to vector<8x128xf32>
    %33 = arith.addf %31, %32 : vector<8x128xf32>
    %34 = arith.truncf %33 : vector<8x128xf32> to vector<8x128xbf16>
    %c0_16 = arith.constant 0 : index
    %c0_17 = arith.constant 0 : index
    %35 = vector.load %arg6[%c0_16, %c0_17] : memref<128x384xbf16, #tpu.memory_space<vmem>>, vector<128x384xbf16>
    %cst_18 = arith.constant dense<0.000000e+00> : vector<8x384xf32>
    %36 = tpu.matmul %34, %35, %cst_18 {dimension_numbers = #tpu.dot_dimension_numbers<[1], [0], [0], [1], [0, 0, 1, 1], [], []>} : vector<8x128xbf16>, vector<128x384xbf16>, vector<8x384xf32> -> vector<8x384xf32>
    %c0_19 = arith.constant 0 : index
    %c0_20 = arith.constant 0 : index
    %37 = vector.load %arg7[%c0_19, %c0_20] : memref<1x384xf32, #tpu.memory_space<vmem>>, vector<1x384xf32>
    %38 = vector.broadcast %37 : vector<1x384xf32> to vector<8x384xf32>
    %39 = arith.addf %36, %38 : vector<8x384xf32>
    %40 = vector.extract_strided_slice %39 {offsets = [0, 0], sizes = [8, 32], strides = [1, 1]} : vector<8x384xf32> to vector<8x32xf32>
    %41 = arith.truncf %40 : vector<8x32xf32> to vector<8x32xbf16>
    %42 = vector.extract_strided_slice %39 {offsets = [0, 128], sizes = [8, 32], strides = [1, 1]} : vector<8x384xf32> to vector<8x32xf32>
    %43 = arith.truncf %42 : vector<8x32xf32> to vector<8x32xbf16>
    %44 = vector.extract_strided_slice %39 {offsets = [0, 256], sizes = [8, 32], strides = [1, 1]} : vector<8x384xf32> to vector<8x32xf32>
    %45 = arith.truncf %44 : vector<8x32xf32> to vector<8x32xbf16>
    %cst_21 = arith.constant dense<0.000000e+00> : vector<8x8xf32>
    %46 = tpu.matmul %41, %43, %cst_21 {dimension_numbers = #tpu.dot_dimension_numbers<[1], [1], [0], [0], [0, 0, 1, 0], [], []>} : vector<8x32xbf16>, vector<8x32xbf16>, vector<8x8xf32> -> vector<8x8xf32>
    %47 = arith.addf %46, %11 : vector<8x8xf32>
    %cst_22 = arith.constant dense<0xFF800000> : vector<8xf32>
    %48 = vector.multi_reduction <maximumf>, %47, %cst_22 [1] : vector<8x8xf32> to vector<8xf32>
    %49 = vector.shape_cast %48 : vector<8xf32> to vector<8x1xf32>
    %50 = vector.broadcast %49 : vector<8x1xf32> to vector<8x8xf32>
    %51 = arith.subf %47, %50 : vector<8x8xf32>
    %52 = math.exp %51 : vector<8x8xf32>
    %cst_23 = arith.constant dense<0.000000e+00> : vector<8xf32>
    %53 = vector.multi_reduction <add>, %52, %cst_23 [1] : vector<8x8xf32> to vector<8xf32>
    %54 = vector.shape_cast %53 : vector<8xf32> to vector<8x1xf32>
    %55 = tpu.reciprocal %54 {approx = true} : vector<8x1xf32> -> vector<8x1xf32>
    %56 = vector.broadcast %55 : vector<8x1xf32> to vector<8x8xf32>
    %57 = arith.mulf %52, %56 : vector<8x8xf32>
    %58 = arith.truncf %57 : vector<8x8xf32> to vector<8x8xbf16>
    %cst_24 = arith.constant dense<0.000000e+00> : vector<8x32xf32>
    %59 = tpu.matmul %58, %45, %cst_24 {dimension_numbers = #tpu.dot_dimension_numbers<[1], [0], [0], [1], [0, 0, 1, 1], [], []>} : vector<8x8xbf16>, vector<8x32xbf16>, vector<8x32xf32> -> vector<8x32xf32>
    %60 = vector.extract_strided_slice %39 {offsets = [0, 32], sizes = [8, 32], strides = [1, 1]} : vector<8x384xf32> to vector<8x32xf32>
    %61 = arith.truncf %60 : vector<8x32xf32> to vector<8x32xbf16>
    %62 = vector.extract_strided_slice %39 {offsets = [0, 160], sizes = [8, 32], strides = [1, 1]} : vector<8x384xf32> to vector<8x32xf32>
    %63 = arith.truncf %62 : vector<8x32xf32> to vector<8x32xbf16>
    %64 = vector.extract_strided_slice %39 {offsets = [0, 288], sizes = [8, 32], strides = [1, 1]} : vector<8x384xf32> to vector<8x32xf32>
    %65 = arith.truncf %64 : vector<8x32xf32> to vector<8x32xbf16>
    %cst_25 = arith.constant dense<0.000000e+00> : vector<8x8xf32>
    %66 = tpu.matmul %61, %63, %cst_25 {dimension_numbers = #tpu.dot_dimension_numbers<[1], [1], [0], [0], [0, 0, 1, 0], [], []>} : vector<8x32xbf16>, vector<8x32xbf16>, vector<8x8xf32> -> vector<8x8xf32>
    %67 = arith.addf %66, %11 : vector<8x8xf32>
    %cst_26 = arith.constant dense<0xFF800000> : vector<8xf32>
    %68 = vector.multi_reduction <maximumf>, %67, %cst_26 [1] : vector<8x8xf32> to vector<8xf32>
    %69 = vector.shape_cast %68 : vector<8xf32> to vector<8x1xf32>
    %70 = vector.broadcast %69 : vector<8x1xf32> to vector<8x8xf32>
    %71 = arith.subf %67, %70 : vector<8x8xf32>
    %72 = math.exp %71 : vector<8x8xf32>
    %cst_27 = arith.constant dense<0.000000e+00> : vector<8xf32>
    %73 = vector.multi_reduction <add>, %72, %cst_27 [1] : vector<8x8xf32> to vector<8xf32>
    %74 = vector.shape_cast %73 : vector<8xf32> to vector<8x1xf32>
    %75 = tpu.reciprocal %74 {approx = true} : vector<8x1xf32> -> vector<8x1xf32>
    %76 = vector.broadcast %75 : vector<8x1xf32> to vector<8x8xf32>
    %77 = arith.mulf %72, %76 : vector<8x8xf32>
    %78 = arith.truncf %77 : vector<8x8xf32> to vector<8x8xbf16>
    %cst_28 = arith.constant dense<0.000000e+00> : vector<8x32xf32>
    %79 = tpu.matmul %78, %65, %cst_28 {dimension_numbers = #tpu.dot_dimension_numbers<[1], [0], [0], [1], [0, 0, 1, 1], [], []>} : vector<8x8xbf16>, vector<8x32xbf16>, vector<8x32xf32> -> vector<8x32xf32>
    %80 = vector.extract_strided_slice %39 {offsets = [0, 64], sizes = [8, 32], strides = [1, 1]} : vector<8x384xf32> to vector<8x32xf32>
    %81 = arith.truncf %80 : vector<8x32xf32> to vector<8x32xbf16>
    %82 = vector.extract_strided_slice %39 {offsets = [0, 192], sizes = [8, 32], strides = [1, 1]} : vector<8x384xf32> to vector<8x32xf32>
    %83 = arith.truncf %82 : vector<8x32xf32> to vector<8x32xbf16>
    %84 = vector.extract_strided_slice %39 {offsets = [0, 320], sizes = [8, 32], strides = [1, 1]} : vector<8x384xf32> to vector<8x32xf32>
    %85 = arith.truncf %84 : vector<8x32xf32> to vector<8x32xbf16>
    %cst_29 = arith.constant dense<0.000000e+00> : vector<8x8xf32>
    %86 = tpu.matmul %81, %83, %cst_29 {dimension_numbers = #tpu.dot_dimension_numbers<[1], [1], [0], [0], [0, 0, 1, 0], [], []>} : vector<8x32xbf16>, vector<8x32xbf16>, vector<8x8xf32> -> vector<8x8xf32>
    %87 = arith.addf %86, %11 : vector<8x8xf32>
    %cst_30 = arith.constant dense<0xFF800000> : vector<8xf32>
    %88 = vector.multi_reduction <maximumf>, %87, %cst_30 [1] : vector<8x8xf32> to vector<8xf32>
    %89 = vector.shape_cast %88 : vector<8xf32> to vector<8x1xf32>
    %90 = vector.broadcast %89 : vector<8x1xf32> to vector<8x8xf32>
    %91 = arith.subf %87, %90 : vector<8x8xf32>
    %92 = math.exp %91 : vector<8x8xf32>
    %cst_31 = arith.constant dense<0.000000e+00> : vector<8xf32>
    %93 = vector.multi_reduction <add>, %92, %cst_31 [1] : vector<8x8xf32> to vector<8xf32>
    %94 = vector.shape_cast %93 : vector<8xf32> to vector<8x1xf32>
    %95 = tpu.reciprocal %94 {approx = true} : vector<8x1xf32> -> vector<8x1xf32>
    %96 = vector.broadcast %95 : vector<8x1xf32> to vector<8x8xf32>
    %97 = arith.mulf %92, %96 : vector<8x8xf32>
    %98 = arith.truncf %97 : vector<8x8xf32> to vector<8x8xbf16>
    %cst_32 = arith.constant dense<0.000000e+00> : vector<8x32xf32>
    %99 = tpu.matmul %98, %85, %cst_32 {dimension_numbers = #tpu.dot_dimension_numbers<[1], [0], [0], [1], [0, 0, 1, 1], [], []>} : vector<8x8xbf16>, vector<8x32xbf16>, vector<8x32xf32> -> vector<8x32xf32>
    %100 = vector.extract_strided_slice %39 {offsets = [0, 96], sizes = [8, 32], strides = [1, 1]} : vector<8x384xf32> to vector<8x32xf32>
    %101 = arith.truncf %100 : vector<8x32xf32> to vector<8x32xbf16>
    %102 = vector.extract_strided_slice %39 {offsets = [0, 224], sizes = [8, 32], strides = [1, 1]} : vector<8x384xf32> to vector<8x32xf32>
    %103 = arith.truncf %102 : vector<8x32xf32> to vector<8x32xbf16>
    %104 = vector.extract_strided_slice %39 {offsets = [0, 352], sizes = [8, 32], strides = [1, 1]} : vector<8x384xf32> to vector<8x32xf32>
    %105 = arith.truncf %104 : vector<8x32xf32> to vector<8x32xbf16>
    %cst_33 = arith.constant dense<0.000000e+00> : vector<8x8xf32>
    %106 = tpu.matmul %101, %103, %cst_33 {dimension_numbers = #tpu.dot_dimension_numbers<[1], [1], [0], [0], [0, 0, 1, 0], [], []>} : vector<8x32xbf16>, vector<8x32xbf16>, vector<8x8xf32> -> vector<8x8xf32>
    %107 = arith.addf %106, %11 : vector<8x8xf32>
    %cst_34 = arith.constant dense<0xFF800000> : vector<8xf32>
    %108 = vector.multi_reduction <maximumf>, %107, %cst_34 [1] : vector<8x8xf32> to vector<8xf32>
    %109 = vector.shape_cast %108 : vector<8xf32> to vector<8x1xf32>
    %110 = vector.broadcast %109 : vector<8x1xf32> to vector<8x8xf32>
    %111 = arith.subf %107, %110 : vector<8x8xf32>
    %112 = math.exp %111 : vector<8x8xf32>
    %cst_35 = arith.constant dense<0.000000e+00> : vector<8xf32>
    %113 = vector.multi_reduction <add>, %112, %cst_35 [1] : vector<8x8xf32> to vector<8xf32>
    %114 = vector.shape_cast %113 : vector<8xf32> to vector<8x1xf32>
    %115 = tpu.reciprocal %114 {approx = true} : vector<8x1xf32> -> vector<8x1xf32>
    %116 = vector.broadcast %115 : vector<8x1xf32> to vector<8x8xf32>
    %117 = arith.mulf %112, %116 : vector<8x8xf32>
    %118 = arith.truncf %117 : vector<8x8xf32> to vector<8x8xbf16>
    %cst_36 = arith.constant dense<0.000000e+00> : vector<8x32xf32>
    %119 = tpu.matmul %118, %105, %cst_36 {dimension_numbers = #tpu.dot_dimension_numbers<[1], [0], [0], [1], [0, 0, 1, 1], [], []>} : vector<8x8xbf16>, vector<8x32xbf16>, vector<8x32xf32> -> vector<8x32xf32>
    %120 = tpu.concatenate %59, %79, %99, %119 in 1 : vector<8x32xf32>, vector<8x32xf32>, vector<8x32xf32>, vector<8x32xf32> -> vector<8x128xf32>
    %121 = arith.truncf %120 : vector<8x128xf32> to vector<8x128xbf16>
    %c0_37 = arith.constant 0 : index
    %c0_38 = arith.constant 0 : index
    %122 = vector.load %arg8[%c0_37, %c0_38] : memref<128x128xbf16, #tpu.memory_space<vmem>>, vector<128x128xbf16>
    %cst_39 = arith.constant dense<0.000000e+00> : vector<8x128xf32>
    %123 = tpu.matmul %121, %122, %cst_39 {dimension_numbers = #tpu.dot_dimension_numbers<[1], [0], [0], [1], [0, 0, 1, 1], [], []>} : vector<8x128xbf16>, vector<128x128xbf16>, vector<8x128xf32> -> vector<8x128xf32>
    %c0_40 = arith.constant 0 : index
    %c0_41 = arith.constant 0 : index
    %124 = vector.load %arg9[%c0_40, %c0_41] : memref<1x128xf32, #tpu.memory_space<vmem>>, vector<1x128xf32>
    %125 = vector.broadcast %124 : vector<1x128xf32> to vector<8x128xf32>
    %126 = arith.addf %123, %125 : vector<8x128xf32>
    %127 = arith.addf %5, %126 : vector<8x128xf32>
    %c0_42 = arith.constant 0 : index
    %c0_43 = arith.constant 0 : index
    %128 = vector.load %arg10[%c0_42, %c0_43] : memref<1x128xf32, #tpu.memory_space<vmem>>, vector<1x128xf32>
    %c0_44 = arith.constant 0 : index
    %c0_45 = arith.constant 0 : index
    %129 = vector.load %arg11[%c0_44, %c0_45] : memref<1x128xf32, #tpu.memory_space<vmem>>, vector<1x128xf32>
    %cst_46 = arith.constant dense<0.000000e+00> : vector<8xf32>
    %130 = vector.multi_reduction <add>, %127, %cst_46 [1] : vector<8x128xf32> to vector<8xf32>
    %131 = vector.shape_cast %130 : vector<8xf32> to vector<8x1xf32>
    %cst_47 = arith.constant 1.280000e+02 : f32
    %132 = vector.broadcast %cst_47 : f32 to vector<8x1xf32>
    %133 = arith.divf %131, %132 : vector<8x1xf32>
    %134 = vector.broadcast %133 : vector<8x1xf32> to vector<8x128xf32>
    %135 = arith.subf %127, %134 : vector<8x128xf32>
    %136 = arith.mulf %135, %135 : vector<8x128xf32>
    %cst_48 = arith.constant dense<0.000000e+00> : vector<8xf32>
    %137 = vector.multi_reduction <add>, %136, %cst_48 [1] : vector<8x128xf32> to vector<8xf32>
    %138 = vector.shape_cast %137 : vector<8xf32> to vector<8x1xf32>
    %cst_49 = arith.constant 1.280000e+02 : f32
    %139 = vector.broadcast %cst_49 : f32 to vector<8x1xf32>
    %140 = arith.divf %138, %139 : vector<8x1xf32>
    %cst_50 = arith.constant 9.99999997E-7 : f32
    %141 = vector.broadcast %cst_50 : f32 to vector<8x1xf32>
    %142 = arith.addf %140, %141 : vector<8x1xf32>
    %143 = math.rsqrt %142 : vector<8x1xf32>
    %144 = vector.broadcast %143 : vector<8x1xf32> to vector<8x128xf32>
    %145 = arith.mulf %135, %144 : vector<8x128xf32>
    %146 = vector.broadcast %128 : vector<1x128xf32> to vector<8x128xf32>
    %147 = arith.mulf %145, %146 : vector<8x128xf32>
    %148 = vector.broadcast %129 : vector<1x128xf32> to vector<8x128xf32>
    %149 = arith.addf %147, %148 : vector<8x128xf32>
    %150 = arith.truncf %149 : vector<8x128xf32> to vector<8x128xbf16>
    %c0_51 = arith.constant 0 : index
    %c0_52 = arith.constant 0 : index
    %151 = vector.load %arg12[%c0_51, %c0_52] : memref<128x256xbf16, #tpu.memory_space<vmem>>, vector<128x256xbf16>
    %cst_53 = arith.constant dense<0.000000e+00> : vector<8x256xf32>
    %152 = tpu.matmul %150, %151, %cst_53 {dimension_numbers = #tpu.dot_dimension_numbers<[1], [0], [0], [1], [0, 0, 1, 1], [], []>} : vector<8x128xbf16>, vector<128x256xbf16>, vector<8x256xf32> -> vector<8x256xf32>
    %c0_54 = arith.constant 0 : index
    %c0_55 = arith.constant 0 : index
    %153 = vector.load %arg13[%c0_54, %c0_55] : memref<1x256xf32, #tpu.memory_space<vmem>>, vector<1x256xf32>
    %154 = vector.broadcast %153 : vector<1x256xf32> to vector<8x256xf32>
    %155 = arith.addf %152, %154 : vector<8x256xf32>
    %cst_56 = arith.constant 5.000000e-01 : f32
    %156 = vector.broadcast %cst_56 : f32 to vector<8x256xf32>
    %157 = arith.mulf %156, %155 : vector<8x256xf32>
    %158 = arith.mulf %155, %155 : vector<8x256xf32>
    %159 = arith.mulf %158, %155 : vector<8x256xf32>
    %cst_57 = arith.constant 4.471500e-02 : f32
    %160 = vector.broadcast %cst_57 : f32 to vector<8x256xf32>
    %161 = arith.mulf %160, %159 : vector<8x256xf32>
    %162 = arith.addf %155, %161 : vector<8x256xf32>
    %cst_58 = arith.constant 0.797884583 : f32
    %163 = vector.broadcast %cst_58 : f32 to vector<8x256xf32>
    %164 = arith.mulf %163, %162 : vector<8x256xf32>
    %165 = math.tanh %164 : vector<8x256xf32>
    %cst_59 = arith.constant 1.000000e+00 : f32
    %166 = vector.broadcast %cst_59 : f32 to vector<8x256xf32>
    %167 = arith.addf %166, %165 : vector<8x256xf32>
    %168 = arith.mulf %157, %167 : vector<8x256xf32>
    %169 = arith.truncf %168 : vector<8x256xf32> to vector<8x256xbf16>
    %c0_60 = arith.constant 0 : index
    %c0_61 = arith.constant 0 : index
    %170 = vector.load %arg14[%c0_60, %c0_61] : memref<256x128xbf16, #tpu.memory_space<vmem>>, vector<256x128xbf16>
    %cst_62 = arith.constant dense<0.000000e+00> : vector<8x128xf32>
    %171 = tpu.matmul %169, %170, %cst_62 {dimension_numbers = #tpu.dot_dimension_numbers<[1], [0], [0], [1], [0, 0, 1, 1], [], []>} : vector<8x256xbf16>, vector<256x128xbf16>, vector<8x128xf32> -> vector<8x128xf32>
    %c0_63 = arith.constant 0 : index
    %c0_64 = arith.constant 0 : index
    %172 = vector.load %arg15[%c0_63, %c0_64] : memref<1x128xf32, #tpu.memory_space<vmem>>, vector<1x128xf32>
    %173 = vector.broadcast %172 : vector<1x128xf32> to vector<8x128xf32>
    %174 = arith.addf %171, %173 : vector<8x128xf32>
    %175 = arith.addf %127, %174 : vector<8x128xf32>
    %c0_65 = arith.constant 0 : index
    %c0_66 = arith.constant 0 : index
    %176 = vector.load %arg16[%c0_65, %c0_66] : memref<1x128xf32, #tpu.memory_space<vmem>>, vector<1x128xf32>
    %c0_67 = arith.constant 0 : index
    %c0_68 = arith.constant 0 : index
    %177 = vector.load %arg17[%c0_67, %c0_68] : memref<1x128xf32, #tpu.memory_space<vmem>>, vector<1x128xf32>
    %cst_69 = arith.constant dense<0.000000e+00> : vector<8xf32>
    %178 = vector.multi_reduction <add>, %175, %cst_69 [1] : vector<8x128xf32> to vector<8xf32>
    %179 = vector.shape_cast %178 : vector<8xf32> to vector<8x1xf32>
    %cst_70 = arith.constant 1.280000e+02 : f32
    %180 = vector.broadcast %cst_70 : f32 to vector<8x1xf32>
    %181 = arith.divf %179, %180 : vector<8x1xf32>
    %182 = vector.broadcast %181 : vector<8x1xf32> to vector<8x128xf32>
    %183 = arith.subf %175, %182 : vector<8x128xf32>
    %184 = arith.mulf %183, %183 : vector<8x128xf32>
    %cst_71 = arith.constant dense<0.000000e+00> : vector<8xf32>
    %185 = vector.multi_reduction <add>, %184, %cst_71 [1] : vector<8x128xf32> to vector<8xf32>
    %186 = vector.shape_cast %185 : vector<8xf32> to vector<8x1xf32>
    %cst_72 = arith.constant 1.280000e+02 : f32
    %187 = vector.broadcast %cst_72 : f32 to vector<8x1xf32>
    %188 = arith.divf %186, %187 : vector<8x1xf32>
    %cst_73 = arith.constant 9.99999997E-7 : f32
    %189 = vector.broadcast %cst_73 : f32 to vector<8x1xf32>
    %190 = arith.addf %188, %189 : vector<8x1xf32>
    %191 = math.rsqrt %190 : vector<8x1xf32>
    %192 = vector.broadcast %191 : vector<8x1xf32> to vector<8x128xf32>
    %193 = arith.mulf %183, %192 : vector<8x128xf32>
    %194 = vector.broadcast %176 : vector<1x128xf32> to vector<8x128xf32>
    %195 = arith.mulf %193, %194 : vector<8x128xf32>
    %196 = vector.broadcast %177 : vector<1x128xf32> to vector<8x128xf32>
    %197 = arith.addf %195, %196 : vector<8x128xf32>
    %198 = arith.truncf %197 : vector<8x128xf32> to vector<8x128xbf16>
    %c0_74 = arith.constant 0 : index
    %c0_75 = arith.constant 0 : index
    %199 = vector.load %arg18[%c0_74, %c0_75] : memref<128x384xbf16, #tpu.memory_space<vmem>>, vector<128x384xbf16>
    %cst_76 = arith.constant dense<0.000000e+00> : vector<8x384xf32>
    %200 = tpu.matmul %198, %199, %cst_76 {dimension_numbers = #tpu.dot_dimension_numbers<[1], [0], [0], [1], [0, 0, 1, 1], [], []>} : vector<8x128xbf16>, vector<128x384xbf16>, vector<8x384xf32> -> vector<8x384xf32>
    %c0_77 = arith.constant 0 : index
    %c0_78 = arith.constant 0 : index
    %201 = vector.load %arg19[%c0_77, %c0_78] : memref<1x384xf32, #tpu.memory_space<vmem>>, vector<1x384xf32>
    %202 = vector.broadcast %201 : vector<1x384xf32> to vector<8x384xf32>
    %203 = arith.addf %200, %202 : vector<8x384xf32>
    %204 = vector.extract_strided_slice %203 {offsets = [0, 0], sizes = [8, 32], strides = [1, 1]} : vector<8x384xf32> to vector<8x32xf32>
    %205 = arith.truncf %204 : vector<8x32xf32> to vector<8x32xbf16>
    %206 = vector.extract_strided_slice %203 {offsets = [0, 128], sizes = [8, 32], strides = [1, 1]} : vector<8x384xf32> to vector<8x32xf32>
    %207 = arith.truncf %206 : vector<8x32xf32> to vector<8x32xbf16>
    %208 = vector.extract_strided_slice %203 {offsets = [0, 256], sizes = [8, 32], strides = [1, 1]} : vector<8x384xf32> to vector<8x32xf32>
    %209 = arith.truncf %208 : vector<8x32xf32> to vector<8x32xbf16>
    %cst_79 = arith.constant dense<0.000000e+00> : vector<8x8xf32>
    %210 = tpu.matmul %205, %207, %cst_79 {dimension_numbers = #tpu.dot_dimension_numbers<[1], [1], [0], [0], [0, 0, 1, 0], [], []>} : vector<8x32xbf16>, vector<8x32xbf16>, vector<8x8xf32> -> vector<8x8xf32>
    %211 = arith.addf %210, %11 : vector<8x8xf32>
    %cst_80 = arith.constant dense<0xFF800000> : vector<8xf32>
    %212 = vector.multi_reduction <maximumf>, %211, %cst_80 [1] : vector<8x8xf32> to vector<8xf32>
    %213 = vector.shape_cast %212 : vector<8xf32> to vector<8x1xf32>
    %214 = vector.broadcast %213 : vector<8x1xf32> to vector<8x8xf32>
    %215 = arith.subf %211, %214 : vector<8x8xf32>
    %216 = math.exp %215 : vector<8x8xf32>
    %cst_81 = arith.constant dense<0.000000e+00> : vector<8xf32>
    %217 = vector.multi_reduction <add>, %216, %cst_81 [1] : vector<8x8xf32> to vector<8xf32>
    %218 = vector.shape_cast %217 : vector<8xf32> to vector<8x1xf32>
    %219 = tpu.reciprocal %218 {approx = true} : vector<8x1xf32> -> vector<8x1xf32>
    %220 = vector.broadcast %219 : vector<8x1xf32> to vector<8x8xf32>
    %221 = arith.mulf %216, %220 : vector<8x8xf32>
    %222 = arith.truncf %221 : vector<8x8xf32> to vector<8x8xbf16>
    %cst_82 = arith.constant dense<0.000000e+00> : vector<8x32xf32>
    %223 = tpu.matmul %222, %209, %cst_82 {dimension_numbers = #tpu.dot_dimension_numbers<[1], [0], [0], [1], [0, 0, 1, 1], [], []>} : vector<8x8xbf16>, vector<8x32xbf16>, vector<8x32xf32> -> vector<8x32xf32>
    %224 = vector.extract_strided_slice %203 {offsets = [0, 32], sizes = [8, 32], strides = [1, 1]} : vector<8x384xf32> to vector<8x32xf32>
    %225 = arith.truncf %224 : vector<8x32xf32> to vector<8x32xbf16>
    %226 = vector.extract_strided_slice %203 {offsets = [0, 160], sizes = [8, 32], strides = [1, 1]} : vector<8x384xf32> to vector<8x32xf32>
    %227 = arith.truncf %226 : vector<8x32xf32> to vector<8x32xbf16>
    %228 = vector.extract_strided_slice %203 {offsets = [0, 288], sizes = [8, 32], strides = [1, 1]} : vector<8x384xf32> to vector<8x32xf32>
    %229 = arith.truncf %228 : vector<8x32xf32> to vector<8x32xbf16>
    %cst_83 = arith.constant dense<0.000000e+00> : vector<8x8xf32>
    %230 = tpu.matmul %225, %227, %cst_83 {dimension_numbers = #tpu.dot_dimension_numbers<[1], [1], [0], [0], [0, 0, 1, 0], [], []>} : vector<8x32xbf16>, vector<8x32xbf16>, vector<8x8xf32> -> vector<8x8xf32>
    %231 = arith.addf %230, %11 : vector<8x8xf32>
    %cst_84 = arith.constant dense<0xFF800000> : vector<8xf32>
    %232 = vector.multi_reduction <maximumf>, %231, %cst_84 [1] : vector<8x8xf32> to vector<8xf32>
    %233 = vector.shape_cast %232 : vector<8xf32> to vector<8x1xf32>
    %234 = vector.broadcast %233 : vector<8x1xf32> to vector<8x8xf32>
    %235 = arith.subf %231, %234 : vector<8x8xf32>
    %236 = math.exp %235 : vector<8x8xf32>
    %cst_85 = arith.constant dense<0.000000e+00> : vector<8xf32>
    %237 = vector.multi_reduction <add>, %236, %cst_85 [1] : vector<8x8xf32> to vector<8xf32>
    %238 = vector.shape_cast %237 : vector<8xf32> to vector<8x1xf32>
    %239 = tpu.reciprocal %238 {approx = true} : vector<8x1xf32> -> vector<8x1xf32>
    %240 = vector.broadcast %239 : vector<8x1xf32> to vector<8x8xf32>
    %241 = arith.mulf %236, %240 : vector<8x8xf32>
    %242 = arith.truncf %241 : vector<8x8xf32> to vector<8x8xbf16>
    %cst_86 = arith.constant dense<0.000000e+00> : vector<8x32xf32>
    %243 = tpu.matmul %242, %229, %cst_86 {dimension_numbers = #tpu.dot_dimension_numbers<[1], [0], [0], [1], [0, 0, 1, 1], [], []>} : vector<8x8xbf16>, vector<8x32xbf16>, vector<8x32xf32> -> vector<8x32xf32>
    %244 = vector.extract_strided_slice %203 {offsets = [0, 64], sizes = [8, 32], strides = [1, 1]} : vector<8x384xf32> to vector<8x32xf32>
    %245 = arith.truncf %244 : vector<8x32xf32> to vector<8x32xbf16>
    %246 = vector.extract_strided_slice %203 {offsets = [0, 192], sizes = [8, 32], strides = [1, 1]} : vector<8x384xf32> to vector<8x32xf32>
    %247 = arith.truncf %246 : vector<8x32xf32> to vector<8x32xbf16>
    %248 = vector.extract_strided_slice %203 {offsets = [0, 320], sizes = [8, 32], strides = [1, 1]} : vector<8x384xf32> to vector<8x32xf32>
    %249 = arith.truncf %248 : vector<8x32xf32> to vector<8x32xbf16>
    %cst_87 = arith.constant dense<0.000000e+00> : vector<8x8xf32>
    %250 = tpu.matmul %245, %247, %cst_87 {dimension_numbers = #tpu.dot_dimension_numbers<[1], [1], [0], [0], [0, 0, 1, 0], [], []>} : vector<8x32xbf16>, vector<8x32xbf16>, vector<8x8xf32> -> vector<8x8xf32>
    %251 = arith.addf %250, %11 : vector<8x8xf32>
    %cst_88 = arith.constant dense<0xFF800000> : vector<8xf32>
    %252 = vector.multi_reduction <maximumf>, %251, %cst_88 [1] : vector<8x8xf32> to vector<8xf32>
    %253 = vector.shape_cast %252 : vector<8xf32> to vector<8x1xf32>
    %254 = vector.broadcast %253 : vector<8x1xf32> to vector<8x8xf32>
    %255 = arith.subf %251, %254 : vector<8x8xf32>
    %256 = math.exp %255 : vector<8x8xf32>
    %cst_89 = arith.constant dense<0.000000e+00> : vector<8xf32>
    %257 = vector.multi_reduction <add>, %256, %cst_89 [1] : vector<8x8xf32> to vector<8xf32>
    %258 = vector.shape_cast %257 : vector<8xf32> to vector<8x1xf32>
    %259 = tpu.reciprocal %258 {approx = true} : vector<8x1xf32> -> vector<8x1xf32>
    %260 = vector.broadcast %259 : vector<8x1xf32> to vector<8x8xf32>
    %261 = arith.mulf %256, %260 : vector<8x8xf32>
    %262 = arith.truncf %261 : vector<8x8xf32> to vector<8x8xbf16>
    %cst_90 = arith.constant dense<0.000000e+00> : vector<8x32xf32>
    %263 = tpu.matmul %262, %249, %cst_90 {dimension_numbers = #tpu.dot_dimension_numbers<[1], [0], [0], [1], [0, 0, 1, 1], [], []>} : vector<8x8xbf16>, vector<8x32xbf16>, vector<8x32xf32> -> vector<8x32xf32>
    %264 = vector.extract_strided_slice %203 {offsets = [0, 96], sizes = [8, 32], strides = [1, 1]} : vector<8x384xf32> to vector<8x32xf32>
    %265 = arith.truncf %264 : vector<8x32xf32> to vector<8x32xbf16>
    %266 = vector.extract_strided_slice %203 {offsets = [0, 224], sizes = [8, 32], strides = [1, 1]} : vector<8x384xf32> to vector<8x32xf32>
    %267 = arith.truncf %266 : vector<8x32xf32> to vector<8x32xbf16>
    %268 = vector.extract_strided_slice %203 {offsets = [0, 352], sizes = [8, 32], strides = [1, 1]} : vector<8x384xf32> to vector<8x32xf32>
    %269 = arith.truncf %268 : vector<8x32xf32> to vector<8x32xbf16>
    %cst_91 = arith.constant dense<0.000000e+00> : vector<8x8xf32>
    %270 = tpu.matmul %265, %267, %cst_91 {dimension_numbers = #tpu.dot_dimension_numbers<[1], [1], [0], [0], [0, 0, 1, 0], [], []>} : vector<8x32xbf16>, vector<8x32xbf16>, vector<8x8xf32> -> vector<8x8xf32>
    %271 = arith.addf %270, %11 : vector<8x8xf32>
    %cst_92 = arith.constant dense<0xFF800000> : vector<8xf32>
    %272 = vector.multi_reduction <maximumf>, %271, %cst_92 [1] : vector<8x8xf32> to vector<8xf32>
    %273 = vector.shape_cast %272 : vector<8xf32> to vector<8x1xf32>
    %274 = vector.broadcast %273 : vector<8x1xf32> to vector<8x8xf32>
    %275 = arith.subf %271, %274 : vector<8x8xf32>
    %276 = math.exp %275 : vector<8x8xf32>
    %cst_93 = arith.constant dense<0.000000e+00> : vector<8xf32>
    %277 = vector.multi_reduction <add>, %276, %cst_93 [1] : vector<8x8xf32> to vector<8xf32>
    %278 = vector.shape_cast %277 : vector<8xf32> to vector<8x1xf32>
    %279 = tpu.reciprocal %278 {approx = true} : vector<8x1xf32> -> vector<8x1xf32>
    %280 = vector.broadcast %279 : vector<8x1xf32> to vector<8x8xf32>
    %281 = arith.mulf %276, %280 : vector<8x8xf32>
    %282 = arith.truncf %281 : vector<8x8xf32> to vector<8x8xbf16>
    %cst_94 = arith.constant dense<0.000000e+00> : vector<8x32xf32>
    %283 = tpu.matmul %282, %269, %cst_94 {dimension_numbers = #tpu.dot_dimension_numbers<[1], [0], [0], [1], [0, 0, 1, 1], [], []>} : vector<8x8xbf16>, vector<8x32xbf16>, vector<8x32xf32> -> vector<8x32xf32>
    %284 = tpu.concatenate %223, %243, %263, %283 in 1 : vector<8x32xf32>, vector<8x32xf32>, vector<8x32xf32>, vector<8x32xf32> -> vector<8x128xf32>
    %285 = arith.truncf %284 : vector<8x128xf32> to vector<8x128xbf16>
    %c0_95 = arith.constant 0 : index
    %c0_96 = arith.constant 0 : index
    %286 = vector.load %arg20[%c0_95, %c0_96] : memref<128x128xbf16, #tpu.memory_space<vmem>>, vector<128x128xbf16>
    %cst_97 = arith.constant dense<0.000000e+00> : vector<8x128xf32>
    %287 = tpu.matmul %285, %286, %cst_97 {dimension_numbers = #tpu.dot_dimension_numbers<[1], [0], [0], [1], [0, 0, 1, 1], [], []>} : vector<8x128xbf16>, vector<128x128xbf16>, vector<8x128xf32> -> vector<8x128xf32>
    %c0_98 = arith.constant 0 : index
    %c0_99 = arith.constant 0 : index
    %288 = vector.load %arg21[%c0_98, %c0_99] : memref<1x128xf32, #tpu.memory_space<vmem>>, vector<1x128xf32>
    %289 = vector.broadcast %288 : vector<1x128xf32> to vector<8x128xf32>
    %290 = arith.addf %287, %289 : vector<8x128xf32>
    %291 = arith.addf %175, %290 : vector<8x128xf32>
    %c0_100 = arith.constant 0 : index
    %c0_101 = arith.constant 0 : index
    %292 = vector.load %arg22[%c0_100, %c0_101] : memref<1x128xf32, #tpu.memory_space<vmem>>, vector<1x128xf32>
    %c0_102 = arith.constant 0 : index
    %c0_103 = arith.constant 0 : index
    %293 = vector.load %arg23[%c0_102, %c0_103] : memref<1x128xf32, #tpu.memory_space<vmem>>, vector<1x128xf32>
    %cst_104 = arith.constant dense<0.000000e+00> : vector<8xf32>
    %294 = vector.multi_reduction <add>, %291, %cst_104 [1] : vector<8x128xf32> to vector<8xf32>
    %295 = vector.shape_cast %294 : vector<8xf32> to vector<8x1xf32>
    %cst_105 = arith.constant 1.280000e+02 : f32
    %296 = vector.broadcast %cst_105 : f32 to vector<8x1xf32>
    %297 = arith.divf %295, %296 : vector<8x1xf32>
    %298 = vector.broadcast %297 : vector<8x1xf32> to vector<8x128xf32>
    %299 = arith.subf %291, %298 : vector<8x128xf32>
    %300 = arith.mulf %299, %299 : vector<8x128xf32>
    %cst_106 = arith.constant dense<0.000000e+00> : vector<8xf32>
    %301 = vector.multi_reduction <add>, %300, %cst_106 [1] : vector<8x128xf32> to vector<8xf32>
    %302 = vector.shape_cast %301 : vector<8xf32> to vector<8x1xf32>
    %cst_107 = arith.constant 1.280000e+02 : f32
    %303 = vector.broadcast %cst_107 : f32 to vector<8x1xf32>
    %304 = arith.divf %302, %303 : vector<8x1xf32>
    %cst_108 = arith.constant 9.99999997E-7 : f32
    %305 = vector.broadcast %cst_108 : f32 to vector<8x1xf32>
    %306 = arith.addf %304, %305 : vector<8x1xf32>
    %307 = math.rsqrt %306 : vector<8x1xf32>
    %308 = vector.broadcast %307 : vector<8x1xf32> to vector<8x128xf32>
    %309 = arith.mulf %299, %308 : vector<8x128xf32>
    %310 = vector.broadcast %292 : vector<1x128xf32> to vector<8x128xf32>
    %311 = arith.mulf %309, %310 : vector<8x128xf32>
    %312 = vector.broadcast %293 : vector<1x128xf32> to vector<8x128xf32>
    %313 = arith.addf %311, %312 : vector<8x128xf32>
    %314 = arith.truncf %313 : vector<8x128xf32> to vector<8x128xbf16>
    %c0_109 = arith.constant 0 : index
    %c0_110 = arith.constant 0 : index
    %315 = vector.load %arg24[%c0_109, %c0_110] : memref<128x256xbf16, #tpu.memory_space<vmem>>, vector<128x256xbf16>
    %cst_111 = arith.constant dense<0.000000e+00> : vector<8x256xf32>
    %316 = tpu.matmul %314, %315, %cst_111 {dimension_numbers = #tpu.dot_dimension_numbers<[1], [0], [0], [1], [0, 0, 1, 1], [], []>} : vector<8x128xbf16>, vector<128x256xbf16>, vector<8x256xf32> -> vector<8x256xf32>
    %c0_112 = arith.constant 0 : index
    %c0_113 = arith.constant 0 : index
    %317 = vector.load %arg25[%c0_112, %c0_113] : memref<1x256xf32, #tpu.memory_space<vmem>>, vector<1x256xf32>
    %318 = vector.broadcast %317 : vector<1x256xf32> to vector<8x256xf32>
    %319 = arith.addf %316, %318 : vector<8x256xf32>
    %cst_114 = arith.constant 5.000000e-01 : f32
    %320 = vector.broadcast %cst_114 : f32 to vector<8x256xf32>
    %321 = arith.mulf %320, %319 : vector<8x256xf32>
    %322 = arith.mulf %319, %319 : vector<8x256xf32>
    %323 = arith.mulf %322, %319 : vector<8x256xf32>
    %cst_115 = arith.constant 4.471500e-02 : f32
    %324 = vector.broadcast %cst_115 : f32 to vector<8x256xf32>
    %325 = arith.mulf %324, %323 : vector<8x256xf32>
    %326 = arith.addf %319, %325 : vector<8x256xf32>
    %cst_116 = arith.constant 0.797884583 : f32
    %327 = vector.broadcast %cst_116 : f32 to vector<8x256xf32>
    %328 = arith.mulf %327, %326 : vector<8x256xf32>
    %329 = math.tanh %328 : vector<8x256xf32>
    %cst_117 = arith.constant 1.000000e+00 : f32
    %330 = vector.broadcast %cst_117 : f32 to vector<8x256xf32>
    %331 = arith.addf %330, %329 : vector<8x256xf32>
    %332 = arith.mulf %321, %331 : vector<8x256xf32>
    %333 = arith.truncf %332 : vector<8x256xf32> to vector<8x256xbf16>
    %c0_118 = arith.constant 0 : index
    %c0_119 = arith.constant 0 : index
    %334 = vector.load %arg26[%c0_118, %c0_119] : memref<256x128xbf16, #tpu.memory_space<vmem>>, vector<256x128xbf16>
    %cst_120 = arith.constant dense<0.000000e+00> : vector<8x128xf32>
    %335 = tpu.matmul %333, %334, %cst_120 {dimension_numbers = #tpu.dot_dimension_numbers<[1], [0], [0], [1], [0, 0, 1, 1], [], []>} : vector<8x256xbf16>, vector<256x128xbf16>, vector<8x128xf32> -> vector<8x128xf32>
    %c0_121 = arith.constant 0 : index
    %c0_122 = arith.constant 0 : index
    %336 = vector.load %arg27[%c0_121, %c0_122] : memref<1x128xf32, #tpu.memory_space<vmem>>, vector<1x128xf32>
    %337 = vector.broadcast %336 : vector<1x128xf32> to vector<8x128xf32>
    %338 = arith.addf %335, %337 : vector<8x128xf32>
    %339 = arith.addf %291, %338 : vector<8x128xf32>
    %340 = vector.extract_strided_slice %339 {offsets = [0, 0], sizes = [1, 128], strides = [1, 1]} : vector<8x128xf32> to vector<1x128xf32>
    %c0_123 = arith.constant 0 : index
    %c0_124 = arith.constant 0 : index
    %341 = vector.load %arg28[%c0_123, %c0_124] : memref<1x128xf32, #tpu.memory_space<vmem>>, vector<1x128xf32>
    %c0_125 = arith.constant 0 : index
    %c0_126 = arith.constant 0 : index
    %342 = vector.load %arg29[%c0_125, %c0_126] : memref<1x128xf32, #tpu.memory_space<vmem>>, vector<1x128xf32>
    %cst_127 = arith.constant dense<0.000000e+00> : vector<1xf32>
    %343 = vector.multi_reduction <add>, %340, %cst_127 [1] : vector<1x128xf32> to vector<1xf32>
    %344 = vector.shape_cast %343 : vector<1xf32> to vector<1x1xf32>
    %cst_128 = arith.constant 1.280000e+02 : f32
    %345 = vector.broadcast %cst_128 : f32 to vector<1x1xf32>
    %346 = arith.divf %344, %345 : vector<1x1xf32>
    %347 = vector.broadcast %346 : vector<1x1xf32> to vector<1x128xf32>
    %348 = arith.subf %340, %347 : vector<1x128xf32>
    %349 = arith.mulf %348, %348 : vector<1x128xf32>
    %cst_129 = arith.constant dense<0.000000e+00> : vector<1xf32>
    %350 = vector.multi_reduction <add>, %349, %cst_129 [1] : vector<1x128xf32> to vector<1xf32>
    %351 = vector.shape_cast %350 : vector<1xf32> to vector<1x1xf32>
    %cst_130 = arith.constant 1.280000e+02 : f32
    %352 = vector.broadcast %cst_130 : f32 to vector<1x1xf32>
    %353 = arith.divf %351, %352 : vector<1x1xf32>
    %cst_131 = arith.constant 9.99999997E-7 : f32
    %354 = vector.broadcast %cst_131 : f32 to vector<1x1xf32>
    %355 = arith.addf %353, %354 : vector<1x1xf32>
    %356 = math.rsqrt %355 : vector<1x1xf32>
    %357 = vector.broadcast %356 : vector<1x1xf32> to vector<1x128xf32>
    %358 = arith.mulf %348, %357 : vector<1x128xf32>
    %359 = arith.mulf %358, %341 : vector<1x128xf32>
    %360 = arith.addf %359, %342 : vector<1x128xf32>
    %361 = arith.truncf %360 : vector<1x128xf32> to vector<1x128xbf16>
    %c0_132 = arith.constant 0 : index
    %c0_133 = arith.constant 0 : index
    %362 = vector.load %arg30[%c0_132, %c0_133] : memref<128x128xbf16, #tpu.memory_space<vmem>>, vector<128x128xbf16>
    %cst_134 = arith.constant dense<0.000000e+00> : vector<1x128xf32>
    %363 = tpu.matmul %361, %362, %cst_134 {dimension_numbers = #tpu.dot_dimension_numbers<[1], [0], [0], [1], [0, 0, 1, 1], [], []>} : vector<1x128xbf16>, vector<128x128xbf16>, vector<1x128xf32> -> vector<1x128xf32>
    %c0_135 = arith.constant 0 : index
    %c0_136 = arith.constant 0 : index
    %364 = vector.load %arg31[%c0_135, %c0_136] : memref<1x128xf32, #tpu.memory_space<vmem>>, vector<1x128xf32>
    %365 = arith.addf %363, %364 : vector<1x128xf32>
    %366 = vector.shape_cast %365 : vector<1x128xf32> to vector<1x128xf32>
    %367 = vector.broadcast %366 : vector<1x128xf32> to vector<8x128xf32>
    %c0_137 = arith.constant 0 : index
    %c0_138 = arith.constant 0 : index
    %368 = vector.load %arg32[%c0_137, %c0_138] : memref<8x128xf32, #tpu.memory_space<vmem>>, vector<8x128xf32>
    tpu.vector_store %arg32[%c0_137, %c0_138], %367 {strides = array<i32>} : memref<8x128xf32, #tpu.memory_space<vmem>>, vector<8x128xf32>,
    return
  }
  func.func @transform_0(%arg0: i32) -> (i32, i32) {
    %c0_i32 = arith.constant 0 : i32
    %c0_i32_0 = arith.constant 0 : i32
    return %arg0, %c0_i32 : i32, i32
  }
  func.func @transform_1(%arg0: i32) -> (i32, i32) {
    %c0_i32 = arith.constant 0 : i32
    %c0_i32_0 = arith.constant 0 : i32
    return %arg0, %c0_i32 : i32, i32
  }
  func.func @transform_2(%arg0: i32) -> (i32, i32) {
    %c0_i32 = arith.constant 0 : i32
    %c0_i32_0 = arith.constant 0 : i32
    %c0_i32_1 = arith.constant 0 : i32
    return %c0_i32, %c0_i32_0 : i32, i32
  }
  func.func @transform_3(%arg0: i32) -> (i32, i32) {
    %c0_i32 = arith.constant 0 : i32
    %c0_i32_0 = arith.constant 0 : i32
    %c0_i32_1 = arith.constant 0 : i32
    return %c0_i32, %c0_i32_0 : i32, i32
  }
  func.func @transform_4(%arg0: i32) -> (i32, i32) {
    %c0_i32 = arith.constant 0 : i32
    %c0_i32_0 = arith.constant 0 : i32
    %c0_i32_1 = arith.constant 0 : i32
    return %c0_i32, %c0_i32_0 : i32, i32
  }
  func.func @transform_5(%arg0: i32) -> (i32, i32) {
    %c0_i32 = arith.constant 0 : i32
    %c0_i32_0 = arith.constant 0 : i32
    %c0_i32_1 = arith.constant 0 : i32
    return %c0_i32, %c0_i32_0 : i32, i32
  }
  func.func @transform_6(%arg0: i32) -> (i32, i32) {
    %c0_i32 = arith.constant 0 : i32
    %c0_i32_0 = arith.constant 0 : i32
    %c0_i32_1 = arith.constant 0 : i32
    return %c0_i32, %c0_i32_0 : i32, i32
  }
  func.func @transform_7(%arg0: i32) -> (i32, i32) {
    %c0_i32 = arith.constant 0 : i32
    %c0_i32_0 = arith.constant 0 : i32
    %c0_i32_1 = arith.constant 0 : i32
    return %c0_i32, %c0_i32_0 : i32, i32
  }
  func.func @transform_8(%arg0: i32) -> (i32, i32) {
    %c0_i32 = arith.constant 0 : i32
    %c0_i32_0 = arith.constant 0 : i32
    %c0_i32_1 = arith.constant 0 : i32
    return %c0_i32, %c0_i32_0 : i32, i32
  }
  func.func @transform_9(%arg0: i32) -> (i32, i32) {
    %c0_i32 = arith.constant 0 : i32
    %c0_i32_0 = arith.constant 0 : i32
    %c0_i32_1 = arith.constant 0 : i32
    return %c0_i32, %c0_i32_0 : i32, i32
  }
  func.func @transform_10(%arg0: i32) -> (i32, i32) {
    %c0_i32 = arith.constant 0 : i32
    %c0_i32_0 = arith.constant 0 : i32
    %c0_i32_1 = arith.constant 0 : i32
    return %c0_i32, %c0_i32_0 : i32, i32
  }
  func.func @transform_11(%arg0: i32) -> (i32, i32) {
    %c0_i32 = arith.constant 0 : i32
    %c0_i32_0 = arith.constant 0 : i32
    %c0_i32_1 = arith.constant 0 : i32
    return %c0_i32, %c0_i32_0 : i32, i32
  }
  func.func @transform_12(%arg0: i32) -> (i32, i32) {
    %c0_i32 = arith.constant 0 : i32
    %c0_i32_0 = arith.constant 0 : i32
    %c0_i32_1 = arith.constant 0 : i32
    return %c0_i32, %c0_i32_0 : i32, i32
  }
  func.func @transform_13(%arg0: i32) -> (i32, i32) {
    %c0_i32 = arith.constant 0 : i32
    %c0_i32_0 = arith.constant 0 : i32
    %c0_i32_1 = arith.constant 0 : i32
    return %c0_i32, %c0_i32_0 : i32, i32
  }
  func.func @transform_14(%arg0: i32) -> (i32, i32) {
    %c0_i32 = arith.constant 0 : i32
    %c0_i32_0 = arith.constant 0 : i32
    %c0_i32_1 = arith.constant 0 : i32
    return %c0_i32, %c0_i32_0 : i32, i32
  }
  func.func @transform_15(%arg0: i32) -> (i32, i32) {
    %c0_i32 = arith.constant 0 : i32
    %c0_i32_0 = arith.constant 0 : i32
    %c0_i32_1 = arith.constant 0 : i32
    return %c0_i32, %c0_i32_0 : i32, i32
  }
  func.func @transform_16(%arg0: i32) -> (i32, i32) {
    %c0_i32 = arith.constant 0 : i32
    %c0_i32_0 = arith.constant 0 : i32
    %c0_i32_1 = arith.constant 0 : i32
    return %c0_i32, %c0_i32_0 : i32, i32
  }
  func.func @transform_17(%arg0: i32) -> (i32, i32) {
    %c0_i32 = arith.constant 0 : i32
    %c0_i32_0 = arith.constant 0 : i32
    %c0_i32_1 = arith.constant 0 : i32
    return %c0_i32, %c0_i32_0 : i32, i32
  }
  func.func @transform_18(%arg0: i32) -> (i32, i32) {
    %c0_i32 = arith.constant 0 : i32
    %c0_i32_0 = arith.constant 0 : i32
    %c0_i32_1 = arith.constant 0 : i32
    return %c0_i32, %c0_i32_0 : i32, i32
  }
  func.func @transform_19(%arg0: i32) -> (i32, i32) {
    %c0_i32 = arith.constant 0 : i32
    %c0_i32_0 = arith.constant 0 : i32
    %c0_i32_1 = arith.constant 0 : i32
    return %c0_i32, %c0_i32_0 : i32, i32
  }
  func.func @transform_20(%arg0: i32) -> (i32, i32) {
    %c0_i32 = arith.constant 0 : i32
    %c0_i32_0 = arith.constant 0 : i32
    %c0_i32_1 = arith.constant 0 : i32
    return %c0_i32, %c0_i32_0 : i32, i32
  }
  func.func @transform_21(%arg0: i32) -> (i32, i32) {
    %c0_i32 = arith.constant 0 : i32
    %c0_i32_0 = arith.constant 0 : i32
    %c0_i32_1 = arith.constant 0 : i32
    return %c0_i32, %c0_i32_0 : i32, i32
  }
  func.func @transform_22(%arg0: i32) -> (i32, i32) {
    %c0_i32 = arith.constant 0 : i32
    %c0_i32_0 = arith.constant 0 : i32
    %c0_i32_1 = arith.constant 0 : i32
    return %c0_i32, %c0_i32_0 : i32, i32
  }
  func.func @transform_23(%arg0: i32) -> (i32, i32) {
    %c0_i32 = arith.constant 0 : i32
    %c0_i32_0 = arith.constant 0 : i32
    %c0_i32_1 = arith.constant 0 : i32
    return %c0_i32, %c0_i32_0 : i32, i32
  }
  func.func @transform_24(%arg0: i32) -> (i32, i32) {
    %c0_i32 = arith.constant 0 : i32
    %c0_i32_0 = arith.constant 0 : i32
    %c0_i32_1 = arith.constant 0 : i32
    return %c0_i32, %c0_i32_0 : i32, i32
  }
  func.func @transform_25(%arg0: i32) -> (i32, i32) {
    %c0_i32 = arith.constant 0 : i32
    %c0_i32_0 = arith.constant 0 : i32
    %c0_i32_1 = arith.constant 0 : i32
    return %c0_i32, %c0_i32_0 : i32, i32
  }
  func.func @transform_26(%arg0: i32) -> (i32, i32) {
    %c0_i32 = arith.constant 0 : i32
    %c0_i32_0 = arith.constant 0 : i32
    %c0_i32_1 = arith.constant 0 : i32
    return %c0_i32, %c0_i32_0 : i32, i32
  }
  func.func @transform_27(%arg0: i32) -> (i32, i32) {
    %c0_i32 = arith.constant 0 : i32
    %c0_i32_0 = arith.constant 0 : i32
    %c0_i32_1 = arith.constant 0 : i32
    return %c0_i32, %c0_i32_0 : i32, i32
  }
  func.func @transform_28(%arg0: i32) -> (i32, i32) {
    %c0_i32 = arith.constant 0 : i32
    %c0_i32_0 = arith.constant 0 : i32
    %c0_i32_1 = arith.constant 0 : i32
    return %c0_i32, %c0_i32_0 : i32, i32
  }
  func.func @transform_29(%arg0: i32) -> (i32, i32) {
    %c0_i32 = arith.constant 0 : i32
    %c0_i32_0 = arith.constant 0 : i32
    %c0_i32_1 = arith.constant 0 : i32
    return %c0_i32, %c0_i32_0 : i32, i32
  }
  func.func @transform_30(%arg0: i32) -> (i32, i32) {
    %c0_i32 = arith.constant 0 : i32
    %c0_i32_0 = arith.constant 0 : i32
    %c0_i32_1 = arith.constant 0 : i32
    return %c0_i32, %c0_i32_0 : i32, i32
  }
  func.func @transform_31(%arg0: i32) -> (i32, i32) {
    %c0_i32 = arith.constant 0 : i32
    %c0_i32_0 = arith.constant 0 : i32
    return %arg0, %c0_i32 : i32, i32
  }
}

</mosaic_0001>

<bundles_post_ra>
// kernel: vit_forward.1
= control target key start
LH: loop header
LB: loop body
LE: loop exit
PB: predicated region body
PF: predicated region fallthrough
CT: control target
= control target key end

     0   :  { %s6671_s6 = smov 1   ;;  %s6672_s10 = smov 2   ;;  %s7503_s0 = inlined_call_operand.smem [shape: u32[32], index: -1, kind: input, shape index: {}] }
   0x1   :  { %s6715_s5 = sld [smem:[%s7503_s0]]   ;;  %s6673_s14 = smov 3  }
   0x2   :  { %s6720_s9 = sld [smem:[%s7503_s0 + %s6671_s6]]   ;;  %s6674_s18 = smov 4  }
   0x3   :  { %s6725_s13 = sld [smem:[%s7503_s0 + %s6672_s10]]   ;;  %s6675_s22 = smov 5  }
   0x4   :  { %s6730_s17 = sld [smem:[%s7503_s0 + %s6673_s14]]   ;;  %s6676_s26 = smov 6  }
   0x5   :  { %s6735_s21 = sld [smem:[%s7503_s0 + %s6674_s18]]   ;;  %s6677_s30 = smov 7  }
   0x6   :  { %s6740_s25 = sld [smem:[%s7503_s0 + %s6675_s22]]   ;;  %s6678_s4 = smov 8  }
   0x7   :  { %s6745_s29 = sld [smem:[%s7503_s0 + %s6676_s26]]   ;;  %s6679_s10 = smov 9  }
   0x8   :  { %s6750_s3 = sld [smem:[%s7503_s0 + %s6677_s30]]   ;;  %s6680_s15 = smov 10  }
   0x9   :  { %s6755_s8 = sld [smem:[%s7503_s0 + %s6678_s4]]   ;;  %s6681_s20 = smov 11  }
   0xa   :  { %s6760_s14 = sld [smem:[%s7503_s0 + %s6679_s10]]   ;;  %s6682_s26 = smov 12  }
   0xb   :  { %s6765_s19 = sld [smem:[%s7503_s0 + %s6680_s15]]   ;;  %s6683_s1 = smov 13  }
   0xc   :  { %s6770_s24 = sld [smem:[%s7503_s0 + %s6681_s20]]   ;;  %s6684_s7 = smov 14  }
   0xd   :  { %s6775_s30 = sld [smem:[%s7503_s0 + %s6682_s26]]   ;;  %s6685_s15 = smov 15  }
   0xe   :  { %s6780_s6 = sld [smem:[%s7503_s0 + %s6683_s1]]   ;;  %s6686_s22 = smov 16  }
   0xf   :  { %s6785_s12 = sld [smem:[%s7503_s0 + %s6684_s7]]   ;;  %s6687_s28 = smov 17  }
  0x10   :  { %s6790_s20 = sld [smem:[%s7503_s0 + %s6685_s15]]   ;;  %s6688_s7 = smov 18  }
  0x11   :  { %s6795_s27 = sld [smem:[%s7503_s0 + %s6686_s22]]   ;;  %s6689_s15 = smov 19  }
  0x12   :  { %s6800_s4 = sld [smem:[%s7503_s0 + %s6687_s28]]   ;;  %s6690_s22 = smov 20  }
  0x13   :  { %s6691_s28 = smov 21  }
  0x15   :  { %7508 = sst [smem:[#allocation2_spill]] %s6785_s12 }
  0x16   :  { %7509 = sst [smem:[#allocation3_spill]] %s6790_s20 }
  0x17   :  { %7510 = sst [smem:[#allocation4_spill]] %s6795_s27 }
  0x18   :  { %7511 = sst [smem:[#allocation5_spill]] %s6800_s4 }
  0x19   :  { %s6805_s12 = sld [smem:[%s7503_s0 + %s6688_s7]]   ;;  %s6692_s7 = smov 22  }
  0x1a   :  { %s6810_s20 = sld [smem:[%s7503_s0 + %s6689_s15]]   ;;  %s6693_s15 = smov 23  }
  0x1b   :  { %s6815_s27 = sld [smem:[%s7503_s0 + %s6690_s22]]   ;;  %s6694_s22 = smov 24  }
  0x1c   :  { %s6820_s4 = sld [smem:[%s7503_s0 + %s6691_s28]]   ;;  %s6695_s28 = smov 25  }
  0x1f   :  { %7512 = sst [smem:[#allocation6_spill]] %s6805_s12 }
  0x20   :  { %7513 = sst [smem:[#allocation7_spill]] %s6810_s20 }
  0x21   :  { %7514 = sst [smem:[#allocation8_spill]] %s6815_s27 }
  0x22   :  { %7515 = sst [smem:[#allocation9_spill]] %s6820_s4 }
  0x23   :  { %s6825_s12 = sld [smem:[%s7503_s0 + %s6692_s7]]   ;;  %s6696_s7 = smov 26  }
  0x24   :  { %s6830_s20 = sld [smem:[%s7503_s0 + %s6693_s15]]   ;;  %s6697_s15 = smov 27  }
  0x25   :  { %s6835_s27 = sld [smem:[%s7503_s0 + %s6694_s22]]   ;;  %s6698_s22 = smov 28  }
  0x26   :  { %s6840_s4 = sld [smem:[%s7503_s0 + %s6695_s28]]   ;;  %s6699_s28 = smov 29  }
  0x29   :  { %7516 = sst [smem:[#allocation10_spill]] %s6825_s12 }
  0x2a   :  { %7517 = sst [smem:[#allocation11_spill]] %s6830_s20 }
  0x2b   :  { %7518 = sst [smem:[#allocation12_spill]] %s6835_s27 }
  0x2c   :  { %7519 = sst [smem:[#allocation13_spill]] %s6840_s4 }
  0x2d   :  { %s6845_s12 = sld [smem:[%s7503_s0 + %s6696_s7]]   ;;  %s6700_s7 = smov 30  }
  0x2e   :  { %s6850_s20 = sld [smem:[%s7503_s0 + %s6697_s15]]   ;;  %s6701_s15 = smov 31  }
  0x2f   :  { %s6855_s27 = sld [smem:[%s7503_s0 + %s6698_s22]]   ;;  %s6872_s22 = smov 0  }
  0x30   :  { %s6860_s4 = sld [smem:[%s7503_s0 + %s6699_s28]]  }
  0x33   :  { %7520 = sst [smem:[#allocation14_spill]] %s6845_s12 }
  0x34   :  { %7521 = sst [smem:[#allocation15_spill]] %s6850_s20 }
  0x35   :  { %s6865_s12 = sld [smem:[%s7503_s0 + %s6700_s7]]  }
  0x36   :  { %s6870_s20 = sld [smem:[%s7503_s0 + %s6701_s15]]  }
  0x37 LB: > { %s4888_s23 = sadd.s32 4294967295, %s6669_s22   ;;  %p4892_p0 = scmp.ge.s32.totalorder %s6669_s22, 1  ;;  %s6669_s22 = sphi %s6872_s22, %s73_s22  }
  0x38   : > { %p878_p1 = scmp.lt.s32.totalorder %s6669_s22, 3 }
  0x3a   : > { %p879_p2 = pnand %p4892_p0, %p878_p1 }
  0x3b   : > { %p961_p3 = scmp.lt.s32.totalorder (!%p879_p2), %s4888_s23, 1  ;;  %s6703_s2 = smov (!%p879_p2), 32  }
  0x3c   : > { %882 = sbr.rel (%p879_p2) target bundleno = 4531 (0x11b3), region = 144  ;;  %s6704_s7 = smov (!%p879_p2), 96  }
  0x3d   : > { %s6705_s10 = smov (!%p879_p2), 64   ;;  %s7522_s11 = sld [smem:[#allocation2_spill]] (!%p879_p2) }
  0x3e   : > { %s7523_s15 = sld [smem:[#allocation5_spill]] (!%p879_p2) }
  0x3f   : > { %s7524_s16 = sld [smem:[#allocation3_spill]] (!%p879_p2) }
  0x40   : > { %s7525_s18 = sld [smem:[#allocation4_spill]] (!%p879_p2) }
  0x41   : > { %v6233_v0 = vld [vmem:[%s6725_s13 + $0x38] sm:$0xff]  ;;  %v6232_v4 = vld [vmem:[%s6725_s13 + $0x30] sm:$0xff]  ;;  %v6231_v8 = vld [vmem:[%s6725_s13 + $0x28] sm:$0xff]  ;;  %s7537_s23 = smov (!%p961_p3, %s4888_s23), 1  ;;  %vm3124_vm4 = vcmask 261120   ;;  %vm3160_vm5 = vcmask 1043456  }
  0x42   : > { %v6241_v1 = vld [vmem:[%s6725_s13 + $0x78] sm:$0xff]  ;;  %2560 = vmatpush.bf16.msra.mxu0 %v6233_v0  ;;  %v6240_v5 = vld [vmem:[%s6725_s13 + $0x70] sm:$0xff]  ;;  %v6239_v9 = vld [vmem:[%s6725_s13 + $0x68] sm:$0xff]  ;;  %s6554_s0 = smul.u32 192, %s7537_s23  ;;  %s4894_s28 = sshll.u32 %s7537_s23, 3  ;;  %vm3144_vm7 = vcmask 64512  }
  0x43   : > { %v6249_v2 = vld [vmem:[%s6725_s13 + $0xb8] sm:$0xff]  ;;  %2573 = vmatpush.bf16.msra.mxu1 %v6241_v1  ;;  %v6248_v6 = vld [vmem:[%s6725_s13 + $0xb0] sm:$0xff]  ;;  %v6247_v10 = vld [vmem:[%s6725_s13 + $0xa8] sm:$0xff]  ;;  %s969_s1 = scalar_lea.vmem %s6720_s9, %s4894_s28  ;;  %vm3361_vm8 = vcmask 523264   ;;  %vm3363_vm9 = vcmask 785408  }
  0x44   : > { %v6257_v3 = vld [vmem:[%s6725_s13 + $0xf8] sm:$0xff]  ;;  %2586 = vmatpush.bf16.msra.mxu2 %v6249_v2  ;;  %v6256_v7 = vld [vmem:[%s6725_s13 + $0xf0] sm:$0xff]  ;;  %v6255_v11 = vld [vmem:[%s6725_s13 + $0xe8] sm:$0xff]  ;;  %s6916_s26 = scalar_lea.vmem %s6715_s5, %s6554_s0  ;;  %s7526_s0 = sld [smem:[#allocation6_spill]] }
  0x45   : > { %2599 = vmatpush.bf16.msra.mxu3 %v6257_v3  ;;  %v6230_v12 = vld [vmem:[%s6725_s13 + $0x20] sm:$0xff]  ;;  %v6229_v16 = vld [vmem:[%s6725_s13 + $0x18] sm:$0xff]  ;;  %v6228_v20 = vld [vmem:[%s6725_s13 + $0x10] sm:$0xff] }
  0x46   : > { %2561 = vmatpush.bf16.msra.mxu0 %v6232_v4  ;;  %v6238_v13 = vld [vmem:[%s6725_s13 + $0x60] sm:$0xff]  ;;  %v6237_v17 = vld [vmem:[%s6725_s13 + $0x58] sm:$0xff]  ;;  %v6236_v21 = vld [vmem:[%s6725_s13 + $0x50] sm:$0xff] }
  0x47   : > { %2574 = vmatpush.bf16.msra.mxu1 %v6240_v5  ;;  %v6246_v14 = vld [vmem:[%s6725_s13 + $0xa0] sm:$0xff]  ;;  %v6245_v18 = vld [vmem:[%s6725_s13 + $0x98] sm:$0xff]  ;;  %v6244_v22 = vld [vmem:[%s6725_s13 + $0x90] sm:$0xff] }
  0x48   : > { %2587 = vmatpush.bf16.msra.mxu2 %v6248_v6  ;;  %v6254_v15 = vld [vmem:[%s6725_s13 + $0xe0] sm:$0xff]  ;;  %v6253_v19 = vld [vmem:[%s6725_s13 + $0xd8] sm:$0xff]  ;;  %v6252_v23 = vld [vmem:[%s6725_s13 + $0xd0] sm:$0xff] }
  0x49   : > { %2600 = vmatpush.bf16.msra.mxu3 %v6256_v7  ;;  %v6227_v24 = vld [vmem:[%s6725_s13 + $0x8] sm:$0xff]  ;;  %v6226_v28 = vld [vmem:[%s6725_s13] sm:$0xff]  ;;  %v6265_v32 = vld [vmem:[%s6725_s13 + $0x138] sm:$0xff] }
  0x4a   : > { %2562 = vmatpush.bf16.msra.mxu0 %v6231_v8  ;;  %v6235_v25 = vld [vmem:[%s6725_s13 + $0x48] sm:$0xff]  ;;  %v6234_v29 = vld [vmem:[%s6725_s13 + $0x40] sm:$0xff]  ;;  %v977_v33 = vld [vmem:[%s6916_s26 + $0x10] sm:$0xff] }
  0x4b   : > { %2575 = vmatpush.bf16.msra.mxu1 %v6239_v9  ;;  %v6243_v26 = vld [vmem:[%s6725_s13 + $0x88] sm:$0xff]  ;;  %v6242_v30 = vld [vmem:[%s6725_s13 + $0x80] sm:$0xff]  ;;  %v6273_v35 = vld [vmem:[%s6725_s13 + $0x178] sm:$0xff]  ;;  %v1001_v40 = vpack.c.bf16 %v977_v33, %v977_v33 }
  0x4c   : > { %2588 = vmatpush.bf16.msra.mxu2 %v6247_v10  ;;  %v6251_v27 = vld [vmem:[%s6725_s13 + $0xc8] sm:$0xff]  ;;  %v6250_v31 = vld [vmem:[%s6725_s13 + $0xc0] sm:$0xff]  ;;  %v978_v36 = vld [vmem:[%s6916_s26 + $0x18] sm:$0xff] }
  0x4d   : > { %2601 = vmatpush.bf16.msra.mxu3 %v6255_v11  ;;  %v975_v34 = vld [vmem:[%s6916_s26] sm:$0xff]  ;;  %v976_v37 = vld [vmem:[%s6916_s26 + $0x8] sm:$0xff]  ;;  %v6281_v38 = vld [vmem:[%s6725_s13 + $0x1b8] sm:$0xff]  ;;  %v1002_v42 = vpack.c.bf16 %v978_v36, %v978_v36 }
  0x4e   : > { %2563 = vmatpush.bf16.msra.mxu0 %v6230_v12  ;;  %v6289_v39 = vld [vmem:[%s6725_s13 + $0x1f8] sm:$0xff]  ;;  %v999_v41 = vpack.c.bf16 %v975_v34, %v975_v34  ;;  %v1000_v43 = vpack.c.bf16 %v976_v37, %v976_v37  ;;  %v6264_v44 = vld [vmem:[%s6725_s13 + $0x130] sm:$0xff]  ;;  %v6263_v48 = vld [vmem:[%s6725_s13 + $0x128] sm:$0xff] }
  0x4f   : > { %2576 = vmatpush.bf16.msra.mxu1 %v6238_v13  ;;  %v6272_v45 = vld [vmem:[%s6725_s13 + $0x170] sm:$0xff]  ;;  %v6271_v49 = vld [vmem:[%s6725_s13 + $0x168] sm:$0xff]  ;;  %v6262_v52 = vld [vmem:[%s6725_s13 + $0x120] sm:$0xff] }
  0x50   : > { %2589 = vmatpush.bf16.msra.mxu2 %v6246_v14  ;;  %v6280_v46 = vld [vmem:[%s6725_s13 + $0x1b0] sm:$0xff]  ;;  %v6279_v50 = vld [vmem:[%s6725_s13 + $0x1a8] sm:$0xff]  ;;  %v6270_v53 = vld [vmem:[%s6725_s13 + $0x160] sm:$0xff] }
  0x51   : > { %2602 = vmatpush.bf16.msra.mxu3 %v6254_v15  ;;  %v6288_v47 = vld [vmem:[%s6725_s13 + $0x1f0] sm:$0xff]  ;;  %v6287_v51 = vld [vmem:[%s6725_s13 + $0x1e8] sm:$0xff]  ;;  %v6278_v54 = vld [vmem:[%s6725_s13 + $0x1a0] sm:$0xff] }
  0x52   : > { %2564 = vmatpush.bf16.msra.mxu0 %v6229_v16  ;;  %v6286_v55 = vld [vmem:[%s6725_s13 + $0x1e0] sm:$0xff]  ;;  %v6261_v56 = vld [vmem:[%s6725_s13 + $0x118] sm:$0xff]  ;;  %v6260_v60 = vld [vmem:[%s6725_s13 + $0x110] sm:$0xff] }
  0x53   : > { %2577 = vmatpush.bf16.msra.mxu1 %v6237_v17  ;;  %v6269_v57 = vld [vmem:[%s6725_s13 + $0x158] sm:$0xff]  ;;  %v6268_v61 = vld [vmem:[%s6725_s13 + $0x150] sm:$0xff]  ;;  %v6259_v0 = vld [vmem:[%s6725_s13 + $0x108] sm:$0xff] }
  0x54   : > { %2590 = vmatpush.bf16.msra.mxu2 %v6245_v18  ;;  %v6277_v58 = vld [vmem:[%s6725_s13 + $0x198] sm:$0xff]  ;;  %v6276_v62 = vld [vmem:[%s6725_s13 + $0x190] sm:$0xff]  ;;  %v6267_v1 = vld [vmem:[%s6725_s13 + $0x148] sm:$0xff] }
  0x55   : > { %2603 = vmatpush.bf16.msra.mxu3 %v6253_v19  ;;  %v6285_v59 = vld [vmem:[%s6725_s13 + $0x1d8] sm:$0xff]  ;;  %v6284_v63 = vld [vmem:[%s6725_s13 + $0x1d0] sm:$0xff]  ;;  %v6275_v2 = vld [vmem:[%s6725_s13 + $0x188] sm:$0xff] }
  0x56   : > { %2565 = vmatpush.bf16.msra.mxu0 %v6228_v20  ;;  %v6283_v3 = vld [vmem:[%s6725_s13 + $0x1c8] sm:$0xff]  ;;  %v6258_v4 = vld [vmem:[%s6725_s13 + $0x100] sm:$0xff]  ;;  %v6297_v8 = vld [vmem:[%s6725_s13 + $0x238] sm:$0xff] }
  0x57   : > { %2578 = vmatpush.bf16.msra.mxu1 %v6236_v21  ;;  %v6266_v5 = vld [vmem:[%s6725_s13 + $0x140] sm:$0xff]  ;;  %v981_v9 = vld [vmem:[%s6916_s26 + $0x30] sm:$0xff]  ;;  %v6305_v11 = vld [vmem:[%s6725_s13 + $0x278] sm:$0xff] }
  0x58   : > { %2591 = vmatpush.bf16.msra.mxu2 %v6244_v22  ;;  %v6274_v6 = vld [vmem:[%s6725_s13 + $0x180] sm:$0xff]  ;;  %v982_v12 = vld [vmem:[%s6916_s26 + $0x38] sm:$0xff]  ;;  %v980_v13 = vld [vmem:[%s6916_s26 + $0x28] sm:$0xff]  ;;  %v1005_v16 = vpack.c.bf16 %v981_v9, %v981_v9 }
  0x59   : > { %2604 = vmatpush.bf16.msra.mxu3 %v6252_v23  ;;  %v6282_v7 = vld [vmem:[%s6725_s13 + $0x1c0] sm:$0xff]  ;;  %v6313_v14 = vld [vmem:[%s6725_s13 + $0x2b8] sm:$0xff]  ;;  %v1006_v18 = vpack.c.bf16 %v982_v12, %v982_v12  ;;  %v1004_v19 = vpack.c.bf16 %v980_v13, %v980_v13  ;;  %v6296_v20 = vld [vmem:[%s6725_s13 + $0x230] sm:$0xff] }
  0x5a   : > { %2566 = vmatpush.bf16.msra.mxu0 %v6227_v24  ;;  %v979_v10 = vld [vmem:[%s6916_s26 + $0x20] sm:$0xff]  ;;  %v6321_v15 = vld [vmem:[%s6725_s13 + $0x2f8] sm:$0xff]  ;;  %v6304_v21 = vld [vmem:[%s6725_s13 + $0x270] sm:$0xff] }
  0x5b   : > { %2579 = vmatpush.bf16.msra.mxu1 %v6235_v25  ;;  %v1003_v17 = vpack.c.bf16 %v979_v10, %v979_v10  ;;  %v6312_v22 = vld [vmem:[%s6725_s13 + $0x2b0] sm:$0xff]  ;;  %v6295_v24 = vld [vmem:[%s6725_s13 + $0x228] sm:$0xff]  ;;  %v6301_v33 = vld [vmem:[%s6725_s13 + $0x258] sm:$0xff] }
  0x5c   : > { %2592 = vmatpush.bf16.msra.mxu2 %v6243_v26  ;;  %v6320_v23 = vld [vmem:[%s6725_s13 + $0x2f0] sm:$0xff]  ;;  %v6303_v25 = vld [vmem:[%s6725_s13 + $0x268] sm:$0xff]  ;;  %v6309_v34 = vld [vmem:[%s6725_s13 + $0x298] sm:$0xff] }
  0x5d   : > { %2605 = vmatpush.bf16.msra.mxu3 %v6251_v27  ;;  %v6311_v26 = vld [vmem:[%s6725_s13 + $0x2a8] sm:$0xff]  ;;  %v6292_v36 = vld [vmem:[%s6725_s13 + $0x210] sm:$0xff]  ;;  %v6333_v9 = vld [vmem:[%s6725_s13 + $0x358] sm:$0xff] }
  0x5e   : > { %2567 = vmatpush.bf16.msra.mxu0 %v6226_v28  ;;  %v6319_v27 = vld [vmem:[%s6725_s13 + $0x2e8] sm:$0xff]  ;;  %v6294_v28 = vld [vmem:[%s6725_s13 + $0x220] sm:$0xff]  ;;  %v6300_v37 = vld [vmem:[%s6725_s13 + $0x250] sm:$0xff] }
  0x5f   : > { %2580 = vmatpush.bf16.msra.mxu1 %v6234_v29  ;;  %v6302_v29 = vld [vmem:[%s6725_s13 + $0x260] sm:$0xff]  ;;  %v6341_v10 = vld [vmem:[%s6725_s13 + $0x398] sm:$0xff]  ;;  %v6324_v12 = vld [vmem:[%s6725_s13 + $0x310] sm:$0xff] }
  0x60   : > { %2593 = vmatpush.bf16.msra.mxu2 %v6242_v30  ;;  %v6310_v30 = vld [vmem:[%s6725_s13 + $0x2a0] sm:$0xff]  ;;  %v6332_v13 = vld [vmem:[%s6725_s13 + $0x350] sm:$0xff] }
  0x61   : > { %2606 = vmatpush.bf16.msra.mxu3 %v6250_v31  ;;  %2568 = vmatmul.bf16.vlgmr.msra.gmra.mxu0 %v999_v41  ;;  %v6318_v31 = vld [vmem:[%s6725_s13 + $0x2e0] sm:$0xff]  ;;  %v6299_v41 = vld [vmem:[%s6725_s13 + $0x248] sm:$0xff] }
  0x62   : > { %2612 = vmatpush.bf16.msrb.mxu0 %v6265_v32  ;;  %2581 = vmatmul.bf16.vlgmr.msra.gmra.mxu1 %v1000_v43  ;;  %v6293_v32 = vld [vmem:[%s6725_s13 + $0x218] sm:$0xff]  ;;  %v6315_v43 = vld [vmem:[%s6725_s13 + $0x2c8] sm:$0xff] }
  0x63   : > { %2625 = vmatpush.bf16.msrb.mxu1 %v6273_v35  ;;  %2594 = vmatmul.bf16.vlgmr.msra.gmra.mxu2 %v1001_v40  ;;  %v6317_v35 = vld [vmem:[%s6725_s13 + $0x2d8] sm:$0xff]  ;;  %v6291_v40 = vld [vmem:[%s6725_s13 + $0x208] sm:$0xff] }
  0x64   : > { %2638 = vmatpush.bf16.msrb.mxu2 %v6281_v38  ;;  %2607 = vmatmul.bf16.vlgmr.msra.gmra.mxu3 %v1002_v42  ;;  %v6308_v38 = vld [vmem:[%s6725_s13 + $0x290] sm:$0xff]  ;;  %v6307_v42 = vld [vmem:[%s6725_s13 + $0x288] sm:$0xff] }
  0x65   : > { %2651 = vmatpush.bf16.msrb.mxu3 %v6289_v39  ;;  %v6316_v39 = vld [vmem:[%s6725_s13 + $0x2d0] sm:$0xff] }
  0x66   : > { %2613 = vmatpush.bf16.msrb.mxu0 %v6264_v44  ;;  %v6290_v44 = vld [vmem:[%s6725_s13 + $0x200] sm:$0xff] }
  0x67   : > { %2626 = vmatpush.bf16.msrb.mxu1 %v6272_v45  ;;  %v6298_v45 = vld [vmem:[%s6725_s13 + $0x240] sm:$0xff] }
  0x68   : > { %2639 = vmatpush.bf16.msrb.mxu2 %v6280_v46  ;;  %v6306_v46 = vld [vmem:[%s6725_s13 + $0x280] sm:$0xff] }
  0x69   : > { %2652 = vmatpush.bf16.msrb.mxu3 %v6288_v47  ;;  %v6314_v47 = vld [vmem:[%s6725_s13 + $0x2c0] sm:$0xff] }
  0x6a   : > { %2614 = vmatpush.bf16.msrb.mxu0 %v6263_v48  ;;  %v6329_v48 = vld [vmem:[%s6725_s13 + $0x338] sm:$0xff] }
  0x6b   : > { %2627 = vmatpush.bf16.msrb.mxu1 %v6271_v49  ;;  %v983_v49 = vld [vmem:[%s6916_s26 + $0x40] sm:$0xff] }
  0x6c   : > { %2640 = vmatpush.bf16.msrb.mxu2 %v6279_v50  ;;  %v985_v50 = vld [vmem:[%s6916_s26 + $0x50] sm:$0xff] }
  0x6d   : > { %2653 = vmatpush.bf16.msrb.mxu3 %v6287_v51  ;;  %v6337_v51 = vld [vmem:[%s6725_s13 + $0x378] sm:$0xff] }
  0x6e   : > { %2615 = vmatpush.bf16.msrb.mxu0 %v6262_v52  ;;  %v984_v52 = vld [vmem:[%s6916_s26 + $0x48] sm:$0xff] }
  0x6f   : > { %2628 = vmatpush.bf16.msrb.mxu1 %v6270_v53  ;;  %v986_v53 = vld [vmem:[%s6916_s26 + $0x58] sm:$0xff] }
  0x70   : > { %2641 = vmatpush.bf16.msrb.mxu2 %v6278_v54  ;;  %v6345_v54 = vld [vmem:[%s6725_s13 + $0x3b8] sm:$0xff] }
  0x71   : > { %2654 = vmatpush.bf16.msrb.mxu3 %v6286_v55  ;;  %v6353_v55 = vld [vmem:[%s6725_s13 + $0x3f8] sm:$0xff] }
  0x72   : > { %2616 = vmatpush.bf16.msrb.mxu0 %v6261_v56  ;;  %v1007_v56 = vpack.c.bf16 %v983_v49, %v983_v49  ;;  %v6365_v49 = vld [vmem:[%s6725_s13 + $0x458] sm:$0xff] }
  0x73   : > { %2629 = vmatpush.bf16.msrb.mxu1 %v6269_v57  ;;  %v1009_v57 = vpack.c.bf16 %v985_v50, %v985_v50  ;;  %v6373_v50 = vld [vmem:[%s6725_s13 + $0x498] sm:$0xff] }
  0x74   : > { %2642 = vmatpush.bf16.msrb.mxu2 %v6277_v58  ;;  %v1008_v58 = vpack.c.bf16 %v984_v52, %v984_v52  ;;  %v6356_v52 = vld [vmem:[%s6725_s13 + $0x410] sm:$0xff] }
  0x75   : > { %2655 = vmatpush.bf16.msrb.mxu3 %v6285_v59  ;;  %v1010_v59 = vpack.c.bf16 %v986_v53, %v986_v53  ;;  %v6364_v53 = vld [vmem:[%s6725_s13 + $0x450] sm:$0xff] }
  0x76   : > { %2617 = vmatpush.bf16.msrb.mxu0 %v6260_v60  ;;  %v6328_v60 = vld [vmem:[%s6725_s13 + $0x330] sm:$0xff] }
  0x77   : > { %2630 = vmatpush.bf16.msrb.mxu1 %v6268_v61  ;;  %v6336_v61 = vld [vmem:[%s6725_s13 + $0x370] sm:$0xff] }
  0x78   : > { %2643 = vmatpush.bf16.msrb.mxu2 %v6276_v62  ;;  %v6344_v62 = vld [vmem:[%s6725_s13 + $0x3b0] sm:$0xff] }
  0x79   : > { %2656 = vmatpush.bf16.msrb.mxu3 %v6284_v63  ;;  %v6352_v63 = vld [vmem:[%s6725_s13 + $0x3f0] sm:$0xff] }
  0x7a   : > { %2618 = vmatpush.bf16.msrb.mxu0 %v6259_v0  ;;  %v6327_v0 = vld [vmem:[%s6725_s13 + $0x328] sm:$0xff] }
  0x7b   : > { %2631 = vmatpush.bf16.msrb.mxu1 %v6267_v1  ;;  %v6335_v1 = vld [vmem:[%s6725_s13 + $0x368] sm:$0xff] }
  0x7c   : > { %2644 = vmatpush.bf16.msrb.mxu2 %v6275_v2  ;;  %v6343_v2 = vld [vmem:[%s6725_s13 + $0x3a8] sm:$0xff] }
  0x7d   : > { %2657 = vmatpush.bf16.msrb.mxu3 %v6283_v3  ;;  %v6351_v3 = vld [vmem:[%s6725_s13 + $0x3e8] sm:$0xff] }
  0x7e   : > { %2619 = vmatpush.bf16.msrb.mxu0 %v6258_v4  ;;  %v6326_v4 = vld [vmem:[%s6725_s13 + $0x320] sm:$0xff] }
  0x7f   : > { %2632 = vmatpush.bf16.msrb.mxu1 %v6266_v5  ;;  %v6334_v5 = vld [vmem:[%s6725_s13 + $0x360] sm:$0xff] }
  0x80   : > { %2645 = vmatpush.bf16.msrb.mxu2 %v6274_v6  ;;  %v6342_v6 = vld [vmem:[%s6725_s13 + $0x3a0] sm:$0xff] }
  0x81   : > { %2658 = vmatpush.bf16.msrb.mxu3 %v6282_v7  ;;  %2620 = vmatmul.bf16.vlgmr.msrb.gmra.mxu0 %v1003_v17  ;;  %v6350_v7 = vld [vmem:[%s6725_s13 + $0x3e0] sm:$0xff]  ;;  %v6331_v17 = vld [vmem:[%s6725_s13 + $0x348] sm:$0xff] }
  0x82   : > { %2664 = vmatpush.bf16.msra.mxu0 %v6297_v8  ;;  %2633 = vmatmul.bf16.vlgmr.msrb.gmra.mxu1 %v1004_v19  ;;  %v6325_v8 = vld [vmem:[%s6725_s13 + $0x318] sm:$0xff]  ;;  %v6347_v19 = vld [vmem:[%s6725_s13 + $0x3c8] sm:$0xff] }
  0x83   : > { %2677 = vmatpush.bf16.msra.mxu1 %v6305_v11  ;;  %2646 = vmatmul.bf16.vlgmr.msrb.gmra.mxu2 %v1005_v16  ;;  %v6349_v11 = vld [vmem:[%s6725_s13 + $0x3d8] sm:$0xff]  ;;  %v6323_v16 = vld [vmem:[%s6725_s13 + $0x308] sm:$0xff] }
  0x84   : > { %2690 = vmatpush.bf16.msra.mxu2 %v6313_v14  ;;  %2659 = vmatmul.bf16.vlgmr.msrb.gmra.mxu3 %v1006_v18  ;;  %v6340_v14 = vld [vmem:[%s6725_s13 + $0x390] sm:$0xff]  ;;  %v6339_v18 = vld [vmem:[%s6725_s13 + $0x388] sm:$0xff] }
  0x85   : > { %2703 = vmatpush.bf16.msra.mxu3 %v6321_v15  ;;  %v6348_v15 = vld [vmem:[%s6725_s13 + $0x3d0] sm:$0xff] }
  0x86   : > { %2665 = vmatpush.bf16.msra.mxu0 %v6296_v20  ;;  %v6322_v20 = vld [vmem:[%s6725_s13 + $0x300] sm:$0xff] }
  0x87   : > { %2678 = vmatpush.bf16.msra.mxu1 %v6304_v21  ;;  %v6330_v21 = vld [vmem:[%s6725_s13 + $0x340] sm:$0xff] }
  0x88   : > { %2691 = vmatpush.bf16.msra.mxu2 %v6312_v22  ;;  %v6338_v22 = vld [vmem:[%s6725_s13 + $0x380] sm:$0xff] }
  0x89   : > { %2704 = vmatpush.bf16.msra.mxu3 %v6320_v23  ;;  %v6346_v23 = vld [vmem:[%s6725_s13 + $0x3c0] sm:$0xff] }
  0x8a   : > { %2666 = vmatpush.bf16.msra.mxu0 %v6295_v24  ;;  %v6361_v24 = vld [vmem:[%s6725_s13 + $0x438] sm:$0xff] }
  0x8b   : > { %2679 = vmatpush.bf16.msra.mxu1 %v6303_v25  ;;  %v987_v25 = vld [vmem:[%s6916_s26 + $0x60] sm:$0xff] }
  0x8c   : > { %2692 = vmatpush.bf16.msra.mxu2 %v6311_v26  ;;  %v989_v26 = vld [vmem:[%s6916_s26 + $0x70] sm:$0xff] }
  0x8d   : > { %2705 = vmatpush.bf16.msra.mxu3 %v6319_v27  ;;  %v6369_v27 = vld [vmem:[%s6725_s13 + $0x478] sm:$0xff] }
  0x8e   : > { %2667 = vmatpush.bf16.msra.mxu0 %v6294_v28  ;;  %v988_v28 = vld [vmem:[%s6916_s26 + $0x68] sm:$0xff] }
  0x8f   : > { %2680 = vmatpush.bf16.msra.mxu1 %v6302_v29  ;;  %v990_v29 = vld [vmem:[%s6916_s26 + $0x78] sm:$0xff] }
  0x90   : > { %2693 = vmatpush.bf16.msra.mxu2 %v6310_v30  ;;  %v6377_v30 = vld [vmem:[%s6725_s13 + $0x4b8] sm:$0xff] }
  0x91   : > { %2706 = vmatpush.bf16.msra.mxu3 %v6318_v31  ;;  %v6385_v31 = vld [vmem:[%s6725_s13 + $0x4f8] sm:$0xff] }
  0x92   : > { %2668 = vmatpush.bf16.msra.mxu0 %v6293_v32  ;;  %v1011_v32 = vpack.c.bf16 %v987_v25, %v987_v25 }
  0x93   : > { %2681 = vmatpush.bf16.msra.mxu1 %v6301_v33  ;;  %v1013_v33 = vpack.c.bf16 %v989_v26, %v989_v26  ;;  %v6406_v26 = vld [vmem:[%s6725_s13 + $0x5a0] sm:$0xff] }
  0x94   : > { %2694 = vmatpush.bf16.msra.mxu2 %v6309_v34  ;;  %v1012_v34 = vpack.c.bf16 %v988_v28, %v988_v28 }
  0x95   : > { %2707 = vmatpush.bf16.msra.mxu3 %v6317_v35  ;;  %v1014_v35 = vpack.c.bf16 %v990_v29, %v990_v29  ;;  %v6389_v29 = vld [vmem:[%s6725_s13 + $0x518] sm:$0xff] }
  0x96   : > { %2669 = vmatpush.bf16.msra.mxu0 %v6292_v36  ;;  %v6360_v36 = vld [vmem:[%s6725_s13 + $0x430] sm:$0xff] }
  0x97   : > { %2682 = vmatpush.bf16.msra.mxu1 %v6300_v37  ;;  %v6368_v37 = vld [vmem:[%s6725_s13 + $0x470] sm:$0xff] }
  0x98   : > { %2695 = vmatpush.bf16.msra.mxu2 %v6308_v38  ;;  %v6376_v38 = vld [vmem:[%s6725_s13 + $0x4b0] sm:$0xff] }
  0x99   : > { %2708 = vmatpush.bf16.msra.mxu3 %v6316_v39  ;;  %v6384_v39 = vld [vmem:[%s6725_s13 + $0x4f0] sm:$0xff] }
  0x9a   : > { %2670 = vmatpush.bf16.msra.mxu0 %v6291_v40  ;;  %v6359_v40 = vld [vmem:[%s6725_s13 + $0x428] sm:$0xff] }
  0x9b   : > { %2683 = vmatpush.bf16.msra.mxu1 %v6299_v41  ;;  %v6367_v41 = vld [vmem:[%s6725_s13 + $0x468] sm:$0xff] }
  0x9c   : > { %2696 = vmatpush.bf16.msra.mxu2 %v6307_v42  ;;  %v6375_v42 = vld [vmem:[%s6725_s13 + $0x4a8] sm:$0xff] }
  0x9d   : > { %2709 = vmatpush.bf16.msra.mxu3 %v6315_v43  ;;  %v6383_v43 = vld [vmem:[%s6725_s13 + $0x4e8] sm:$0xff] }
  0x9e   : > { %2671 = vmatpush.bf16.msra.mxu0 %v6290_v44  ;;  %v6358_v44 = vld [vmem:[%s6725_s13 + $0x420] sm:$0xff] }
  0x9f   : > { %2684 = vmatpush.bf16.msra.mxu1 %v6298_v45  ;;  %v6366_v45 = vld [vmem:[%s6725_s13 + $0x460] sm:$0xff] }
  0xa0   : > { %2697 = vmatpush.bf16.msra.mxu2 %v6306_v46  ;;  %v6374_v46 = vld [vmem:[%s6725_s13 + $0x4a0] sm:$0xff] }
  0xa1   : > { %2710 = vmatpush.bf16.msra.mxu3 %v6314_v47  ;;  %2672 = vmatmul.bf16.vlgmr.msra.gmra.mxu0 %v1007_v56  ;;  %v6382_v47 = vld [vmem:[%s6725_s13 + $0x4e0] sm:$0xff]  ;;  %v6355_v56 = vld [vmem:[%s6725_s13 + $0x408] sm:$0xff] }
  0xa2   : > { %2716 = vmatpush.bf16.msrb.mxu0 %v6329_v48  ;;  %2685 = vmatmul.bf16.vlgmr.msra.gmra.mxu1 %v1008_v58  ;;  %v6357_v48 = vld [vmem:[%s6725_s13 + $0x418] sm:$0xff]  ;;  %v6371_v58 = vld [vmem:[%s6725_s13 + $0x488] sm:$0xff] }
  0xa3   : > { %2729 = vmatpush.bf16.msrb.mxu1 %v6337_v51  ;;  %2698 = vmatmul.bf16.vlgmr.msra.gmra.mxu2 %v1009_v57  ;;  %v6381_v51 = vld [vmem:[%s6725_s13 + $0x4d8] sm:$0xff]  ;;  %v6363_v57 = vld [vmem:[%s6725_s13 + $0x448] sm:$0xff] }
  0xa4   : > { %2742 = vmatpush.bf16.msrb.mxu2 %v6345_v54  ;;  %2711 = vmatmul.bf16.vlgmr.msra.gmra.mxu3 %v1010_v59  ;;  %v6372_v54 = vld [vmem:[%s6725_s13 + $0x490] sm:$0xff]  ;;  %v6379_v59 = vld [vmem:[%s6725_s13 + $0x4c8] sm:$0xff] }
  0xa5   : > { %2755 = vmatpush.bf16.msrb.mxu3 %v6353_v55  ;;  %v6380_v55 = vld [vmem:[%s6725_s13 + $0x4d0] sm:$0xff] }
  0xa6   : > { %2717 = vmatpush.bf16.msrb.mxu0 %v6328_v60  ;;  %v6354_v60 = vld [vmem:[%s6725_s13 + $0x400] sm:$0xff] }
  0xa7   : > { %2730 = vmatpush.bf16.msrb.mxu1 %v6336_v61  ;;  %v6362_v61 = vld [vmem:[%s6725_s13 + $0x440] sm:$0xff] }
  0xa8   : > { %2743 = vmatpush.bf16.msrb.mxu2 %v6344_v62  ;;  %v6370_v62 = vld [vmem:[%s6725_s13 + $0x480] sm:$0xff] }
  0xa9   : > { %2756 = vmatpush.bf16.msrb.mxu3 %v6352_v63  ;;  %v6378_v63 = vld [vmem:[%s6725_s13 + $0x4c0] sm:$0xff] }
  0xaa   : > { %2718 = vmatpush.bf16.msrb.mxu0 %v6327_v0  ;;  %v6393_v0 = vld [vmem:[%s6725_s13 + $0x538] sm:$0xff] }
  0xab   : > { %2731 = vmatpush.bf16.msrb.mxu1 %v6335_v1  ;;  %v991_v1 = vld [vmem:[%s6916_s26 + $0x80] sm:$0xff] }
  0xac   : > { %2744 = vmatpush.bf16.msrb.mxu2 %v6343_v2  ;;  %v993_v2 = vld [vmem:[%s6916_s26 + $0x90] sm:$0xff] }
  0xad   : > { %2757 = vmatpush.bf16.msrb.mxu3 %v6351_v3  ;;  %v6401_v3 = vld [vmem:[%s6725_s13 + $0x578] sm:$0xff] }
  0xae   : > { %2719 = vmatpush.bf16.msrb.mxu0 %v6326_v4  ;;  %v992_v4 = vld [vmem:[%s6916_s26 + $0x88] sm:$0xff] }
  0xaf   : > { %2732 = vmatpush.bf16.msrb.mxu1 %v6334_v5  ;;  %v994_v5 = vld [vmem:[%s6916_s26 + $0x98] sm:$0xff] }
  0xb0   : > { %2745 = vmatpush.bf16.msrb.mxu2 %v6342_v6  ;;  %v6409_v6 = vld [vmem:[%s6725_s13 + $0x5b8] sm:$0xff] }
  0xb1   : > { %2758 = vmatpush.bf16.msrb.mxu3 %v6350_v7  ;;  %v6417_v7 = vld [vmem:[%s6725_s13 + $0x5f8] sm:$0xff] }
  0xb2   : > { %2720 = vmatpush.bf16.msrb.mxu0 %v6325_v8  ;;  %v1015_v8 = vpack.c.bf16 %v991_v1, %v991_v1 }
  0xb3   : > { %2733 = vmatpush.bf16.msrb.mxu1 %v6333_v9  ;;  %v1017_v9 = vpack.c.bf16 %v993_v2, %v993_v2 }
  0xb4   : > { %2746 = vmatpush.bf16.msrb.mxu2 %v6341_v10  ;;  %v1016_v10 = vpack.c.bf16 %v992_v4, %v992_v4 }
  0xb5   : > { %2759 = vmatpush.bf16.msrb.mxu3 %v6349_v11  ;;  %v1018_v11 = vpack.c.bf16 %v994_v5, %v994_v5 }
  0xb6   : > { %2721 = vmatpush.bf16.msrb.mxu0 %v6324_v12  ;;  %v6392_v12 = vld [vmem:[%s6725_s13 + $0x530] sm:$0xff] }
  0xb7   : > { %2734 = vmatpush.bf16.msrb.mxu1 %v6332_v13  ;;  %v6400_v13 = vld [vmem:[%s6725_s13 + $0x570] sm:$0xff] }
  0xb8   : > { %2747 = vmatpush.bf16.msrb.mxu2 %v6340_v14  ;;  %v6408_v14 = vld [vmem:[%s6725_s13 + $0x5b0] sm:$0xff] }
  0xb9   : > { %2760 = vmatpush.bf16.msrb.mxu3 %v6348_v15  ;;  %v6416_v15 = vld [vmem:[%s6725_s13 + $0x5f0] sm:$0xff] }
  0xba   : > { %2722 = vmatpush.bf16.msrb.mxu0 %v6323_v16  ;;  %v6391_v16 = vld [vmem:[%s6725_s13 + $0x528] sm:$0xff] }
  0xbb   : > { %2735 = vmatpush.bf16.msrb.mxu1 %v6331_v17  ;;  %v6399_v17 = vld [vmem:[%s6725_s13 + $0x568] sm:$0xff] }
  0xbc   : > { %2748 = vmatpush.bf16.msrb.mxu2 %v6339_v18  ;;  %v6407_v18 = vld [vmem:[%s6725_s13 + $0x5a8] sm:$0xff] }
  0xbd   : > { %2761 = vmatpush.bf16.msrb.mxu3 %v6347_v19  ;;  %v6415_v19 = vld [vmem:[%s6725_s13 + $0x5e8] sm:$0xff] }
  0xbe   : > { %2723 = vmatpush.bf16.msrb.mxu0 %v6322_v20  ;;  %v1407_v20 = vld [vmem:[%s969_s1] sm:$0xff]  ;;  %s7528_s1 = sld [smem:[#allocation8_spill]] }
  0xbf   : > { %2736 = vmatpush.bf16.msrb.mxu1 %v6330_v21 }
  0xc0   : > { %2749 = vmatpush.bf16.msrb.mxu2 %v6338_v22  ;;  %v6390_v22 = vld [vmem:[%s6725_s13 + $0x520] sm:$0xff] }
  0xc1   : > { %2762 = vmatpush.bf16.msrb.mxu3 %v6346_v23  ;;  %2724 = vmatmul.bf16.vlgmr.msrb.gmra.mxu0 %v1011_v32  ;;  %v6398_v23 = vld [vmem:[%s6725_s13 + $0x560] sm:$0xff]  ;;  %v6413_v32 = vld [vmem:[%s6725_s13 + $0x5d8] sm:$0xff] }
  0xc2   : > { %2768 = vmatpush.bf16.msra.mxu0 %v6361_v24  ;;  %2737 = vmatmul.bf16.vlgmr.msrb.gmra.mxu1 %v1012_v34 }
  0xc3   : > { %2781 = vmatpush.bf16.msra.mxu1 %v6369_v27  ;;  %2750 = vmatmul.bf16.vlgmr.msrb.gmra.mxu2 %v1013_v33  ;;  %v6414_v27 = vld [vmem:[%s6725_s13 + $0x5e0] sm:$0xff] }
  0xc4   : > { %2794 = vmatpush.bf16.msra.mxu2 %v6377_v30  ;;  %2763 = vmatmul.bf16.vlgmr.msrb.gmra.mxu3 %v1014_v35  ;;  %v6397_v30 = vld [vmem:[%s6725_s13 + $0x558] sm:$0xff] }
  0xc5   : > { %2807 = vmatpush.bf16.msra.mxu3 %v6385_v31  ;;  %v6405_v31 = vld [vmem:[%s6725_s13 + $0x598] sm:$0xff] }
  0xc6   : > { %2769 = vmatpush.bf16.msra.mxu0 %v6360_v36 }
  0xc7   : > { %2782 = vmatpush.bf16.msra.mxu1 %v6368_v37  ;;  %v6388_v37 = vld [vmem:[%s6725_s13 + $0x510] sm:$0xff] }
  0xc8   : > { %2795 = vmatpush.bf16.msra.mxu2 %v6376_v38  ;;  %v6396_v38 = vld [vmem:[%s6725_s13 + $0x550] sm:$0xff] }
  0xc9   : > { %2808 = vmatpush.bf16.msra.mxu3 %v6384_v39 }
  0xca   : > { %2770 = vmatpush.bf16.msra.mxu0 %v6359_v40 }
  0xcb   : > { %2783 = vmatpush.bf16.msra.mxu1 %v6367_v41  ;;  %v6404_v41 = vld [vmem:[%s6725_s13 + $0x590] sm:$0xff] }
  0xcc   : > { %2796 = vmatpush.bf16.msra.mxu2 %v6375_v42  ;;  %v6412_v42 = vld [vmem:[%s6725_s13 + $0x5d0] sm:$0xff] }
  0xcd   : > { %2809 = vmatpush.bf16.msra.mxu3 %v6383_v43  ;;  %v6387_v43 = vld [vmem:[%s6725_s13 + $0x508] sm:$0xff] }
  0xce   : > { %2771 = vmatpush.bf16.msra.mxu0 %v6358_v44  ;;  %v6395_v44 = vld [vmem:[%s6725_s13 + $0x548] sm:$0xff] }
  0xcf   : > { %2784 = vmatpush.bf16.msra.mxu1 %v6366_v45  ;;  %v6403_v45 = vld [vmem:[%s6725_s13 + $0x588] sm:$0xff] }
  0xd0   : > { %2797 = vmatpush.bf16.msra.mxu2 %v6374_v46  ;;  %v6411_v46 = vld [vmem:[%s6725_s13 + $0x5c8] sm:$0xff] }
  0xd1   : > { %2810 = vmatpush.bf16.msra.mxu3 %v6382_v47 }
  0xd2   : > { %2772 = vmatpush.bf16.msra.mxu0 %v6357_v48 }
  0xd3   : > { %2785 = vmatpush.bf16.msra.mxu1 %v6365_v49  ;;  %v6386_v49 = vld [vmem:[%s6725_s13 + $0x500] sm:$0xff] }
  0xd4   : > { %2798 = vmatpush.bf16.msra.mxu2 %v6373_v50  ;;  %v6394_v50 = vld [vmem:[%s6725_s13 + $0x540] sm:$0xff] }
  0xd5   : > { %2811 = vmatpush.bf16.msra.mxu3 %v6381_v51  ;;  %v6402_v51 = vld [vmem:[%s6725_s13 + $0x580] sm:$0xff] }
  0xd6   : > { %2773 = vmatpush.bf16.msra.mxu0 %v6356_v52  ;;  %v995_v52 = vld [vmem:[%s6916_s26 + $0xa0] sm:$0xff] }
  0xd7   : > { %2786 = vmatpush.bf16.msra.mxu1 %v6364_v53  ;;  %v996_v53 = vld [vmem:[%s6916_s26 + $0xa8] sm:$0xff] }
  0xd8   : > { %2799 = vmatpush.bf16.msra.mxu2 %v6372_v54  ;;  %v6410_v54 = vld [vmem:[%s6725_s13 + $0x5c0] sm:$0xff] }
  0xd9   : > { %2812 = vmatpush.bf16.msra.mxu3 %v6380_v55  ;;  %v997_v55 = vld [vmem:[%s6916_s26 + $0xb0] sm:$0xff] }
  0xda   : > { %2774 = vmatpush.bf16.msra.mxu0 %v6355_v56  ;;  %v998_v56 = vld [vmem:[%s6916_s26 + $0xb8] sm:$0xff]  ;;  %s7527_s26 = sld [smem:[#allocation7_spill]] }
  0xdb   : > { %2787 = vmatpush.bf16.msra.mxu1 %v6363_v57  ;;  %v1019_v57 = vpack.c.bf16 %v995_v52, %v995_v52 }
  0xdc   : > { %2800 = vmatpush.bf16.msra.mxu2 %v6371_v58  ;;  %v1020_v58 = vpack.c.bf16 %v996_v53, %v996_v53 }
  0xdd   : > { %2813 = vmatpush.bf16.msra.mxu3 %v6379_v59  ;;  %v1021_v59 = vpack.c.bf16 %v997_v55, %v997_v55 }
  0xde   : > { %2775 = vmatpush.bf16.msra.mxu0 %v6354_v60  ;;  %v2569_v21 = vpop.f32.mrf.mxu0  ;;  %v1022_v60 = vpack.c.bf16 %v998_v56, %v998_v56 }
  0xdf   : > { %2788 = vmatpush.bf16.msra.mxu1 %v6362_v61  ;;  %v2570_v24 = vadd.f32 %v2569_v21, %v1407_v20  ;;  %v2582_v25 = vpop.f32.mrf.mxu1 }
  0xe0   : > { %2801 = vmatpush.bf16.msra.mxu2 %v6370_v62 }
  0xe1   : > { %2814 = vmatpush.bf16.msra.mxu3 %v6378_v63  ;;  %2776 = vmatmul.bf16.vlgmr.msra.gmra.mxu0 %v1015_v8  ;;  %v2583_v28 = vadd.f32 %v2582_v25, %v2570_v24 }
  0xe2   : > { %2820 = vmatpush.bf16.msrb.mxu0 %v6393_v0  ;;  %2789 = vmatmul.bf16.vlgmr.msra.gmra.mxu1 %v1016_v10 }
  0xe3   : > { %2833 = vmatpush.bf16.msrb.mxu1 %v6401_v3  ;;  %2802 = vmatmul.bf16.vlgmr.msra.gmra.mxu2 %v1017_v9 }
  0xe4   : > { %2846 = vmatpush.bf16.msrb.mxu2 %v6409_v6  ;;  %2815 = vmatmul.bf16.vlgmr.msra.gmra.mxu3 %v1018_v11 }
  0xe5   : > { %2859 = vmatpush.bf16.msrb.mxu3 %v6417_v7 }
  0xe6   : > { %2821 = vmatpush.bf16.msrb.mxu0 %v6392_v12  ;;  %v2595_v33 = vpop.f32.mrf.mxu2  ;;  %v2571_v36 = vpop.f32.mrf.mxu0 }
  0xe7   : > { %2834 = vmatpush.bf16.msrb.mxu1 %v6400_v13  ;;  %v2596_v34 = vadd.f32 %v2595_v33, %v2583_v28  ;;  %v2608_v35 = vpop.f32.mrf.mxu3  ;;  %v2584_v40 = vpop.f32.mrf.mxu1 }
  0xe8   : > { %2847 = vmatpush.bf16.msrb.mxu2 %v6408_v14 }
  0xe9   : > { %2860 = vmatpush.bf16.msrb.mxu3 %v6416_v15  ;;  %v2609_v39 = vadd.f32 %v2608_v35, %v2596_v34 }
  0xea   : > { %2822 = vmatpush.bf16.msrb.mxu0 %v6391_v16 }
  0xeb   : > { %2835 = vmatpush.bf16.msrb.mxu1 %v6399_v17 }
  0xec   : > { %2848 = vmatpush.bf16.msrb.mxu2 %v6407_v18 }
  0xed   : > { %2861 = vmatpush.bf16.msrb.mxu3 %v6415_v19 }
  0xee   : > { %2823 = vmatpush.bf16.msrb.mxu0 %v6390_v22  ;;  %v2597_v47 = vpop.f32.mrf.mxu2 }
  0xef   : > { %2836 = vmatpush.bf16.msrb.mxu1 %v6398_v23  ;;  %v2610_v48 = vpop.f32.mrf.mxu3 }
  0xf0   : > { %2849 = vmatpush.bf16.msrb.mxu2 %v6406_v26 }
  0xf1   : > { %2862 = vmatpush.bf16.msrb.mxu3 %v6414_v27 }
  0xf2   : > { %2824 = vmatpush.bf16.msrb.mxu0 %v6389_v29 }
  0xf3   : > { %2837 = vmatpush.bf16.msrb.mxu1 %v6397_v30 }
  0xf4   : > { %2850 = vmatpush.bf16.msrb.mxu2 %v6405_v31 }
  0xf5   : > { %2863 = vmatpush.bf16.msrb.mxu3 %v6413_v32 }
  0xf6   : > { %2825 = vmatpush.bf16.msrb.mxu0 %v6388_v37 }
  0xf7   : > { %2838 = vmatpush.bf16.msrb.mxu1 %v6396_v38 }
  0xf8   : > { %2851 = vmatpush.bf16.msrb.mxu2 %v6404_v41 }
  0xf9   : > { %2864 = vmatpush.bf16.msrb.mxu3 %v6412_v42 }
  0xfa   : > { %2826 = vmatpush.bf16.msrb.mxu0 %v6387_v43 }
  0xfb   : > { %2839 = vmatpush.bf16.msrb.mxu1 %v6395_v44 }
  0xfc   : > { %2852 = vmatpush.bf16.msrb.mxu2 %v6403_v45 }
  0xfd   : > { %2865 = vmatpush.bf16.msrb.mxu3 %v6411_v46 }
  0xfe   : > { %2827 = vmatpush.bf16.msrb.mxu0 %v6386_v49  ;;  %v2621_v61 = vpop.f32.mrf.mxu0 }
  0xff   : > { %2840 = vmatpush.bf16.msrb.mxu1 %v6394_v50  ;;  %v2622_v62 = vadd.f32 %v2621_v61, %v2609_v39  ;;  %v2634_v63 = vpop.f32.mrf.mxu1 }
 0x100   : > { %2853 = vmatpush.bf16.msrb.mxu2 %v6402_v51 }
 0x101   : > { %2866 = vmatpush.bf16.msrb.mxu3 %v6410_v54  ;;  %2828 = vmatmul.bf16.vlgmr.msrb.gmra.mxu0 %v1019_v57  ;;  %v2635_v0 = vadd.f32 %v2634_v63, %v2622_v62  ;;  %v6702_v57 = vmov 128.0   ;;  %v5752_v62 = vld [vmem:[%s6740_s25 + $0xb4] sm:$0xf0]  ;;  %v5758_v63 = vld [vmem:[%s6740_s25 + $0xb0] sm:$0xf] }
 0x102   : > { %2841 = vmatmul.bf16.vlgmr.msrb.gmra.mxu1 %v1020_v58  ;;  %6611 = vrcp.f32 %v6702_v57  ;;  %v5750_v58 = vld [vmem:[%s6740_s25 + $0xa8] sm:$0xf] }
 0x103   : > { %2854 = vmatmul.bf16.vlgmr.msrb.gmra.mxu2 %v1021_v59  ;;  %v6440_v59 = vld [vmem:[%s6740_s25 + $0xb0] sm:$0xf0] }
 0x104   : > { %2867 = vmatmul.bf16.vlgmr.msrb.gmra.mxu3 %v1022_v60  ;;  %v6439_v60 = vld [vmem:[%s6740_s25 + $0xac] sm:$0xf]  ;;  %v5751_v61 = vor.u32 %v6440_v59, %v5750_v58  ;;  %v5678_v59 = vld [vmem:[%s6740_s25 + $0x18] sm:$0xf] }
 0x106   : > { %v2647_v1 = vpop.f32.mrf.mxu2  ;;  %v2623_v4 = vpop.f32.mrf.mxu0  ;;  %3082 = vmatpush.bf16.msra.mxu0 %v5751_v61  ;;  %v6421_v61 = vld [vmem:[%s6740_s25 + $0x1c] sm:$0xf] }
 0x107   : > { %v2648_v2 = vadd.f32 %v2647_v1, %v2635_v0  ;;  %v2660_v3 = vpop.f32.mrf.mxu3  ;;  %v2636_v6 = vpop.f32.mrf.mxu1  ;;  %v6441_v0 = vld [vmem:[%s6740_s25 + $0xb8] sm:$0xf0]  ;;  %v5755_v1 = vor.u32 %v6439_v60, %v5752_v62  ;;  %v6422_v60 = vld [vmem:[%s6740_s25 + $0x20] sm:$0xf0] }
 0x108   : > { %v5679_v62 = vor.u32 %v6422_v60, %v5678_v59  ;;  %v6706_v60 = vmov -1e+30  }
 0x109   : > { %v2661_v5 = vadd.f32 %v2660_v3, %v2648_v2  ;;  %v5759_v2 = vor.u32 %v6441_v0, %v5758_v63  ;;  %v6612_v3 = vpop.eup %6611  ;;  %3095 = vmatpush.bf16.msra.mxu1 %v5755_v1  ;;  %v5680_v63 = vld [vmem:[%s6740_s25 + $0x24] sm:$0xf0]  ;;  %v5686_v0 = vld [vmem:[%s6740_s25 + $0x20] sm:$0xf]  ;;  %v6423_v1 = vld [vmem:[%s6740_s25 + $0x28] sm:$0xf0] }
 0x10a   : > { %v2881_v4 = vmul.f32 128.0, %v6612_v3  ;;  %vm2885_vm0 = vweird.f32 %v6612_v3 }
 0x10b   : > { %3108 = vmatpush.bf16.msra.mxu2 %v5759_v2  ;;  %v5683_v2 = vor.u32 %v6421_v61, %v5680_v63 }
 0x10e   : > { %v2649_v7 = vpop.f32.mrf.mxu2 }
 0x10f   : > { %v2662_v8 = vpop.f32.mrf.mxu3 }
 0x11e   : > { %v2673_v9 = vpop.f32.mrf.mxu0 }
 0x11f   : > { %v2674_v10 = vadd.f32 %v2673_v9, %v2661_v5  ;;  %v2686_v11 = vpop.f32.mrf.mxu1  ;;  %v2882_v5 = vsub.f32 1.0, %v2881_v4  ;;  %v5666_v4 = vld [vmem:[%s6740_s25] sm:$0xf] }
 0x121   : > { %v2687_v12 = vadd.f32 %v2686_v11, %v2674_v10  ;;  %v2883_v6 = vmul.f32 %v6612_v3, %v2882_v5  ;;  %v6419_v5 = vld [vmem:[%s6740_s25 + $0x8] sm:$0xf0] }
 0x123   : > { %v2884_v7 = vadd.f32 %v6612_v3, %v2883_v6  ;;  %v6418_v6 = vld [vmem:[%s6740_s25 + $0x4] sm:$0xf] }
 0x125   : > { %v7119_v8 = vsel %vm2885_vm0, %v6612_v3, %v2884_v7  ;;  %v5687_v3 = vor.u32 %v6423_v1, %v5686_v0  ;;  %v5667_v7 = vor.u32 %v6419_v5, %v5666_v4 }
 0x126   : > { %v2699_v13 = vpop.f32.mrf.mxu2  ;;  %v2675_v16 = vpop.f32.mrf.mxu0 }
 0x127   : > { %v2700_v14 = vadd.f32 %v2699_v13, %v2687_v12  ;;  %v2712_v15 = vpop.f32.mrf.mxu3  ;;  %v2688_v18 = vpop.f32.mrf.mxu1  ;;  %v5738_v13 = vld [vmem:[%s6740_s25 + $0x90] sm:$0xf] }
 0x128   : > { %v5746_v18 = vld [vmem:[%s6740_s25 + $0x98] sm:$0xf] }
 0x129   : > { %v2713_v17 = vadd.f32 %v2712_v15, %v2700_v14  ;;  %v6437_v14 = vld [vmem:[%s6740_s25 + $0x98] sm:$0xf0]  ;;  %v6436_v15 = vld [vmem:[%s6740_s25 + $0x94] sm:$0xf] }
 0x12a   : > { %v5739_v16 = vor.u32 %v6437_v14, %v5738_v13 }
 0x12c   : > { %3083 = vmatpush.bf16.msra.mxu0 %v5739_v16 }
 0x12e   : > { %v2701_v19 = vpop.f32.mrf.mxu2 }
 0x12f   : > { %v2714_v20 = vpop.f32.mrf.mxu3  ;;  %v6438_v19 = vld [vmem:[%s6740_s25 + $0xa0] sm:$0xf0] }
 0x13e   : > { %v2725_v21 = vpop.f32.mrf.mxu0 }
 0x13f   : > { %v2738_v22 = vpop.f32.mrf.mxu1  ;;  %v2726_v32 = vadd.f32 %v2725_v21, %v2713_v17  ;;  %v5740_v17 = vld [vmem:[%s6740_s25 + $0x9c] sm:$0xf0]  ;;  %v5747_v21 = vor.u32 %v6438_v19, %v5746_v18 }
 0x140   : > { %v5743_v20 = vor.u32 %v6436_v15, %v5740_v17 }
 0x141   : > { %v2739_v36 = vadd.f32 %v2738_v22, %v2726_v32  ;;  %3109 = vmatpush.bf16.msra.mxu2 %v5747_v21  ;;  %v5726_v22 = vld [vmem:[%s6740_s25 + $0x78] sm:$0xf]  ;;  %v6431_v32 = vld [vmem:[%s6740_s25 + $0x68] sm:$0xf0] }
 0x142   : > { %3096 = vmatpush.bf16.msra.mxu1 %v5743_v20 }
 0x146   : > { %v2751_v23 = vpop.f32.mrf.mxu2  ;;  %v2727_v25 = vpop.f32.mrf.mxu0 }
 0x147   : > { %v2764_v24 = vpop.f32.mrf.mxu3  ;;  %v2740_v26 = vpop.f32.mrf.mxu1  ;;  %v2752_v37 = vadd.f32 %v2751_v23, %v2739_v36  ;;  %v6434_v23 = vld [vmem:[%s6740_s25 + $0x80] sm:$0xf0]  ;;  %v5722_v36 = vld [vmem:[%s6740_s25 + $0x68] sm:$0xf] }
 0x148   : > { %v5727_v25 = vor.u32 %v6434_v23, %v5726_v22  ;;  %v5728_v26 = vld [vmem:[%s6740_s25 + $0x84] sm:$0xf0] }
 0x149   : > { %v2765_v40 = vadd.f32 %v2764_v24, %v2752_v37  ;;  %v6433_v24 = vld [vmem:[%s6740_s25 + $0x7c] sm:$0xf]  ;;  %v6432_v37 = vld [vmem:[%s6740_s25 + $0x70] sm:$0xf0] }
 0x14a   : > { %3084 = vmatpush.bf16.msra.mxu0 %v5727_v25 }
 0x14e   : > { %v2753_v27 = vpop.f32.mrf.mxu2 }
 0x14f   : > { %v2766_v28 = vpop.f32.mrf.mxu3  ;;  %v5734_v27 = vld [vmem:[%s6740_s25 + $0x80] sm:$0xf] }
 0x150   : > { %v6435_v28 = vld [vmem:[%s6740_s25 + $0x88] sm:$0xf0] }
 0x15e   : > { %v2777_v29 = vpop.f32.mrf.mxu0 }
 0x15f   : > { %v2790_v30 = vpop.f32.mrf.mxu1  ;;  %v2778_v41 = vadd.f32 %v2777_v29, %v2765_v40  ;;  %v5731_v29 = vor.u32 %v6433_v24, %v5728_v26  ;;  %v5702_v40 = vld [vmem:[%s6740_s25 + $0x48] sm:$0xf]  ;;  %v6599_v24 = vld [vmem:[%s6730_s17] ss:$0 sm:$0xff] }
 0x161   : > { %v2791_v42 = vadd.f32 %v2790_v30, %v2778_v41  ;;  %v5735_v30 = vor.u32 %v6435_v28, %v5734_v27  ;;  %3097 = vmatpush.bf16.msra.mxu1 %v5731_v29  ;;  %v6428_v41 = vld [vmem:[%s6740_s25 + $0x50] sm:$0xf0]  ;;  %v6600_v27 = vld [vmem:[%s6735_s21] ss:$0 sm:$0xff] }
 0x163   : > { %3110 = vmatpush.bf16.msra.mxu2 %v5735_v30 }
 0x166   : > { %v2803_v31 = vpop.f32.mrf.mxu2  ;;  %v2779_v34 = vpop.f32.mrf.mxu0 }
 0x167   : > { %v2816_v33 = vpop.f32.mrf.mxu3  ;;  %v2792_v35 = vpop.f32.mrf.mxu1  ;;  %v2804_v43 = vadd.f32 %v2803_v31, %v2791_v42  ;;  %v5714_v31 = vld [vmem:[%s6740_s25 + $0x60] sm:$0xf]  ;;  %v6427_v42 = vld [vmem:[%s6740_s25 + $0x4c] sm:$0xf] }
 0x168   : > { %v5715_v34 = vor.u32 %v6431_v32, %v5714_v31  ;;  %v5716_v35 = vld [vmem:[%s6740_s25 + $0x6c] sm:$0xf0]  ;;  %v2946_v31 = vld [vmem:[%s6745_s29] sm:$0x7] }
 0x169   : > { %v2817_v44 = vadd.f32 %v2816_v33, %v2804_v43  ;;  %v6430_v33 = vld [vmem:[%s6740_s25 + $0x64] sm:$0xf]  ;;  %v5703_v43 = vor.u32 %v6428_v41, %v5702_v40  ;;  %v2948_v32 = vperm.slane %v2946_v31, 0  ;;  %v2950_v40 = vperm.slane %v2946_v31, 2 }
 0x16a   : > { %3085 = vmatpush.bf16.msra.mxu0 %v5715_v34 }
 0x16e   : > { %v2805_v38 = vpop.f32.mrf.mxu2  ;;  %3086 = vmatpush.bf16.msra.mxu0 %v5703_v43 }
 0x16f   : > { %v2818_v39 = vpop.f32.mrf.mxu3  ;;  %v5719_v38 = vor.u32 %v6430_v33, %v5716_v35  ;;  %v2949_v33 = vperm.slane %v2946_v31, 1 }
 0x170   : > { %v5723_v39 = vor.u32 %v6432_v37, %v5722_v36 }
 0x171   : > { %3098 = vmatpush.bf16.msra.mxu1 %v5719_v38 }
 0x172   : > { %3111 = vmatpush.bf16.msra.mxu2 %v5723_v39 }
 0x17e   : > { %v2829_v45 = vpop.f32.mrf.mxu0 }
 0x17f   : > { %v2842_v46 = vpop.f32.mrf.mxu1  ;;  %v2830_v47 = vadd.f32 %v2829_v45, %v2817_v44  ;;  %v5704_v44 = vld [vmem:[%s6740_s25 + $0x54] sm:$0xf0]  ;;  %v5710_v45 = vld [vmem:[%s6740_s25 + $0x50] sm:$0xf] }
 0x181   : > { %v2843_v48 = vadd.f32 %v2842_v46, %v2830_v47  ;;  %v6429_v46 = vld [vmem:[%s6740_s25 + $0x58] sm:$0xf0]  ;;  %v5707_v47 = vor.u32 %v6427_v42, %v5704_v44 }
 0x183   : > { %3099 = vmatpush.bf16.msra.mxu1 %v5707_v47 }
 0x186   : > { %v2855_v49 = vpop.f32.mrf.mxu2  ;;  %v2831_v52 = vpop.f32.mrf.mxu0 }
 0x187   : > { %v2868_v50 = vpop.f32.mrf.mxu3  ;;  %v2856_v51 = vadd.f32 %v2855_v49, %v2843_v48  ;;  %v2844_v53 = vpop.f32.mrf.mxu1  ;;  %v5711_v48 = vor.u32 %v6429_v46, %v5710_v45  ;;  %v5690_v49 = vld [vmem:[%s6740_s25 + $0x30] sm:$0xf] }
 0x188   : > { %v5692_v53 = vld [vmem:[%s6740_s25 + $0x3c] sm:$0xf0] }
 0x189   : > { %v7110_v54 = vadd.f32 %v2868_v50, %v2856_v51  ;;  %3112 = vmatpush.bf16.msra.mxu2 %v5711_v48  ;;  %v6425_v50 = vld [vmem:[%s6740_s25 + $0x38] sm:$0xf0]  ;;  %v6424_v51 = vld [vmem:[%s6740_s25 + $0x34] sm:$0xf] }
 0x18a   : > { %v5691_v52 = vor.u32 %v6425_v50, %v5690_v49  ;;  %v5695_v57 = vor.u32 %v6424_v51, %v5692_v53 }
 0x18b   : > { %2878 = vadd.xlane.f32.xlu0 %v7110_v54 }
 0x18c   : > { %3087 = vmatpush.bf16.msra.mxu0 %v5691_v52  ;;  %3100 = vmatpush.bf16.msra.mxu1 %v5695_v57 }
 0x18e   : > { %v2857_v55 = vpop.f32.mrf.mxu2 }
 0x18f   : > { %v2870_v56 = vpop.f32.mrf.mxu3  ;;  %v5698_v55 = vld [vmem:[%s6740_s25 + $0x38] sm:$0xf] }
 0x190   : > { %v6426_v56 = vld [vmem:[%s6740_s25 + $0x40] sm:$0xf0]  ;;  %3088 = vmatpush.bf16.msra.mxu0 %v5679_v62  ;;  %3101 = vmatpush.bf16.msra.mxu1 %v5683_v2 }
 0x191   : > { %v5699_v58 = vor.u32 %v6426_v56, %v5698_v55  ;;  %v2872_v56 = vlaneseq }
 0x193   : > { %3113 = vmatpush.bf16.msra.mxu2 %v5699_v58  ;;  %v2873_v58 = vand.u32 127, %v2872_v56 }
 0x194   : > { %3089 = vmatpush.bf16.msra.mxu0 %v5667_v7 }
 0x195   : > { %vm2874_vm6 = vcmp.lt.s32.totalorder %v2873_v58, 5 }
 0x196   : > { %v7191_v61 = vsel %vm2874_vm6, 0.0, %v6706_v60 }
 0x197   : > { %3114 = vmatpush.bf16.msra.mxu2 %v5687_v3 }
 0x1fe   : > { %v2879_v9 = vpop.xlane.xlu0 %2878 }
 0x1ff   : > { %v2887_v10 = vmul.f32 %v7119_v8, %v2879_v9  ;;  %v5668_v9 = vld [vmem:[%s6740_s25 + $0xc] sm:$0xf0] }
 0x200   : > { %v5671_v13 = vor.u32 %v6418_v6, %v5668_v9 }
 0x201   : > { %v7123_v11 = vsub.f32 %v7110_v54, %v2887_v10  ;;  %v5674_v10 = vld [vmem:[%s6740_s25 + $0x8] sm:$0xf] }
 0x202   : > { %3102 = vmatpush.bf16.msra.mxu1 %v5671_v13 }
 0x203   : > { %v2889_v12 = vmul.f32 %v7123_v11, %v7123_v11 }
 0x205   : > { %2890 = vadd.xlane.f32.xlu0 %v2889_v12  ;;  %v6420_v12 = vld [vmem:[%s6740_s25 + $0x10] sm:$0xf0] }
 0x206   : > { %v5675_v14 = vor.u32 %v6420_v12, %v5674_v10 }
 0x208   : > { %3115 = vmatpush.bf16.msra.mxu2 %v5675_v14 }
 0x278   : > { %v2891_v15 = vpop.xlane.xlu0 %2890 }
 0x279   : > { %v2892_v16 = vmul.f32 %v2891_v15, %v7119_v8 }
 0x27b   : > { %v2893_v17 = vadd.f32 1e-06, %v2892_v16 }
 0x27d   : > { %6613 = vrsqrt.f32 %v2893_v17  ;;  %vm2900_vm2 = vweird.f32 %v2893_v17 }
 0x283   : > { %v6614_v18 = vpop.eup %6613 }
 0x284   : > { %v2895_v19 = vmul.f32 %v6614_v18, %v2893_v17  ;;  %vm2901_vm1 = vweird.f32 %v6614_v18 }
 0x285   : > { %vm2902_vm3 = vmor %vm2900_vm2, %vm2901_vm1 }
 0x286   : > { %v2896_v20 = vmul.f32 %v6614_v18, %v2895_v19 }
 0x288   : > { %v2897_v21 = vmul.f32 0.5, %v2896_v20 }
 0x28a   : > { %v2898_v22 = vsub.f32 1.5, %v2897_v21 }
 0x28c   : > { %v2899_v23 = vmul.f32 %v6614_v18, %v2898_v22 }
 0x28e   : > { %v2903_v25 = vsel %vm2902_vm3, %v6614_v18, %v2899_v23  ;;  %vm4686_vm3 = vcmask 1040384  }
 0x28f   : > { %v2904_v26 = vmul.f32 %v2903_v25, %v7123_v11 }
 0x291   : > { %v2908_v28 = vmul.f32 %v6599_v24, %v2904_v26 }
 0x293   : > { %v2912_v29 = vadd.f32 %v6600_v27, %v2908_v28 }
 0x295   : > { %v2913_v30 = vpack.c.bf16 %v2912_v29, %v2912_v29 }
 0x297   : > { %3090 = vmatmul.bf16.vlgmr.msra.gmra.mxu0 %v2913_v30  ;;  %3103 = vmatmul.bf16.vlgmr.msra.gmra.mxu1 %v2913_v30 }
 0x298   : > { %3116 = vmatmul.bf16.vlgmr.msra.gmra.mxu2 %v2913_v30 }
 0x314   : > { %v3091_v34 = vpop.f32.mrf.mxu0  ;;  %v3104_v35 = vpop.f32.mrf.mxu1 }
 0x315   : > { %v3092_v36 = vadd.f32 %v3091_v34, %v2948_v32  ;;  %v3105_v37 = vadd.f32 %v3104_v35, %v2949_v33 }
 0x317   : > { %v3121_v38 = vpack.c.bf16 %v3092_v36, %v3092_v36  ;;  %v3122_v39 = vpack.c.bf16 %v3105_v37, %v3105_v37 }
 0x319   : > { %3294 = vrot.lane.b32.xlu0 %v3122_v39, %s6703_s2  ;;  %3181 = vrot.lane.b32.xlu1 %v3122_v39, %s6704_s7  ;;  %v3129_v11 = vsel %vm3124_vm4, %v3122_v39, 0 }
 0x31a   : > { %3178 = vrot.lane.b32.xlu2 %v3121_v38, %s6704_s7  ;;  %3138 = vmatpush.bf16.xpose.msra.mxu3 %v3129_v11 }
 0x31b   : > { %v3117_v41 = vpop.f32.mrf.mxu2 }
 0x31c   : > { %v3118_v42 = vadd.f32 %v3117_v41, %v2950_v40  ;;  %v3093_v43 = vpop.f32.mrf.mxu0  ;;  %v3106_v44 = vpop.f32.mrf.mxu1 }
 0x31e   : > { %v7178_v45 = vpack.c.bf16 %v3118_v42, %v3118_v42 }
 0x320   : > { %v3162_v46 = vsel %vm3160_vm5, %v7178_v45, 0 }
 0x321   : > { %3238 = vrot.lane.b32.xlu1 %v3122_v39, %s6705_s10  ;;  %5760 = vmatmul.msk.bf16.vlgmr.msra.gmra.mxu3 %vm3124_vm4, %v3121_v38 }
 0x322   : > { %3171 = vmatpush.bf16.msrb.mxu3 %v3162_v46  ;;  %3236 = vrot.lane.b32.xlu2 %v3121_v38, %s6705_s10 }
 0x323   : > { %v3119_v47 = vpop.f32.mrf.mxu2 }
 0x329   : > { %3292 = vrot.lane.b32.xlu1 %v3121_v38, %s6703_s2 }
 0x374   : > { %v3179_v52 = vpop.permute.xlu2 %3178 }
 0x37c   : > { %v3237_v57 = vpop.permute.xlu2 %3236 }
 0x38b   : > { %v3295_v48 = vpop.permute.xlu0 %3294  ;;  %v3182_v49 = vpop.permute.xlu1 %3181 }
 0x38c   : > { %v3300_v50 = vsel %vm3124_vm4, %v3295_v48, 0  ;;  %v3187_v51 = vsel %vm3124_vm4, %v3182_v49, 0 }
 0x38d   : > { %3196 = vmatpush.bf16.xpose.msrb.mxu0 %v3187_v51 }
 0x393   : > { %v3239_v53 = vpop.permute.xlu1 %3238 }
 0x394   : > { %v3244_v55 = vsel %vm3124_vm4, %v3239_v53, 0  ;;  %5762 = vmatmul.msk.bf16.vlgmr.msrb.gmra.mxu0 %vm3124_vm4, %v3179_v52 }
 0x395   : > { %3309 = vmatpush.bf16.xpose.msra.mxu0 %v3300_v50  ;;  %3253 = vmatpush.bf16.xpose.msrb.mxu2 %v3244_v55 }
 0x39b   : > { %v3293_v59 = vpop.permute.xlu1 %3292 }
 0x39c   : > { %5764 = vmatmul.msk.bf16.vlgmr.msrb.gmra.mxu2 %vm3124_vm4, %v3237_v57 }
 0x3a4   : > { %5766 = vmatmul.msk.bf16.vlgmr.msra.gmra.mxu0 %vm3124_vm4, %v3293_v59  ;;  %v3140_v62 = vpop.f32.mrf.mxu3 }
 0x3a5   : > { %v3141_v63 = vadd.f32 %v3140_v62, %v7191_v61 }
 0x3a7   : > { %v3145_v0 = vsel %vm3144_vm7, %v3141_v63, -inf }
 0x3a8   : > { %3146 = vmax.xlane.f32.xlu2 %v3145_v0 }
 0x3ac   : > { %v3142_v1 = vpop.f32.mrf.mxu3 }
 0x411   : > { %v3198_v2 = vpop.f32.mrf.mxu0 }
 0x412   : > { %v3199_v3 = vadd.f32 %v3198_v2, %v7191_v61 }
 0x414   : > { %v3202_v4 = vsel %vm3144_vm7, %v3199_v3, -inf }
 0x415   : > { %3203 = vmax.xlane.f32.xlu1 %v3202_v4  ;;  %v6448_v4 = vld [vmem:[%s6750_s3 + $0x30] sm:$0xff] }
 0x419   : > { %v3200_v5 = vpop.f32.mrf.mxu0 }
 0x41a   : > { %v6447_v5 = vld [vmem:[%s6750_s3 + $0x28] sm:$0xff] }
 0x41b   : > { %v3147_v6 = vpop.xlane.xlu2 %3146 }
 0x41c   : > { %v3148_v7 = vsub.f32 %v3141_v63, %v3147_v6  ;;  %v6446_v6 = vld [vmem:[%s6750_s3 + $0x20] sm:$0xff] }
 0x41e   : > { %v3149_v9 = vmul.f32 1.442695, %v3148_v7  ;;  %v6445_v7 = vld [vmem:[%s6750_s3 + $0x18] sm:$0xff] }
 0x41f   : > { %v3255_v10 = vpop.f32.mrf.mxu2 }
 0x420   : > { %v3256_v12 = vadd.f32 %v3255_v10, %v7191_v61  ;;  %6615 = vpow2.f32 %v3149_v9  ;;  %v6444_v9 = vld [vmem:[%s6750_s3 + $0x10] sm:$0xff]  ;;  %v6443_v10 = vld [vmem:[%s6750_s3 + $0x8] sm:$0xff] }
 0x421   : > { %v3311_v13 = vpop.f32.mrf.mxu0 }
 0x422   : > { %v3312_v14 = vadd.f32 %v3311_v13, %v7191_v61  ;;  %v3259_v15 = vsel %vm3144_vm7, %v3256_v12, -inf }
 0x423   : > { %3260 = vmax.xlane.f32.xlu0 %v3259_v15 }
 0x424   : > { %v3315_v16 = vsel %vm3144_vm7, %v3312_v14, -inf }
 0x425   : > { %3316 = vmax.xlane.f32.xlu2 %v3315_v16 }
 0x426   : > { %v6616_v18 = vpop.eup %6615 }
 0x427   : > { %v3257_v17 = vpop.f32.mrf.mxu2  ;;  %v3151_v20 = vsel %vm3144_vm7, %v6616_v18, 0.0 }
 0x429   : > { %v3313_v19 = vpop.f32.mrf.mxu0 }
 0x42d   : > { %3152 = vadd.xlane.f32.xlu2 %v3151_v20  ;;  %v6601_v20 = vld [vmem:[%s6755_s8] ss:$0 sm:$0xff] }
 0x445   : > { %3215 = vrot.lane.b32.xlu2 %v7178_v45, %s6704_s7 }
 0x488   : > { %v3204_v21 = vpop.xlane.xlu1 %3203 }
 0x489   : > { %v3205_v22 = vsub.f32 %v3199_v3, %v3204_v21  ;;  %v6449_v3 = vld [vmem:[%s6750_s3 + $0x38] sm:$0xff] }
 0x48a   : > { %3434 = vmatpush.bf16.msra.mxu2 %v6449_v3  ;;  %v6452_v3 = vld [vmem:[%s6770_s24 + $0x14] sm:$0xf] }
 0x48b   : > { %v3206_v23 = vmul.f32 1.442695, %v3205_v22 }
 0x48d   : > { %6617 = vpow2.f32 %v3206_v23 }
 0x48e   : > { %3435 = vmatpush.bf16.msra.mxu2 %v6448_v4 }
 0x492   : > { %3436 = vmatpush.bf16.msra.mxu2 %v6447_v5  ;;  %v5812_v5 = vld [vmem:[%s6770_s24 + $0x18] sm:$0xf0] }
 0x493   : > { %v6618_v24 = vpop.eup %6617 }
 0x494   : > { %v3208_v25 = vsel %vm3144_vm7, %v6618_v24, 0.0 }
 0x495   : > { %3209 = vadd.xlane.f32.xlu1 %v3208_v25  ;;  %v5858_v25 = vld [vmem:[%s6770_s24 + $0x70] sm:$0xf] }
 0x496   : > { %v3261_v26 = vpop.xlane.xlu0 %3260  ;;  %3437 = vmatpush.bf16.msra.mxu2 %v6446_v6  ;;  %v5802_v6 = vld [vmem:[%s6770_s24] sm:$0xf] }
 0x497   : > { %v3262_v27 = vsub.f32 %v3256_v12, %v3261_v26  ;;  %v6442_v12 = vld [vmem:[%s6750_s3] sm:$0xff]  ;;  %v6465_v26 = vld [vmem:[%s6770_s24 + $0x74] sm:$0xf0] }
 0x498   : > { %v3317_v28 = vpop.xlane.xlu2 %3316 }
 0x499   : > { %v3263_v29 = vmul.f32 1.442695, %v3262_v27  ;;  %v3318_v30 = vsub.f32 %v3312_v14, %v3317_v28  ;;  %v6464_v27 = vld [vmem:[%s6770_s24 + $0x74] sm:$0xf]  ;;  %v5859_v28 = vor.u32 %v6465_v26, %v5858_v25 }
 0x49a   : > { %3438 = vmatpush.bf16.msra.mxu2 %v6445_v7  ;;  %v6451_v7 = vld [vmem:[%s6770_s24 + $0x4] sm:$0xf0] }
 0x49b   : > { %6619 = vpow2.f32 %v3263_v29  ;;  %v3319_v31 = vmul.f32 1.442695, %v3318_v30  ;;  %v5860_v29 = vld [vmem:[%s6770_s24 + $0x78] sm:$0xf0] }
 0x49c   : > { %v5863_v30 = vor.u32 %v6464_v27, %v5860_v29  ;;  %v6602_v27 = vld [vmem:[%s6760_s14] ss:$0 sm:$0xff] }
 0x49d   : > { %6621 = vpow2.f32 %v3319_v31 }
 0x49e   : > { %3439 = vmatpush.bf16.msra.mxu2 %v6444_v9  ;;  %3594 = vmatpush.bf16.msrb.mxu0 %v5863_v30  ;;  %v5815_v9 = vor.u32 %v6452_v3, %v5812_v5  ;;  %v6603_v30 = vld [vmem:[%s6765_s19] ss:$0 sm:$0xff] }
 0x4a0   : > { %v3153_v32 = vpop.xlane.xlu2 %3152 }
 0x4a1   : > { %v6620_v33 = vpop.eup %6619  ;;  %6623 = vrcp.f32 %v3153_v32 }
 0x4a2   : > { %v3265_v34 = vsel %vm3144_vm7, %v6620_v33, 0.0  ;;  %3440 = vmatpush.bf16.msra.mxu2 %v6443_v10  ;;  %v6450_v10 = vld [vmem:[%s6770_s24 + $0x4] sm:$0xf] }
 0x4a3   : > { %v6622_v35 = vpop.eup %6621  ;;  %3266 = vadd.xlane.f32.xlu1 %v3265_v34  ;;  %v5850_v34 = vld [vmem:[%s6770_s24 + $0x60] sm:$0xf] }
 0x4a4   : > { %v3321_v36 = vsel %vm3144_vm7, %v6622_v35, 0.0 }
 0x4a5   : > { %3322 = vadd.xlane.f32.xlu0 %v3321_v36  ;;  %v6462_v36 = vld [vmem:[%s6770_s24 + $0x64] sm:$0xf] }
 0x4a6   : > { %3441 = vmatpush.bf16.msra.mxu2 %v6442_v12  ;;  %v5804_v12 = vld [vmem:[%s6770_s24 + $0x8] sm:$0xf0] }
 0x4a7   : > { %v6624_v37 = vpop.eup %6623 }
 0x4a8   : > { %v3155_v38 = vmul.f32 %v6624_v37, %v6616_v18  ;;  %v3216_v39 = vpop.permute.xlu2 %3215 }
 0x4a9   : > { %v3221_v40 = vsel %vm3160_vm5, %v3216_v39, 0 }
 0x4aa   : > { %v3156_v11 = vpack.c.bf16 %v3155_v38, %v3155_v38  ;;  %3230 = vmatpush.bf16.msrb.mxu1 %v3221_v40  ;;  %v5852_v38 = vld [vmem:[%s6770_s24 + $0x68] sm:$0xf0]  ;;  %v5842_v40 = vld [vmem:[%s6770_s24 + $0x50] sm:$0xf] }
 0x4ab   : > { %v5855_v39 = vor.u32 %v6462_v36, %v5852_v38  ;;  %v6472_v36 = vld [vmem:[%s6780_s6 + $0x30] sm:$0xff]  ;;  %v6477_v38 = vld [vmem:[%s6780_s6 + $0x58] sm:$0xff] }
 0x4ac   : > { %5761 = vmatmul.msk.bf16.vlgmr.msrb.gmra.mxu3 %vm3144_vm7, %v3156_v11  ;;  %v6461_v11 = vld [vmem:[%s6770_s24 + $0x54] sm:$0xf0] }
 0x4ad   : > { %3595 = vmatpush.bf16.msrb.mxu0 %v5855_v39  ;;  %v6470_v39 = vld [vmem:[%s6780_s6 + $0x20] sm:$0xff] }
 0x4b9   : > { %3327 = vrot.lane.b32.xlu0 %v7178_v45, %s6703_s2 }
 0x4bc   : > { %3271 = vrot.lane.b32.xlu1 %v7178_v45, %s6705_s10 }
 0x508   : > { %v3210_v41 = vpop.xlane.xlu1 %3209 }
 0x509   : > { %6625 = vrcp.f32 %v3210_v41  ;;  %v6460_v41 = vld [vmem:[%s6770_s24 + $0x54] sm:$0xf] }
 0x50f   : > { %v6626_v42 = vpop.eup %6625 }
 0x510   : > { %v3212_v43 = vmul.f32 %v6626_v42, %v6618_v24  ;;  %v5843_v42 = vor.u32 %v6461_v11, %v5842_v40  ;;  %v6476_v40 = vld [vmem:[%s6780_s6 + $0x50] sm:$0xff]  ;;  %v6469_v11 = vld [vmem:[%s6780_s6 + $0x18] sm:$0xff] }
 0x512   : > { %v3213_v44 = vpack.c.bf16 %v3212_v43, %v3212_v43  ;;  %v5844_v43 = vld [vmem:[%s6770_s24 + $0x58] sm:$0xf0] }
 0x514   : > { %5763 = vmatmul.msk.bf16.vlgmr.msrb.gmra.mxu1 %vm3144_vm7, %v3213_v44  ;;  %v5847_v44 = vor.u32 %v6460_v41, %v5844_v43  ;;  %v6475_v41 = vld [vmem:[%s6780_s6 + $0x48] sm:$0xff]  ;;  %v6474_v43 = vld [vmem:[%s6780_s6 + $0x40] sm:$0xff] }
 0x516   : > { %v3267_v47 = vpop.xlane.xlu1 %3266  ;;  %3596 = vmatpush.bf16.msrb.mxu0 %v5847_v44  ;;  %v6467_v44 = vld [vmem:[%s6780_s6 + $0x8] sm:$0xff] }
 0x518   : > { %v3323_v46 = vpop.xlane.xlu0 %3322 }
 0x519   : > { %6627 = vrcp.f32 %v3323_v46  ;;  %v5834_v46 = vld [vmem:[%s6770_s24 + $0x40] sm:$0xf] }
 0x51a   : > { %6629 = vrcp.f32 %v3267_v47  ;;  %v6459_v47 = vld [vmem:[%s6770_s24 + $0x44] sm:$0xf0] }
 0x51f   : > { %v6628_v48 = vpop.eup %6627 }
 0x520   : > { %v6630_v49 = vpop.eup %6629  ;;  %v3325_v50 = vmul.f32 %v6628_v48, %v6622_v35  ;;  %v6463_v35 = vld [vmem:[%s6770_s24 + $0x64] sm:$0xf0]  ;;  %v6458_v48 = vld [vmem:[%s6770_s24 + $0x44] sm:$0xf] }
 0x521   : > { %v3269_v53 = vmul.f32 %v6630_v49, %v6620_v33  ;;  %v5851_v37 = vor.u32 %v6463_v35, %v5850_v34  ;;  %v5835_v49 = vor.u32 %v6459_v47, %v5834_v46  ;;  %v6473_v34 = vld [vmem:[%s6780_s6 + $0x38] sm:$0xff]  ;;  %v6479_v35 = vld [vmem:[%s6780_s6 + $0x68] sm:$0xff]  ;;  %v3495_v46 = vld [vmem:[%s6775_s30] sm:$0x3] }
 0x522   : > { %v3326_v45 = vpack.c.bf16 %v3325_v50, %v3325_v50  ;;  %v5836_v50 = vld [vmem:[%s6770_s24 + $0x48] sm:$0xf0]  ;;  %v6466_v47 = vld [vmem:[%s6780_s6] sm:$0xff] }
 0x523   : > { %v3270_v58 = vpack.c.bf16 %v3269_v53, %v3269_v53  ;;  %v6457_v53 = vld [vmem:[%s6770_s24 + $0x34] sm:$0xf0] }
 0x52b   : > { %v3328_v51 = vpop.permute.xlu0 %3327 }
 0x52c   : > { %v3333_v52 = vsel %vm3160_vm5, %v3328_v51, 0  ;;  %v5839_v51 = vor.u32 %v6458_v48, %v5836_v50  ;;  %v3498_v48 = vperm.slane %v3495_v46, 1 }
 0x52d   : > { %3342 = vmatpush.bf16.msra.mxu1 %v3333_v52  ;;  %v5826_v52 = vld [vmem:[%s6770_s24 + $0x30] sm:$0xf] }
 0x52e   : > { %v3272_v55 = vpop.permute.xlu1 %3271  ;;  %3597 = vmatpush.bf16.msrb.mxu0 %v5839_v51 }
 0x52f   : > { %v3277_v56 = vsel %vm3160_vm5, %v3272_v55, 0  ;;  %v3173_v57 = vpop.f32.mrf.mxu3  ;;  %v5827_v55 = vor.u32 %v6457_v53, %v5826_v52  ;;  %v3497_v52 = vperm.slane %v3495_v46, 0  ;;  %v6497_v46 = vld [vmem:[%s7523_s15 + $0x7c] sm:$0xf] }
 0x530   : > { %3286 = vmatpush.bf16.msra.mxu3 %v3277_v56  ;;  %5767 = vmatmul.msk.bf16.vlgmr.msra.gmra.mxu1 %vm3144_vm7, %v3326_v45  ;;  %v6456_v45 = vld [vmem:[%s6770_s24 + $0x34] sm:$0xf]  ;;  %v5828_v56 = vld [vmem:[%s6770_s24 + $0x38] sm:$0xf0] }
 0x531   : > { %3759 = vmatpush.bf16.msrb.mxu1 %v6473_v34 }
 0x533   : > { %5765 = vmatmul.msk.bf16.vlgmr.msra.gmra.mxu3 %vm3144_vm7, %v3270_v58  ;;  %v5818_v58 = vld [vmem:[%s6770_s24 + $0x20] sm:$0xf] }
 0x534   : > { %3581 = vmatpush.bf16.msrb.mxu3 %v5859_v28 }
 0x535   : > { %3760 = vmatpush.bf16.msrb.mxu1 %v6472_v36  ;;  %v6002_v36 = vld [vmem:[%s7523_s15 + $0x90] sm:$0xf] }
 0x537   : > { %v3175_v59 = vpop.f32.mrf.mxu3 }
 0x538   : > { %3582 = vmatpush.bf16.msrb.mxu3 %v5851_v37  ;;  %v6455_v59 = vld [vmem:[%s6770_s24 + $0x24] sm:$0xf0] }
 0x539   : > { %v6471_v37 = vld [vmem:[%s6780_s6 + $0x28] sm:$0xff] }
 0x53a   : > { %3761 = vmatpush.bf16.msrb.mxu1 %v6471_v37  ;;  %v6500_v37 = vld [vmem:[%s7523_s15 + $0x94] sm:$0xf] }
 0x53c   : > { %3583 = vmatpush.bf16.msrb.mxu3 %v5843_v42  ;;  %v6468_v42 = vld [vmem:[%s6780_s6 + $0x10] sm:$0xff] }
 0x53e   : > { %3762 = vmatpush.bf16.msrb.mxu1 %v6470_v39  ;;  %v6004_v39 = vld [vmem:[%s7523_s15 + $0x9c] sm:$0xf0] }
 0x540   : > { %3584 = vmatpush.bf16.msrb.mxu3 %v5835_v49 }
 0x542   : > { %3763 = vmatpush.bf16.msrb.mxu1 %v6469_v11  ;;  %v6502_v11 = vld [vmem:[%s7523_s15 + $0xa0] sm:$0xf0] }
 0x544   : > { %3585 = vmatpush.bf16.msrb.mxu3 %v5827_v55 }
 0x546   : > { %3764 = vmatpush.bf16.msrb.mxu1 %v6468_v42 }
 0x54a   : > { %3765 = vmatpush.bf16.msrb.mxu1 %v6467_v44  ;;  %v6498_v44 = vld [vmem:[%s7523_s15 + $0x80] sm:$0xf0] }
 0x54e   : > { %3766 = vmatpush.bf16.msrb.mxu1 %v6466_v47 }
 0x591   : > { %v3232_v60 = vpop.f32.mrf.mxu1 }
 0x592   : > { %3349 = vrot.lane.b32.xlu2 %v3232_v60, %s6703_s2  ;;  %v6454_v60 = vld [vmem:[%s6770_s24 + $0x24] sm:$0xf] }
 0x599   : > { %v3234_v62 = vpop.f32.mrf.mxu1 }
 0x59a   : > { %v5819_v62 = vor.u32 %v6455_v59, %v5818_v58 }
 0x59c   : > { %3586 = vmatpush.bf16.msrb.mxu3 %v5819_v62 }
 0x5ad   : > { %v3344_v63 = vpop.f32.mrf.mxu1 }
 0x5ae   : > { %3357 = vrot.lane.b32.xlu0 %v3344_v63, %s6704_s7  ;;  %v5820_v63 = vld [vmem:[%s6770_s24 + $0x28] sm:$0xf0] }
 0x5b5   : > { %v3346_v0 = vpop.f32.mrf.mxu1 }
 0x5b6   : > { %v3288_v1 = vpop.f32.mrf.mxu3  ;;  %v5823_v0 = vor.u32 %v6454_v60, %v5820_v63 }
 0x5b7   : > { %3353 = vrot.lane.b32.xlu2 %v3288_v1, %s6705_s10  ;;  %v5810_v1 = vld [vmem:[%s6770_s24 + $0x10] sm:$0xf] }
 0x5be   : > { %v3290_v2 = vpop.f32.mrf.mxu3 }
 0x5bf   : > { %v6453_v2 = vld [vmem:[%s6770_s24 + $0x14] sm:$0xf0] }
 0x5c0   : > { %v5811_v4 = vor.u32 %v6453_v2, %v5810_v1 }
 0x5c2   : > { %3587 = vmatpush.bf16.msrb.mxu3 %v5811_v4 }
 0x5ec   : > { %v3350_v13 = vpop.permute.xlu2 %3349 }
 0x5ed   : > { %v3360_v15 = vsel %vm3124_vm4, %v3173_v57, %v3350_v13  ;;  %v5831_v57 = vor.u32 %v6456_v45, %v5828_v56  ;;  %v5803_v13 = vor.u32 %v6451_v7, %v5802_v6 }
 0x5ef   : > { %3598 = vmatpush.bf16.msrb.mxu0 %v5831_v57  ;;  %3588 = vmatpush.bf16.msrb.mxu3 %v5803_v13 }
 0x5f3   : > { %3599 = vmatpush.bf16.msrb.mxu0 %v5823_v0 }
 0x5f7   : > { %3600 = vmatpush.bf16.msrb.mxu0 %v5815_v9 }
 0x611   : > { %v3354_v14 = vpop.permute.xlu2 %3353 }
 0x612   : > { %v3362_v16 = vsel %vm3361_vm8, %v3360_v15, %v3354_v14  ;;  %v5807_v14 = vor.u32 %v6450_v10, %v5804_v12  ;;  %v6481_v15 = vld [vmem:[%s6780_s6 + $0x78] sm:$0xff] }
 0x613   : > { %3772 = vmatpush.bf16.msrb.mxu2 %v6481_v15  ;;  %v6604_v15 = vld [vmem:[%s7522_s11] ss:$0 sm:$0xff]  ;;  %s7532_s11 = sld [smem:[#allocation10_spill]] }
 0x614   : > { %3601 = vmatpush.bf16.msrb.mxu0 %v5807_v14 }
 0x620   : > { %v3358_v17 = vpop.permute.xlu0 %3357 }
 0x621   : > { %v3364_v18 = vsel %vm3363_vm9, %v3362_v16, %v3358_v17 }
 0x622   : > { %v3365_v19 = vpack.c.bf16 %v3364_v18, %v3364_v18  ;;  %v6480_v18 = vld [vmem:[%s6780_s6 + $0x70] sm:$0xff] }
 0x623   : > { %3773 = vmatpush.bf16.msrb.mxu2 %v6480_v18 }
 0x624   : > { %3442 = vmatmul.bf16.vlgmr.msra.gmra.mxu2 %v3365_v19 }
 0x627   : > { %3774 = vmatpush.bf16.msrb.mxu2 %v6479_v35 }
 0x6a7   : > { %v3443_v21 = vpop.f32.mrf.mxu2 }
 0x6a8   : > { %v3444_v22 = vadd.f32 %v6601_v20, %v3443_v21 }
 0x6aa   : > { %v7235_v23 = vadd.f32 %v3444_v22, %v7110_v54 }
 0x6ac   : > { %3450 = vadd.xlane.f32.xlu1 %v7235_v23 }
 0x6af   : > { %v3445_v24 = vpop.f32.mrf.mxu2 }
 0x71f   : > { %v3451_v54 = vpop.xlane.xlu1 %3450 }
 0x720   : > { %v3452_v31 = vmul.f32 %v3451_v54, %v7119_v8 }
 0x722   : > { %v7244_v32 = vsub.f32 %v7235_v23, %v3452_v31 }
 0x724   : > { %v3454_v33 = vmul.f32 %v7244_v32, %v7244_v32 }
 0x726   : > { %3455 = vadd.xlane.f32.xlu2 %v3454_v33 }
 0x799   : > { %v3456_v16 = vpop.xlane.xlu2 %3455 }
 0x79a   : > { %v3457_v17 = vmul.f32 %v3456_v16, %v7119_v8 }
 0x79c   : > { %v3458_v19 = vadd.f32 1e-06, %v3457_v17 }
 0x79e   : > { %6631 = vrsqrt.f32 %v3458_v19  ;;  %vm3465_vm11 = vweird.f32 %v3458_v19 }
 0x7a4   : > { %v6632_v20 = vpop.eup %6631 }
 0x7a5   : > { %v3460_v21 = vmul.f32 %v6632_v20, %v3458_v19  ;;  %vm3466_vm10 = vweird.f32 %v6632_v20 }
 0x7a6   : > { %vm3467_vm12 = vmor %vm3465_vm11, %vm3466_vm10 }
 0x7a7   : > { %v3461_v22 = vmul.f32 %v6632_v20, %v3460_v21 }
 0x7a9   : > { %v3462_v24 = vmul.f32 0.5, %v3461_v22 }
 0x7ab   : > { %v3463_v25 = vsub.f32 1.5, %v3462_v24  ;;  %v6014_v24 = vld [vmem:[%s7523_s15 + $0xa8] sm:$0xf] }
 0x7ad   : > { %v3464_v26 = vmul.f32 %v6632_v20, %v3463_v25  ;;  %v6504_v25 = vld [vmem:[%s7523_s15 + $0xb0] sm:$0xf0] }
 0x7af   : > { %v3468_v28 = vsel %vm3467_vm12, %v6632_v20, %v3464_v26  ;;  %v6503_v26 = vld [vmem:[%s7523_s15 + $0xac] sm:$0xf] }
 0x7b0   : > { %v3469_v29 = vmul.f32 %v3468_v28, %v7244_v32  ;;  %v6478_v32 = vld [vmem:[%s6780_s6 + $0x60] sm:$0xff]  ;;  %v6016_v28 = vld [vmem:[%s7523_s15 + $0xb4] sm:$0xf0] }
 0x7b1   : > { %3775 = vmatpush.bf16.msrb.mxu2 %v6478_v32  ;;  %v6501_v32 = vld [vmem:[%s7523_s15 + $0x98] sm:$0xf0] }
 0x7b2   : > { %v3473_v54 = vmul.f32 %v6602_v27, %v3469_v29  ;;  %v6015_v27 = vor.u32 %v6504_v25, %v6014_v24  ;;  %v6022_v29 = vld [vmem:[%s7523_s15 + $0xb0] sm:$0xf]  ;;  %v5944_v25 = vld [vmem:[%s7523_s15 + $0x24] sm:$0xf0] }
 0x7b4   : > { %v3477_v31 = vadd.f32 %v6603_v30, %v3473_v54  ;;  %v6505_v30 = vld [vmem:[%s7523_s15 + $0xb8] sm:$0xf0]  ;;  %v6019_v54 = vor.u32 %v6503_v26, %v6016_v28  ;;  %3985 = vmatpush.bf16.msra.mxu3 %v6015_v27  ;;  %v5950_v26 = vld [vmem:[%s7523_s15 + $0x20] sm:$0xf]  ;;  %v6487_v27 = vld [vmem:[%s7523_s15 + $0x28] sm:$0xf0] }
 0x7b5   : > { %3776 = vmatpush.bf16.msrb.mxu2 %v6477_v38  ;;  %v6003_v38 = vor.u32 %v6501_v32, %v6002_v36  ;;  %v6484_v36 = vld [vmem:[%s7523_s15 + $0x10] sm:$0xf0] }
 0x7b6   : > { %v3478_v33 = vpack.c.bf16 %v3477_v31, %v3477_v31  ;;  %3998 = vmatpush.bf16.msra.mxu0 %v6019_v54  ;;  %v6483_v54 = vld [vmem:[%s7523_s15 + $0x8] sm:$0xf0] }
 0x7b8   : > { %3589 = vmatmul.bf16.vlgmr.msrb.gmra.mxu3 %v3478_v33  ;;  %3602 = vmatmul.bf16.vlgmr.msrb.gmra.mxu0 %v3478_v33 }
 0x7b9   : > { %3777 = vmatpush.bf16.msrb.mxu2 %v6476_v40  ;;  %v6010_v40 = vld [vmem:[%s7523_s15 + $0x98] sm:$0xf]  ;;  %3986 = vmatpush.bf16.msra.mxu3 %v6003_v38 }
 0x7ba   : > { %v6011_v42 = vor.u32 %v6502_v11, %v6010_v40 }
 0x7bd   : > { %3778 = vmatpush.bf16.msrb.mxu2 %v6475_v41  ;;  %v6007_v41 = vor.u32 %v6500_v37, %v6004_v39 }
 0x7bf   : > { %3999 = vmatpush.bf16.msra.mxu0 %v6007_v41 }
 0x7c1   : > { %3779 = vmatpush.bf16.msrb.mxu2 %v6474_v43  ;;  %v5990_v43 = vld [vmem:[%s7523_s15 + $0x78] sm:$0xf] }
 0x7c2   : > { %v5991_v47 = vor.u32 %v6498_v44, %v5990_v43 }
 0x7c4   : > { %3987 = vmatpush.bf16.msra.mxu3 %v5991_v47  ;;  %v6605_v47 = vld [vmem:[%s7524_s16] ss:$0 sm:$0xff]  ;;  %s7533_s16 = sld [smem:[#allocation12_spill]] }
 0x835   : > { %v3603_v49 = vpop.f32.mrf.mxu0 }
 0x836   : > { %v3604_v50 = vadd.f32 %v3603_v49, %v3498_v48  ;;  %v5992_v48 = vld [vmem:[%s7523_s15 + $0x84] sm:$0xf0]  ;;  %v5998_v49 = vld [vmem:[%s7523_s15 + $0x80] sm:$0xf] }
 0x838   : > { %v3610_v51 = vmul.f32 %v3604_v50, %v3604_v50  ;;  %v3608_v4 = vmul.f32 0.5, %v3604_v50 }
 0x83a   : > { %v3612_v53 = vmul.f32 %v3610_v51, %v3604_v50  ;;  %v5995_v51 = vor.u32 %v6497_v46, %v5992_v48 }
 0x83b   : > { %v3590_v45 = vpop.f32.mrf.mxu3 }
 0x83c   : > { %v3614_v55 = vmul.f32 0.044715, %v3612_v53  ;;  %v3591_v56 = vadd.f32 %v3590_v45, %v3497_v52  ;;  %4000 = vmatpush.bf16.msra.mxu0 %v5995_v51  ;;  %v5978_v53 = vld [vmem:[%s7523_s15 + $0x60] sm:$0xf]  ;;  %v6495_v45 = vld [vmem:[%s7523_s15 + $0x68] sm:$0xf0] }
 0x83d   : > { %v3605_v57 = vpop.f32.mrf.mxu0 }
 0x83e   : > { %v3616_v58 = vadd.f32 %v3614_v55, %v3604_v50  ;;  %v3609_v59 = vmul.f32 %v3591_v56, %v3591_v56  ;;  %v3607_v10 = vmul.f32 0.5, %v3591_v56  ;;  %v6499_v50 = vld [vmem:[%s7523_s15 + $0x88] sm:$0xf0]  ;;  %v6494_v55 = vld [vmem:[%s7523_s15 + $0x64] sm:$0xf] }
 0x83f   : > { %v5999_v52 = vor.u32 %v6499_v50, %v5998_v49  ;;  %v5980_v57 = vld [vmem:[%s7523_s15 + $0x6c] sm:$0xf0]  ;;  %v6606_v50 = vld [vmem:[%s7525_s18] ss:$0 sm:$0xff]  ;;  %s7534_s18 = sld [smem:[#allocation14_spill]] }
 0x840   : > { %v3618_v60 = vmul.f32 0.7978846, %v3616_v58  ;;  %v3611_v62 = vmul.f32 %v3609_v59, %v3591_v56  ;;  %v5986_v58 = vld [vmem:[%s7523_s15 + $0x68] sm:$0xf]  ;;  %v6496_v59 = vld [vmem:[%s7523_s15 + $0x70] sm:$0xf0] }
 0x842   : > { %6633 = vtanh.f32 %v3618_v60  ;;  %v3613_v63 = vmul.f32 0.044715, %v3611_v62  ;;  %v5983_v60 = vor.u32 %v6494_v55, %v5980_v57  ;;  %v5987_v62 = vor.u32 %v6496_v59, %v5986_v58 }
 0x843   : > { %v3592_v0 = vpop.f32.mrf.mxu3 }
 0x844   : > { %v3615_v1 = vadd.f32 %v3613_v63, %v3591_v56  ;;  %v5979_v56 = vor.u32 %v6495_v45, %v5978_v53  ;;  %4001 = vmatpush.bf16.msra.mxu0 %v5983_v60  ;;  %v5966_v63 = vld [vmem:[%s7523_s15 + $0x48] sm:$0xf]  ;;  %v6492_v0 = vld [vmem:[%s7523_s15 + $0x50] sm:$0xf0]  ;;  %v3849_v45 = vld [vmem:[%s7526_s0] sm:$0x7] }
 0x845   : > { %v3852_v55 = vperm.slane %v3849_v45, 1  ;;  %s7535_s0 = sld [smem:[#allocation15_spill]] }
 0x846   : > { %v3617_v2 = vmul.f32 0.7978846, %v3615_v1  ;;  %3988 = vmatpush.bf16.msra.mxu3 %v5979_v56  ;;  %v6491_v1 = vld [vmem:[%s7523_s15 + $0x4c] sm:$0xf]  ;;  %v3853_v56 = vperm.slane %v3849_v45, 2 }
 0x848   : > { %v6634_v3 = vpop.eup %6633  ;;  %6635 = vtanh.f32 %v3617_v2  ;;  %v5967_v2 = vor.u32 %v6492_v0, %v5966_v63  ;;  %v3851_v63 = vperm.slane %v3849_v45, 0 }
 0x849   : > { %v3622_v5 = vadd.f32 1.0, %v6634_v3  ;;  %v5968_v3 = vld [vmem:[%s7523_s15 + $0x54] sm:$0xf0] }
 0x84a   : > { %3989 = vmatpush.bf16.msra.mxu3 %v5967_v2 }
 0x84b   : > { %v3624_v6 = vmul.f32 %v3622_v5, %v3608_v4  ;;  %v5974_v4 = vld [vmem:[%s7523_s15 + $0x50] sm:$0xf]  ;;  %v6493_v5 = vld [vmem:[%s7523_s15 + $0x58] sm:$0xf0] }
 0x84d   : > { %v3626_v7 = vpack.c.bf16 %v3624_v6, %v3624_v6  ;;  %v5971_v6 = vor.u32 %v6491_v1, %v5968_v3 }
 0x84e   : > { %v6636_v9 = vpop.eup %6635 }
 0x84f   : > { %3780 = vmatmul.bf16.vlgmr.msrb.gmra.mxu2 %v3626_v7  ;;  %v3621_v12 = vadd.f32 1.0, %v6636_v9  ;;  %v5975_v7 = vor.u32 %v6493_v5, %v5974_v4  ;;  %4002 = vmatpush.bf16.msra.mxu0 %v5971_v6  ;;  %v5954_v9 = vld [vmem:[%s7523_s15 + $0x30] sm:$0xf] }
 0x851   : > { %v3623_v13 = vmul.f32 %v3621_v12, %v3607_v10  ;;  %v6489_v10 = vld [vmem:[%s7523_s15 + $0x38] sm:$0xf0]  ;;  %v6488_v12 = vld [vmem:[%s7523_s15 + $0x34] sm:$0xf] }
 0x853   : > { %v3625_v14 = vpack.c.bf16 %v3623_v13, %v3623_v13  ;;  %v5955_v13 = vor.u32 %v6489_v10, %v5954_v9 }
 0x855   : > { %3767 = vmatmul.bf16.vlgmr.msrb.gmra.mxu1 %v3625_v14  ;;  %v5956_v14 = vld [vmem:[%s7523_s15 + $0x3c] sm:$0xf0]  ;;  %3990 = vmatpush.bf16.msra.mxu3 %v5955_v13 }
 0x8d2   : > { %v3768_v16 = vpop.f32.mrf.mxu1  ;;  %v3781_v17 = vpop.f32.mrf.mxu2 }
 0x8d3   : > { %v3769_v18 = vadd.f32 %v6604_v15, %v3768_v16  ;;  %v5962_v15 = vld [vmem:[%s7523_s15 + $0x38] sm:$0xf]  ;;  %v6490_v16 = vld [vmem:[%s7523_s15 + $0x40] sm:$0xf0] }
 0x8d5   : > { %v3782_v19 = vadd.f32 %v3781_v17, %v3769_v18  ;;  %v5959_v17 = vor.u32 %v6488_v12, %v5956_v14  ;;  %v5963_v18 = vor.u32 %v6490_v16, %v5962_v15 }
 0x8d7   : > { %v7299_v20 = vadd.f32 %v3782_v19, %v7235_v23  ;;  %v6023_v23 = vor.u32 %v6505_v30, %v6022_v29  ;;  %4003 = vmatpush.bf16.msra.mxu0 %v5959_v17  ;;  %v5942_v19 = vld [vmem:[%s7523_s15 + $0x18] sm:$0xf]  ;;  %v5951_v29 = vor.u32 %v6487_v27, %v5950_v26  ;;  %v5930_v30 = vld [vmem:[%s7523_s15] sm:$0xf] }
 0x8d9   : > { %3788 = vadd.xlane.f32.xlu0 %v7299_v20  ;;  %4011 = vmatpush.bf16.msra.mxu1 %v6023_v23  ;;  %v6482_v23 = vld [vmem:[%s7523_s15 + $0x4] sm:$0xf] }
 0x8da   : > { %v3770_v21 = vpop.f32.mrf.mxu1  ;;  %v3783_v22 = vpop.f32.mrf.mxu2 }
 0x8db   : > { %v6486_v21 = vld [vmem:[%s7523_s15 + $0x20] sm:$0xf0]  ;;  %v6485_v22 = vld [vmem:[%s7523_s15 + $0x1c] sm:$0xf] }
 0x8dc   : > { %v5943_v24 = vor.u32 %v6486_v21, %v5942_v19  ;;  %v5947_v28 = vor.u32 %v6485_v22, %v5944_v25 }
 0x8dd   : > { %4012 = vmatpush.bf16.msra.mxu1 %v6011_v42 }
 0x8de   : > { %3991 = vmatpush.bf16.msra.mxu3 %v5943_v24  ;;  %4004 = vmatpush.bf16.msra.mxu0 %v5947_v28 }
 0x8e1   : > { %4013 = vmatpush.bf16.msra.mxu1 %v5999_v52 }
 0x8e5   : > { %4014 = vmatpush.bf16.msra.mxu1 %v5987_v62 }
 0x8e9   : > { %4015 = vmatpush.bf16.msra.mxu1 %v5975_v7 }
 0x8ed   : > { %4016 = vmatpush.bf16.msra.mxu1 %v5963_v18 }
 0x8f1   : > { %4017 = vmatpush.bf16.msra.mxu1 %v5951_v29 }
 0x94c   : > { %v3789_v31 = vpop.xlane.xlu0 %3788 }
 0x94d   : > { %v3790_v33 = vmul.f32 %v3789_v31, %v7119_v8  ;;  %v5931_v31 = vor.u32 %v6483_v54, %v5930_v30 }
 0x94f   : > { %v7310_v34 = vsub.f32 %v7299_v20, %v3790_v33  ;;  %v5932_v33 = vld [vmem:[%s7523_s15 + $0xc] sm:$0xf0]  ;;  %3992 = vmatpush.bf16.msra.mxu3 %v5931_v31 }
 0x950   : > { %v5935_v32 = vor.u32 %v6482_v23, %v5932_v33 }
 0x951   : > { %v3792_v35 = vmul.f32 %v7310_v34, %v7310_v34 }
 0x952   : > { %4005 = vmatpush.bf16.msra.mxu0 %v5935_v32 }
 0x953   : > { %3793 = vadd.xlane.f32.xlu1 %v3792_v35  ;;  %v5938_v35 = vld [vmem:[%s7523_s15 + $0x8] sm:$0xf] }
 0x954   : > { %v5939_v37 = vor.u32 %v6484_v36, %v5938_v35 }
 0x956   : > { %4018 = vmatpush.bf16.msra.mxu1 %v5939_v37 }
 0x9c6   : > { %v3794_v38 = vpop.xlane.xlu1 %3793 }
 0x9c7   : > { %v3795_v39 = vmul.f32 %v3794_v38, %v7119_v8 }
 0x9c9   : > { %v3796_v40 = vadd.f32 1e-06, %v3795_v39 }
 0x9cb   : > { %6637 = vrsqrt.f32 %v3796_v40  ;;  %vm3803_vm14 = vweird.f32 %v3796_v40 }
 0x9d1   : > { %v6638_v11 = vpop.eup %6637 }
 0x9d2   : > { %v3798_v41 = vmul.f32 %v6638_v11, %v3796_v40  ;;  %vm3804_vm13 = vweird.f32 %v6638_v11 }
 0x9d3   : > { %vm3805_vm15 = vmor %vm3803_vm14, %vm3804_vm13 }
 0x9d4   : > { %v3799_v42 = vmul.f32 %v6638_v11, %v3798_v41 }
 0x9d6   : > { %v3800_v43 = vmul.f32 0.5, %v3799_v42 }
 0x9d8   : > { %v3801_v44 = vsub.f32 1.5, %v3800_v43 }
 0x9da   : > { %v3802_v46 = vmul.f32 %v6638_v11, %v3801_v44 }
 0x9dc   : > { %v3806_v48 = vsel %vm3805_vm15, %v6638_v11, %v3802_v46 }
 0x9dd   : > { %v3807_v49 = vmul.f32 %v3806_v48, %v7310_v34 }
 0x9df   : > { %v3811_v51 = vmul.f32 %v6605_v47, %v3807_v49 }
 0x9e1   : > { %v3815_v52 = vadd.f32 %v6606_v50, %v3811_v51 }
 0x9e3   : > { %v3816_v53 = vpack.c.bf16 %v3815_v52, %v3815_v52 }
 0x9e5   : > { %3993 = vmatmul.bf16.vlgmr.msra.gmra.mxu3 %v3816_v53  ;;  %4006 = vmatmul.bf16.vlgmr.msra.gmra.mxu0 %v3816_v53 }
 0x9e6   : > { %4019 = vmatmul.bf16.vlgmr.msra.gmra.mxu1 %v3816_v53 }
 0xa62   : > { %v4007_v57 = vpop.f32.mrf.mxu0 }
 0xa63   : > { %v4008_v58 = vadd.f32 %v4007_v57, %v3852_v55  ;;  %v4020_v59 = vpop.f32.mrf.mxu1 }
 0xa64   : > { %v4021_v60 = vadd.f32 %v4020_v59, %v3853_v56 }
 0xa65   : > { %v4025_v62 = vpack.c.bf16 %v4008_v58, %v4008_v58 }
 0xa66   : > { %v7361_v0 = vpack.c.bf16 %v4021_v60, %v4021_v60 }
 0xa67   : > { %4138 = vrot.lane.b32.xlu0 %v4025_v62, %s6705_s10  ;;  %4081 = vrot.lane.b32.xlu2 %v4025_v62, %s6704_s7  ;;  %v4031_v34 = vsel %vm3124_vm4, %v4025_v62, 0 }
 0xa68   : > { %v3994_v1 = vpop.f32.mrf.mxu3  ;;  %4040 = vmatpush.bf16.xpose.msra.mxu2 %v4031_v34  ;;  %v4062_v2 = vsel %vm3160_vm5, %v7361_v0, 0 }
 0xa69   : > { %v3995_v3 = vadd.f32 %v3994_v1, %v3851_v63  ;;  %4071 = vmatpush.bf16.msrb.mxu3 %v4062_v2 }
 0xa6a   : > { %v4009_v4 = vpop.f32.mrf.mxu0 }
 0xa6b   : > { %v4024_v5 = vpack.c.bf16 %v3995_v3, %v3995_v3  ;;  %v4022_v6 = vpop.f32.mrf.mxu1 }
 0xa6d   : > { %4078 = vrot.lane.b32.xlu1 %v4024_v5, %s6704_s7 }
 0xa6f   : > { %4194 = vrot.lane.b32.xlu2 %v4025_v62, %s6703_s2  ;;  %4136 = vrot.lane.b32.xlu0 %v4024_v5, %s6705_s10 }
 0xa70   : > { %6024 = vmatmul.msk.bf16.vlgmr.msra.gmra.mxu2 %vm3124_vm4, %v4024_v5  ;;  %v3996_v7 = vpop.f32.mrf.mxu3 }
 0xa75   : > { %4192 = vrot.lane.b32.xlu1 %v4024_v5, %s6703_s2 }
 0xac1   : > { %v4082_v9 = vpop.permute.xlu2 %4081 }
 0xac2   : > { %v4087_v10 = vsel %vm3124_vm4, %v4082_v9, 0 }
 0xac3   : > { %4096 = vmatpush.bf16.xpose.msrb.mxu0 %v4087_v10 }
 0xac9   : > { %v4195_v12 = vpop.permute.xlu2 %4194 }
 0xaca   : > { %v4200_v13 = vsel %vm3124_vm4, %v4195_v12, 0 }
 0xacb   : > { %4209 = vmatpush.bf16.xpose.msra.mxu0 %v4200_v13 }
 0xad9   : > { %v4139_v14 = vpop.permute.xlu0 %4138 }
 0xada   : > { %v4144_v15 = vsel %vm3124_vm4, %v4139_v14, 0 }
 0xadb   : > { %4153 = vmatpush.bf16.xpose.msrb.mxu2 %v4144_v15 }
 0xadf   : > { %v4079_v16 = vpop.permute.xlu1 %4078 }
 0xae0   : > { %6026 = vmatmul.msk.bf16.vlgmr.msrb.gmra.mxu0 %vm3124_vm4, %v4079_v16 }
 0xae1   : > { %v4137_v17 = vpop.permute.xlu0 %4136 }
 0xae2   : > { %6028 = vmatmul.msk.bf16.vlgmr.msrb.gmra.mxu2 %vm3124_vm4, %v4137_v17 }
 0xae7   : > { %v4193_v18 = vpop.permute.xlu1 %4192 }
 0xaf0   : > { %6030 = vmatmul.msk.bf16.vlgmr.msra.gmra.mxu0 %vm3124_vm4, %v4193_v18 }
 0xaf3   : > { %v4042_v19 = vpop.f32.mrf.mxu2 }
 0xaf4   : > { %v4043_v21 = vadd.f32 %v4042_v19, %v7191_v61  ;;  %v6513_v19 = vld [vmem:[%s7527_s26 + $0x38] sm:$0xff] }
 0xaf5   : > { %4332 = vmatpush.bf16.msra.mxu2 %v6513_v19 }
 0xaf6   : > { %v4046_v22 = vsel %vm3144_vm7, %v4043_v21, -inf }
 0xaf7   : > { %4047 = vmax.xlane.f32.xlu0 %v4046_v22 }
 0xafb   : > { %v4044_v24 = vpop.f32.mrf.mxu2 }
 0xafc   : > { %v6511_v24 = vld [vmem:[%s7527_s26 + $0x28] sm:$0xff] }
 0xb5d   : > { %v4098_v25 = vpop.f32.mrf.mxu0 }
 0xb5e   : > { %v4099_v26 = vadd.f32 %v4098_v25, %v7191_v61 }
 0xb60   : > { %v4102_v27 = vsel %vm3144_vm7, %v4099_v26, -inf }
 0xb61   : > { %4103 = vmax.xlane.f32.xlu2 %v4102_v27 }
 0xb65   : > { %v4100_v28 = vpop.f32.mrf.mxu0  ;;  %v4155_v29 = vpop.f32.mrf.mxu2 }
 0xb66   : > { %v4156_v30 = vadd.f32 %v4155_v29, %v7191_v61  ;;  %v6510_v28 = vld [vmem:[%s7527_s26 + $0x20] sm:$0xff]  ;;  %v6509_v29 = vld [vmem:[%s7527_s26 + $0x18] sm:$0xff] }
 0xb68   : > { %v4159_v54 = vsel %vm3144_vm7, %v4156_v30, -inf }
 0xb69   : > { %4160 = vmax.xlane.f32.xlu1 %v4159_v54  ;;  %v6507_v54 = vld [vmem:[%s7527_s26 + $0x8] sm:$0xff] }
 0xb6a   : > { %v4048_v23 = vpop.xlane.xlu0 %4047 }
 0xb6b   : > { %v4049_v31 = vsub.f32 %v4043_v21, %v4048_v23  ;;  %v6512_v21 = vld [vmem:[%s7527_s26 + $0x30] sm:$0xff]  ;;  %v6506_v23 = vld [vmem:[%s7527_s26] sm:$0xff] }
 0xb6c   : > { %4333 = vmatpush.bf16.msra.mxu2 %v6512_v21 }
 0xb6d   : > { %v4050_v33 = vmul.f32 1.442695, %v4049_v31  ;;  %v4157_v35 = vpop.f32.mrf.mxu2  ;;  %v4211_v36 = vpop.f32.mrf.mxu0 }
 0xb6e   : > { %v4212_v32 = vadd.f32 %v4211_v36, %v7191_v61 }
 0xb6f   : > { %6639 = vpow2.f32 %v4050_v33 }
 0xb70   : > { %v4215_v37 = vsel %vm3144_vm7, %v4212_v32, -inf  ;;  %4334 = vmatpush.bf16.msra.mxu2 %v6511_v24 }
 0xb71   : > { %4216 = vmax.xlane.f32.xlu0 %v4215_v37 }
 0xb74   : > { %4335 = vmatpush.bf16.msra.mxu2 %v6510_v28 }
 0xb75   : > { %v6640_v38 = vpop.eup %6639  ;;  %v4213_v39 = vpop.f32.mrf.mxu0 }
 0xb76   : > { %v4052_v40 = vsel %vm3144_vm7, %v6640_v38, 0.0  ;;  %v6607_v39 = vld [vmem:[%s7528_s1] ss:$0 sm:$0xff]  ;;  %s973_s1 = scalar_lea.vmem %s6870_s20, %s4894_s28 }
 0xb77   : > { %4053 = vadd.xlane.f32.xlu2 %v4052_v40 }
 0xb78   : > { %4336 = vmatpush.bf16.msra.mxu2 %v6509_v29 }
 0xb85   : > { %4115 = vrot.lane.b32.xlu0 %v7361_v0, %s6704_s7 }
 0xbd4   : > { %v4104_v11 = vpop.xlane.xlu2 %4103 }
 0xbd5   : > { %v4105_v41 = vsub.f32 %v4099_v26, %v4104_v11 }
 0xbd7   : > { %v4106_v42 = vmul.f32 1.442695, %v4105_v41 }
 0xbd9   : > { %6641 = vpow2.f32 %v4106_v42 }
 0xbdc   : > { %v4161_v43 = vpop.xlane.xlu1 %4160 }
 0xbdd   : > { %v4162_v44 = vsub.f32 %v4156_v30, %v4161_v43  ;;  %v6508_v30 = vld [vmem:[%s7527_s26 + $0x10] sm:$0xff] }
 0xbde   : > { %4337 = vmatpush.bf16.msra.mxu2 %v6508_v30 }
 0xbdf   : > { %v6642_v46 = vpop.eup %6641  ;;  %v4163_v61 = vmul.f32 1.442695, %v4162_v44 }
 0xbe0   : > { %v4108_v47 = vsel %vm3144_vm7, %v6642_v46, 0.0 }
 0xbe1   : > { %6643 = vpow2.f32 %v4163_v61  ;;  %4109 = vadd.xlane.f32.xlu1 %v4108_v47 }
 0xbe2   : > { %4338 = vmatpush.bf16.msra.mxu2 %v6507_v54 }
 0xbe4   : > { %v4217_v48 = vpop.xlane.xlu0 %4216 }
 0xbe5   : > { %v4218_v49 = vsub.f32 %v4212_v32, %v4217_v48 }
 0xbe6   : > { %4339 = vmatpush.bf16.msra.mxu2 %v6506_v23 }
 0xbe7   : > { %v6644_v50 = vpop.eup %6643  ;;  %v4219_v51 = vmul.f32 1.442695, %v4218_v49 }
 0xbe8   : > { %v4165_v52 = vsel %vm3144_vm7, %v6644_v50, 0.0 }
 0xbe9   : > { %6645 = vpow2.f32 %v4219_v51  ;;  %4166 = vadd.xlane.f32.xlu2 %v4165_v52 }
 0xbea   : > { %v4054_v53 = vpop.xlane.xlu2 %4053 }
 0xbeb   : > { %6647 = vrcp.f32 %v4054_v53 }
 0xbef   : > { %v6646_v45 = vpop.eup %6645 }
 0xbf0   : > { %v4221_v55 = vsel %vm3144_vm7, %v6646_v45, 0.0 }
 0xbf1   : > { %v6648_v56 = vpop.eup %6647  ;;  %4222 = vadd.xlane.f32.xlu1 %v4221_v55 }
 0xbf2   : > { %v4056_v57 = vmul.f32 %v6648_v56, %v6640_v38 }
 0xbf4   : > { %v4057_v58 = vpack.c.bf16 %v4056_v57, %v4056_v57 }
 0xbf6   : > { %6025 = vmatmul.msk.bf16.vlgmr.msrb.gmra.mxu3 %vm3144_vm7, %v4057_v58 }
 0xbf7   : > { %v4116_v59 = vpop.permute.xlu0 %4115 }
 0xbf8   : > { %v4121_v60 = vsel %vm3160_vm5, %v4116_v59, 0 }
 0xbf9   : > { %4130 = vmatpush.bf16.msrb.mxu1 %v4121_v60 }
 0xc01   : > { %4171 = vrot.lane.b32.xlu2 %v7361_v0, %s6705_s10 }
 0xc0a   : > { %4227 = vrot.lane.b32.xlu1 %v7361_v0, %s6703_s2 }
 0xc54   : > { %v4110_v62 = vpop.xlane.xlu1 %4109 }
 0xc55   : > { %6649 = vrcp.f32 %v4110_v62 }
 0xc5b   : > { %v6650_v63 = vpop.eup %6649 }
 0xc5c   : > { %v4112_v34 = vmul.f32 %v6650_v63, %v6642_v46  ;;  %v4167_v1 = vpop.xlane.xlu2 %4166 }
 0xc5d   : > { %6651 = vrcp.f32 %v4167_v1 }
 0xc5e   : > { %v4113_v2 = vpack.c.bf16 %v4112_v34, %v4112_v34 }
 0xc60   : > { %6027 = vmatmul.msk.bf16.vlgmr.msrb.gmra.mxu1 %vm3144_vm7, %v4113_v2 }
 0xc63   : > { %v6652_v3 = vpop.eup %6651 }
 0xc64   : > { %v4169_v4 = vmul.f32 %v6652_v3, %v6644_v50  ;;  %v4172_v5 = vpop.permute.xlu2 %4171  ;;  %v4223_v0 = vpop.xlane.xlu1 %4222 }
 0xc65   : > { %v4177_v6 = vsel %vm3160_vm5, %v4172_v5, 0  ;;  %6653 = vrcp.f32 %v4223_v0 }
 0xc66   : > { %v4170_v7 = vpack.c.bf16 %v4169_v4, %v4169_v4  ;;  %4186 = vmatpush.bf16.msra.mxu3 %v4177_v6 }
 0xc69   : > { %6029 = vmatmul.msk.bf16.vlgmr.msra.gmra.mxu3 %vm3144_vm7, %v4170_v7 }
 0xc6b   : > { %v6654_v9 = vpop.eup %6653 }
 0xc6c   : > { %v4225_v12 = vmul.f32 %v6654_v9, %v6646_v45 }
 0xc6e   : > { %v4226_v15 = vpack.c.bf16 %v4225_v12, %v4225_v12 }
 0xc79   : > { %v4073_v10 = vpop.f32.mrf.mxu3 }
 0xc7c   : > { %v4228_v13 = vpop.permute.xlu1 %4227 }
 0xc7d   : > { %v4233_v14 = vsel %vm3160_vm5, %v4228_v13, 0 }
 0xc7e   : > { %4242 = vmatpush.bf16.msra.mxu1 %v4233_v14 }
 0xc81   : > { %v4075_v16 = vpop.f32.mrf.mxu3  ;;  %6031 = vmatmul.msk.bf16.vlgmr.msra.gmra.mxu1 %vm3144_vm7, %v4226_v15 }
 0xcdd   : > { %v4132_v17 = vpop.f32.mrf.mxu1 }
 0xcde   : > { %4249 = vrot.lane.b32.xlu0 %v4132_v17, %s6703_s2  ;;  %s7529_s2 = sld [smem:[#allocation11_spill]] }
 0xce4   : > { %v6122_v43 = vld [vmem:[%s7529_s2 + $0x70] sm:$0xf]  ;;  %v6529_v44 = vld [vmem:[%s7529_s2 + $0x74] sm:$0xf0]  ;;  %v6528_v46 = vld [vmem:[%s7529_s2 + $0x74] sm:$0xf] }
 0xce5   : > { %v4134_v18 = vpop.f32.mrf.mxu1  ;;  %v6123_v61 = vor.u32 %v6529_v44, %v6122_v43  ;;  %v6124_v47 = vld [vmem:[%s7529_s2 + $0x78] sm:$0xf0]  ;;  %v6114_v52 = vld [vmem:[%s7529_s2 + $0x60] sm:$0xf]  ;;  %v6527_v53 = vld [vmem:[%s7529_s2 + $0x64] sm:$0xf0] }
 0xce6   : > { %v6127_v48 = vor.u32 %v6528_v46, %v6124_v47  ;;  %v6526_v45 = vld [vmem:[%s7529_s2 + $0x64] sm:$0xf]  ;;  %v6115_v55 = vor.u32 %v6527_v53, %v6114_v52  ;;  %v6116_v56 = vld [vmem:[%s7529_s2 + $0x68] sm:$0xf0]  ;;  %v6106_v58 = vld [vmem:[%s7529_s2 + $0x50] sm:$0xf] }
 0xce7   : > { %4479 = vmatpush.bf16.msrb.mxu3 %v6123_v61  ;;  %v6119_v57 = vor.u32 %v6526_v45, %v6116_v56  ;;  %v6525_v59 = vld [vmem:[%s7529_s2 + $0x54] sm:$0xf0]  ;;  %v6524_v60 = vld [vmem:[%s7529_s2 + $0x54] sm:$0xf]  ;;  %v6108_v63 = vld [vmem:[%s7529_s2 + $0x58] sm:$0xf0] }
 0xce8   : > { %4492 = vmatpush.bf16.msrb.mxu0 %v6127_v48  ;;  %v6107_v62 = vor.u32 %v6525_v59, %v6106_v58  ;;  %v6111_v34 = vor.u32 %v6524_v60, %v6108_v63  ;;  %v6098_v1 = vld [vmem:[%s7529_s2 + $0x40] sm:$0xf]  ;;  %v6523_v2 = vld [vmem:[%s7529_s2 + $0x44] sm:$0xf0]  ;;  %v6522_v3 = vld [vmem:[%s7529_s2 + $0x44] sm:$0xf] }
 0xce9   : > { %v6099_v4 = vor.u32 %v6523_v2, %v6098_v1  ;;  %v6100_v5 = vld [vmem:[%s7529_s2 + $0x48] sm:$0xf0]  ;;  %v6090_v7 = vld [vmem:[%s7529_s2 + $0x30] sm:$0xf]  ;;  %v6521_v0 = vld [vmem:[%s7529_s2 + $0x34] sm:$0xf0] }
 0xcea   : > { %v6103_v6 = vor.u32 %v6522_v3, %v6100_v5  ;;  %v6520_v9 = vld [vmem:[%s7529_s2 + $0x34] sm:$0xf]  ;;  %v6092_v12 = vld [vmem:[%s7529_s2 + $0x38] sm:$0xf0]  ;;  %v6082_v14 = vld [vmem:[%s7529_s2 + $0x20] sm:$0xf] }
 0xceb   : > { %4480 = vmatpush.bf16.msrb.mxu3 %v6115_v55  ;;  %v6095_v13 = vor.u32 %v6520_v9, %v6092_v12  ;;  %v6519_v15 = vld [vmem:[%s7529_s2 + $0x24] sm:$0xf0]  ;;  %v6518_v16 = vld [vmem:[%s7529_s2 + $0x24] sm:$0xf]  ;;  %v6084_v18 = vld [vmem:[%s7529_s2 + $0x28] sm:$0xf0] }
 0xcec   : > { %v4188_v22 = vpop.f32.mrf.mxu3  ;;  %4493 = vmatpush.bf16.msrb.mxu0 %v6119_v57  ;;  %v6083_v17 = vor.u32 %v6519_v15, %v6082_v14  ;;  %v6087_v19 = vor.u32 %v6518_v16, %v6084_v18  ;;  %v6074_v21 = vld [vmem:[%s7529_s2 + $0x10] sm:$0xf]  ;;  %v6516_v24 = vld [vmem:[%s7529_s2 + $0x14] sm:$0xf]  ;;  %v6066_v28 = vld [vmem:[%s7529_s2] sm:$0xf] }
 0xced   : > { %4253 = vrot.lane.b32.xlu0 %v4188_v22, %s6705_s10  ;;  %v6517_v22 = vld [vmem:[%s7529_s2 + $0x14] sm:$0xf0]  ;;  %v6515_v29 = vld [vmem:[%s7529_s2 + $0x4] sm:$0xf0]  ;;  %v6514_v30 = vld [vmem:[%s7529_s2 + $0x4] sm:$0xf] }
 0xcee   : > { %v6067_v54 = vor.u32 %v6515_v29, %v6066_v28  ;;  %v6068_v23 = vld [vmem:[%s7529_s2 + $0x8] sm:$0xf0]  ;;  %s7531_s10 = sld [smem:[#allocation9_spill]]  ;;  %v6609_v47 = vld [vmem:[%s7532_s11] ss:$0 sm:$0xff] }
 0xcef   : > { %4481 = vmatpush.bf16.msrb.mxu3 %v6107_v62 }
 0xcf0   : > { %4494 = vmatpush.bf16.msrb.mxu0 %v6111_v34  ;;  %v4393_v34 = vld [vmem:[%s7533_s16] sm:$0x3] }
 0xcf1   : > { %v4396_v2 = vperm.slane %v4393_v34, 1 }
 0xcf3   : > { %4482 = vmatpush.bf16.msrb.mxu3 %v6099_v4 }
 0xcf4   : > { %v4190_v25 = vpop.f32.mrf.mxu3  ;;  %4495 = vmatpush.bf16.msrb.mxu0 %v6103_v6  ;;  %v6608_v44 = vld [vmem:[%s7531_s10] ss:$0 sm:$0xff]  ;;  %v4395_v6 = vperm.slane %v4393_v34, 0 }
 0xcf5   : > { %v6075_v25 = vor.u32 %v6517_v22, %v6074_v21 }
 0xcf8   : > { %4496 = vmatpush.bf16.msrb.mxu0 %v6095_v13 }
 0xcfc   : > { %4497 = vmatpush.bf16.msrb.mxu0 %v6087_v19 }
 0xcfe   : > { %v4244_v26 = vpop.f32.mrf.mxu1 }
 0xcff   : > { %4257 = vrot.lane.b32.xlu2 %v4244_v26, %s6704_s7  ;;  %s7530_s7 = sld [smem:[#allocation13_spill]]  ;;  %v6076_v26 = vld [vmem:[%s7529_s2 + $0x18] sm:$0xf0] }
 0xd05   : > { %v6543_v52 = vld [vmem:[%s7530_s7 + $0x68] sm:$0xff]  ;;  %v6536_v53 = vld [vmem:[%s7530_s7 + $0x30] sm:$0xff]  ;;  %v6542_v45 = vld [vmem:[%s7530_s7 + $0x60] sm:$0xff] }
 0xd06   : > { %v4246_v27 = vpop.f32.mrf.mxu1  ;;  %v6541_v55 = vld [vmem:[%s7530_s7 + $0x58] sm:$0xff]  ;;  %v6534_v56 = vld [vmem:[%s7530_s7 + $0x20] sm:$0xff]  ;;  %v6540_v57 = vld [vmem:[%s7530_s7 + $0x50] sm:$0xff] }
 0xd07   : > { %v6079_v27 = vor.u32 %v6516_v24, %v6076_v26  ;;  %v6533_v58 = vld [vmem:[%s7530_s7 + $0x18] sm:$0xff]  ;;  %v6539_v59 = vld [vmem:[%s7530_s7 + $0x48] sm:$0xff]  ;;  %v6532_v60 = vld [vmem:[%s7530_s7 + $0x10] sm:$0xff] }
 0xd08   : > { %v6538_v62 = vld [vmem:[%s7530_s7 + $0x40] sm:$0xff]  ;;  %v6531_v63 = vld [vmem:[%s7530_s7 + $0x8] sm:$0xff] }
 0xd09   : > { %4498 = vmatpush.bf16.msrb.mxu0 %v6079_v27  ;;  %v6530_v1 = vld [vmem:[%s7530_s7] sm:$0xff] }
 0xd50   : > { %v4250_v31 = vpop.permute.xlu0 %4249 }
 0xd51   : > { %v4260_v33 = vsel %vm3124_vm4, %v4073_v10, %v4250_v31  ;;  %v6091_v10 = vor.u32 %v6521_v0, %v6090_v7  ;;  %v6071_v31 = vor.u32 %v6514_v30, %v6068_v23 }
 0xd53   : > { %4483 = vmatpush.bf16.msrb.mxu3 %v6091_v10  ;;  %4499 = vmatpush.bf16.msrb.mxu0 %v6071_v31  ;;  %v6610_v31 = vld [vmem:[%s7534_s18] ss:$0 sm:$0xff] }
 0xd57   : > { %4484 = vmatpush.bf16.msrb.mxu3 %v6083_v17 }
 0xd59   : > { %v4258_v36 = vpop.permute.xlu2 %4257 }
 0xd5b   : > { %4485 = vmatpush.bf16.msrb.mxu3 %v6075_v25 }
 0xd5f   : > { %v4254_v35 = vpop.permute.xlu0 %4253  ;;  %4486 = vmatpush.bf16.msrb.mxu3 %v6067_v54 }
 0xd60   : > { %v4261_v32 = vsel %vm3361_vm8, %v4260_v33, %v4254_v35  ;;  %v6545_v33 = vld [vmem:[%s7530_s7 + $0x78] sm:$0xff] }
 0xd61   : > { %v4262_v37 = vsel %vm3363_vm9, %v4261_v32, %v4258_v36  ;;  %4670 = vmatpush.bf16.msrb.mxu2 %v6545_v33  ;;  %v6544_v32 = vld [vmem:[%s7530_s7 + $0x70] sm:$0xff] }
 0xd62   : > { %v4263_v38 = vpack.c.bf16 %v4262_v37, %v4262_v37 }
 0xd64   : > { %4340 = vmatmul.bf16.vlgmr.msra.gmra.mxu2 %v4263_v38 }
 0xd65   : > { %4671 = vmatpush.bf16.msrb.mxu2 %v6544_v32 }
 0xd69   : > { %4672 = vmatpush.bf16.msrb.mxu2 %v6543_v52  ;;  %v6546_v52 = vld [vmem:[%s6860_s4] sm:$0xff] }
 0xd6d   : > { %4673 = vmatpush.bf16.msrb.mxu2 %v6542_v45 }
 0xd71   : > { %4674 = vmatpush.bf16.msrb.mxu2 %v6541_v55 }
 0xd75   : > { %4675 = vmatpush.bf16.msrb.mxu2 %v6540_v57 }
 0xd79   : > { %4676 = vmatpush.bf16.msrb.mxu2 %v6539_v59 }
 0xd7d   : > { %4677 = vmatpush.bf16.msrb.mxu2 %v6538_v62  ;;  %v4684_v62 = vld [vmem:[%s7535_s0] sm:$0x1] }
 0xde7   : > { %v4341_v40 = vpop.f32.mrf.mxu2 }
 0xde8   : > { %v4342_v11 = vadd.f32 %v6607_v39, %v4341_v40 }
 0xdea   : > { %v7420_v41 = vadd.f32 %v4342_v11, %v7299_v20 }
 0xdec   : > { %4348 = vadd.xlane.f32.xlu0 %v7420_v41 }
 0xdef   : > { %v4343_v42 = vpop.f32.mrf.mxu2 }
 0xe5f   : > { %v4349_v20 = vpop.xlane.xlu0 %4348 }
 0xe60   : > { %v4350_v49 = vmul.f32 %v4349_v20, %v7119_v8 }
 0xe62   : > { %v7429_v50 = vsub.f32 %v7420_v41, %v4350_v49 }
 0xe64   : > { %v4352_v51 = vmul.f32 %v7429_v50, %v7429_v50 }
 0xe66   : > { %4353 = vadd.xlane.f32.xlu1 %v4352_v51  ;;  %v6537_v51 = vld [vmem:[%s7530_s7 + $0x38] sm:$0xff] }
 0xe67   : > { %4657 = vmatpush.bf16.msrb.mxu1 %v6537_v51  ;;  %v6547_v51 = vld [vmem:[%s6860_s4 + $0x8] sm:$0xff] }
 0xe6b   : > { %4658 = vmatpush.bf16.msrb.mxu1 %v6536_v53 }
 0xed9   : > { %v4354_v35 = vpop.xlane.xlu1 %4353 }
 0xeda   : > { %v4355_v36 = vmul.f32 %v4354_v35, %v7119_v8 }
 0xedc   : > { %v4356_v37 = vadd.f32 1e-06, %v4355_v36 }
 0xede   : > { %6655 = vrsqrt.f32 %v4356_v37  ;;  %vm4363_vm1 = vweird.f32 %v4356_v37 }
 0xee4   : > { %v6656_v38 = vpop.eup %6655 }
 0xee5   : > { %v4358_v39 = vmul.f32 %v6656_v38, %v4356_v37  ;;  %vm4364_vm0 = vweird.f32 %v6656_v38 }
 0xee6   : > { %vm4365_vm2 = vmor %vm4363_vm1, %vm4364_vm0 }
 0xee7   : > { %v4359_v40 = vmul.f32 %v6656_v38, %v4358_v39 }
 0xee9   : > { %v4360_v11 = vmul.f32 0.5, %v4359_v40 }
 0xeeb   : > { %v4361_v42 = vsub.f32 1.5, %v4360_v11  ;;  %v6553_v11 = vld [vmem:[%s6860_s4 + $0x38] sm:$0xff] }
 0xeec   : > { %4777 = vmatpush.bf16.msra.mxu3 %v6553_v11 }
 0xeed   : > { %v4362_v43 = vmul.f32 %v6656_v38, %v4361_v42 }
 0xeef   : > { %v4366_v46 = vsel %vm4365_vm2, %v6656_v38, %v4362_v43 }
 0xef0   : > { %v4367_v61 = vmul.f32 %v4366_v46, %v7429_v50  ;;  %v6535_v50 = vld [vmem:[%s7530_s7 + $0x28] sm:$0xff] }
 0xef1   : > { %4659 = vmatpush.bf16.msrb.mxu1 %v6535_v50 }
 0xef2   : > { %v4371_v48 = vmul.f32 %v6608_v44, %v4367_v61 }
 0xef4   : > { %v4375_v20 = vadd.f32 %v6609_v47, %v4371_v48  ;;  %v6552_v47 = vld [vmem:[%s6860_s4 + $0x30] sm:$0xff]  ;;  %v6550_v48 = vld [vmem:[%s6860_s4 + $0x20] sm:$0xff] }
 0xef5   : > { %4660 = vmatpush.bf16.msrb.mxu1 %v6534_v56  ;;  %4778 = vmatpush.bf16.msra.mxu3 %v6552_v47 }
 0xef6   : > { %v4376_v49 = vpack.c.bf16 %v4375_v20, %v4375_v20  ;;  %v6549_v20 = vld [vmem:[%s6860_s4 + $0x18] sm:$0xff] }
 0xef8   : > { %4487 = vmatmul.bf16.vlgmr.msrb.gmra.mxu3 %v4376_v49  ;;  %4500 = vmatmul.bf16.vlgmr.msrb.gmra.mxu0 %v4376_v49  ;;  %v6548_v49 = vld [vmem:[%s6860_s4 + $0x10] sm:$0xff] }
 0xef9   : > { %4661 = vmatpush.bf16.msrb.mxu1 %v6533_v58 }
 0xefd   : > { %4662 = vmatpush.bf16.msrb.mxu1 %v6532_v60 }
 0xf01   : > { %4663 = vmatpush.bf16.msrb.mxu1 %v6531_v63 }
 0xf05   : > { %4664 = vmatpush.bf16.msrb.mxu1 %v6530_v1  ;;  %v4685_v1 = vld [vmem:[%s6855_s27] sm:$0x1] }
 0xf75   : > { %v4501_v3 = vpop.f32.mrf.mxu0 }
 0xf76   : > { %v4502_v4 = vadd.f32 %v4501_v3, %v4396_v2 }
 0xf78   : > { %v4508_v5 = vmul.f32 %v4502_v4, %v4502_v4  ;;  %v4506_v24 = vmul.f32 0.5, %v4502_v4 }
 0xf7a   : > { %v4510_v7 = vmul.f32 %v4508_v5, %v4502_v4 }
 0xf7b   : > { %v4488_v0 = vpop.f32.mrf.mxu3 }
 0xf7c   : > { %v4512_v9 = vmul.f32 0.044715, %v4510_v7  ;;  %v4489_v10 = vadd.f32 %v4488_v0, %v4395_v6 }
 0xf7d   : > { %v4503_v12 = vpop.f32.mrf.mxu0 }
 0xf7e   : > { %v4514_v13 = vadd.f32 %v4512_v9, %v4502_v4  ;;  %v4507_v14 = vmul.f32 %v4489_v10, %v4489_v10  ;;  %v4505_v29 = vmul.f32 0.5, %v4489_v10  ;;  %v4728_v4 = vld [vmem:[%s6865_s12] sm:$0x1] }
 0xf80   : > { %v4516_v15 = vmul.f32 0.7978846, %v4514_v13  ;;  %v4509_v16 = vmul.f32 %v4507_v14, %v4489_v10 }
 0xf82   : > { %6657 = vtanh.f32 %v4516_v15  ;;  %v4511_v17 = vmul.f32 0.044715, %v4509_v16 }
 0xf83   : > { %v4490_v18 = vpop.f32.mrf.mxu3 }
 0xf84   : > { %v4513_v19 = vadd.f32 %v4511_v17, %v4489_v10 }
 0xf86   : > { %v4515_v21 = vmul.f32 0.7978846, %v4513_v19 }
 0xf88   : > { %v6658_v22 = vpop.eup %6657  ;;  %6659 = vtanh.f32 %v4515_v21 }
 0xf89   : > { %v4520_v25 = vadd.f32 1.0, %v6658_v22 }
 0xf8b   : > { %v4522_v26 = vmul.f32 %v4520_v25, %v4506_v24 }
 0xf8d   : > { %v4524_v27 = vpack.c.bf16 %v4522_v26, %v4522_v26 }
 0xf8e   : > { %v6660_v28 = vpop.eup %6659 }
 0xf8f   : > { %v4519_v30 = vadd.f32 1.0, %v6660_v28  ;;  %4678 = vmatmul.bf16.vlgmr.msrb.gmra.mxu2 %v4524_v27 }
 0xf91   : > { %v4521_v54 = vmul.f32 %v4519_v30, %v4505_v29 }
 0xf93   : > { %v4523_v23 = vpack.c.bf16 %v4521_v54, %v4521_v54 }
 0xf95   : > { %4665 = vmatmul.bf16.vlgmr.msrb.gmra.mxu1 %v4523_v23 }
0x1012   : > { %v4666_v33 = vpop.f32.mrf.mxu1  ;;  %v4679_v35 = vpop.f32.mrf.mxu2 }
0x1013   : > { %v4667_v36 = vadd.f32 %v6610_v31, %v4666_v33 }
0x1015   : > { %v4680_v32 = vadd.f32 %v4679_v35, %v4667_v36 }
0x1017   : > { %v4683_v37 = vadd.f32 %v4680_v32, %v7420_v41  ;;  %v6551_v41 = vld [vmem:[%s6860_s4 + $0x28] sm:$0xff] }
0x1018   : > { %4779 = vmatpush.bf16.msra.mxu3 %v6551_v41 }
0x1019   : > { %v4687_v38 = vsel %vm4686_vm3, %v4683_v37, 0.0 }
0x101a   : > { %v4668_v39 = vpop.f32.mrf.mxu1  ;;  %v4681_v40 = vpop.f32.mrf.mxu2  ;;  %4688 = vadd.xlane.f32.xlu2 %v4687_v38 }
0x101c   : > { %4780 = vmatpush.bf16.msra.mxu3 %v6550_v48 }
0x1020   : > { %4781 = vmatpush.bf16.msra.mxu3 %v6549_v20 }
0x1024   : > { %4782 = vmatpush.bf16.msra.mxu3 %v6548_v49 }
0x1028   : > { %4783 = vmatpush.bf16.msra.mxu3 %v6547_v51 }
0x102c   : > { %4784 = vmatpush.bf16.msra.mxu3 %v6546_v52 }
0x108d   : > { %v4689_v42 = vpop.xlane.xlu2 %4688 }
0x108e   : > { %v4690_v43 = vmul.f32 %v4689_v42, %v7119_v8 }
0x1090   : > { %v4691_v44 = vsub.f32 %v4683_v37, %v4690_v43 }
0x1092   : > { %v4692_v46 = vmul.f32 %v4691_v44, %v4691_v44 }
0x1094   : > { %v4693_v61 = vsel %vm4686_vm3, %v4692_v46, 0.0 }
0x1095   : > { %4694 = vadd.xlane.f32.xlu0 %v4693_v61 }
0x1108   : > { %v4695_v53 = vpop.xlane.xlu0 %4694 }
0x1109   : > { %v4696_v45 = vmul.f32 %v4695_v53, %v7119_v8 }
0x110b   : > { %v4697_v50 = vadd.f32 1e-06, %v4696_v45 }
0x110d   : > { %6661 = vrsqrt.f32 %v4697_v50  ;;  %vm4704_vm5 = vweird.f32 %v4697_v50 }
0x1113   : > { %v6662_v55 = vpop.eup %6661 }
0x1114   : > { %v4699_v56 = vmul.f32 %v6662_v55, %v4697_v50  ;;  %vm4705_vm4 = vweird.f32 %v6662_v55 }
0x1115   : > { %vm4706_vm6 = vmor %vm4704_vm5, %vm4705_vm4 }
0x1116   : > { %v4700_v57 = vmul.f32 %v6662_v55, %v4699_v56 }
0x1118   : > { %v4701_v58 = vmul.f32 0.5, %v4700_v57 }
0x111a   : > { %v4702_v59 = vsub.f32 1.5, %v4701_v58 }
0x111c   : > { %v4703_v60 = vmul.f32 %v6662_v55, %v4702_v59 }
0x111e   : > { %v4707_v63 = vsel %vm4706_vm6, %v6662_v55, %v4703_v60 }
0x111f   : > { %v4708_v34 = vmul.f32 %v4707_v63, %v4691_v44 }
0x1121   : > { %v4709_v2 = vmul.f32 %v4708_v34, %v4684_v62 }
0x1123   : > { %v4710_v8 = vadd.f32 %v4709_v2, %v4685_v1 }
0x1125   : > { %v4711_v3 = vpack.c.bf16 %v4710_v8, %v4710_v8 }
0x1127   : > { %4785 = vmatmul.bf16.vlgmr.msra.gmra.mxu3 %v4711_v3 }
0x11aa   : > { %v4786_v5 = vpop.f32.mrf.mxu3 }
0x11ab   : > { %v4787_v6 = vadd.f32 %v4786_v5, %v4728_v4 }
0x11ad   : > { %v4790_v7 = vperm.slane %v4787_v6, 0 }
0x11af   : > { %4791 = vst [vmem:[%s973_s1] sm:$0xff] %v4790_v7 }
0x11b2   : > { %v4788_v0 = vpop.f32.mrf.mxu3 }
0x11b3 PF: > { %s73_s22 = sadd.s32 1, %s6669_s22  }
0x11b4   : > { %p70_p4 = scmp.ge.s32.totalorder %s73_s22, 4  }
0x11b6   :  { %72 = sbr.rel (!%p70_p4) target bundleno = 55 (0x37), region = 208 }

</bundles_post_ra>
